<compile_context>
chip_gen: v7x
topology: tpu7x:2x2x1
jax: 0.10.0
libtpu: 0.0.40
codegen_flags: <defaults>
</compile_context>

<pallas_src>
import jax
import jax.numpy as jnp
from jax import lax
from jax.experimental import pallas as pl
from jax.experimental.pallas import tpu as pltpu


BN_EPS = 1e-5


def _make_kernel(N, C, H, W, OFF, L, Pc):
    """Fused residual-block kernel for fixed (N, C, H, W) and lane layout."""
    Hp, Wp = H + 2, W + 2
    P = Hp * Wp                       # flattened padded spatial extent
    NC = N * C                        # packed sublane rows (row r = n*C + c)
    inv_count = 1.0 / float(N * H * W)

    def conv3x3(scr_ref, w_ref):
        # scr_ref: (C, NC, L) — channel ci's padded plane, replicated across the C
        #          output-channel sublane groups, data at lanes [OFF, OFF+Pc) with
        #          zero guard bands of width >= Wp+1 on both sides.
        # w_ref:   (NC, 9*C) f32; w_ref[n*C+co, (kh*3+kw)*C+ci] = w[kh, kw, ci, co].
        # Returns the (NC, Pc) conv output (rows n*C+co).  Conv bias is omitted: it is
        # cancelled exactly by the training-mode BatchNorm that follows.
        acc = jnp.zeros((NC, Pc), jnp.float32)
        for kh in range(3):
            for kw in range(3):
                s = (kh - 1) * Wp + (kw - 1)           # constant flat shift of this tap
                base = OFF + s                         # static, in-bounds lane offset
                for ci in range(C):
                    j = (kh * 3 + kw) * C + ci
                    tap = scr_ref[ci, :, base:base + Pc]   # (NC, Pc) full-sublane tap
                    col = w_ref[:, j:j + 1]                # (NC, 1) weight column
                    acc = acc + tap * col
        return acc

    def combine_over_batch(v):
        # v: (NC, 1) per-row lane sums (rows n*C+c) -> per-channel totals over the
        # batch, replicated back to every row, shape (NC, 1).
        tot = v[0:C]
        for n in range(1, N):
            tot = tot + v[n * C:(n + 1) * C]
        return jnp.concatenate([tot] * N, axis=0)

    def kernel(x_ref, mask_ref, w1_ref, bn1_ref, w2_ref, bn2_ref, out_ref, scr_ref):
        # x_ref   : (NC, L)   zero-padded input planes, rows n*C+c, data at [OFF, OFF+P)
        # mask_ref: (1, Pc)   1.0 at valid interior positions, 0.0 at halo / lane pad
        # w*_ref  : (NC, 9*C) per-row conv weight columns
        # bn*_ref : (2, NC, 1) row-expanded gamma / beta
        # out_ref : (NC, Pc)
        # scr_ref : (C, NC, L) VMEM scratch holding the replicated conv-tap planes
        maskb = jnp.broadcast_to(mask_ref[...], (NC, Pc)) > 0.0   # hoisted once

        def bn(h, bn_ref):
            # Training-mode BatchNorm (biased variance over (N, H, W) valid positions),
            # centered two-pass variance for robustness, folded into one per-row FMA.
            hv = jnp.where(maskb, h, 0.0)
            s1 = jnp.sum(hv, axis=1, keepdims=True)                  # (NC, 1)
            mean = combine_over_batch(s1) * inv_count                # (NC, 1) per-chan
            d = jnp.where(maskb, h - mean, 0.0)
            s2 = jnp.sum(d * d, axis=1, keepdims=True)               # (NC, 1)
            var = combine_over_batch(s2) * inv_count                 # (NC, 1) per-chan
            scale = bn_ref[0] * lax.rsqrt(var + BN_EPS)              # gamma * rsqrt
            shift = bn_ref[1] - mean * scale                         # beta - mean*scale
            return h * scale + shift

        # ---- stage x into the replicated conv-tap layout; this also copies x's zero
        #      guard margins, so no explicit margin zeroing is needed anywhere ----
        for ci in range(C):
            pieces = [jnp.broadcast_to(x_ref[n * C + ci:n * C + ci + 1, :], (C, L))
                      for n in range(N)]
            scr_ref[ci, :, :] = jnp.concatenate(pieces, axis=0)

        # ---- conv1 -> BN1 -> ReLU (masked so conv2 sees zero halo padding) ----
        h1 = conv3x3(scr_ref, w1_ref)
        a1 = jnp.where(maskb, jnp.maximum(bn(h1, bn1_ref), 0.0), 0.0)

        # ---- restage the intermediate for conv2 (only the data window is rewritten;
        #      the +/-(Wp+1) guard bands keep the zeros copied from x) ----
        for ci in range(C):
            pieces = [jnp.broadcast_to(a1[n * C + ci:n * C + ci + 1, :], (C, Pc))
                      for n in range(N)]
            scr_ref[ci, :, OFF:OFF + Pc] = jnp.concatenate(pieces, axis=0)

        # ---- conv2 -> BN2 -> residual add -> ReLU ----
        h2 = conv3x3(scr_ref, w2_ref)
        y = bn(h2, bn2_ref)
        res = x_ref[:, OFF:OFF + Pc]            # residual = already-resident padded x
        out_ref[...] = jnp.maximum(y + res, 0.0)

    return kernel


@jax.jit
def residual_block(x_nchw, params):
    """Pallas implementation of ResidualBlock.forward.  x_nchw: (N, C, H, W) float32."""
    (w1, b1, g1, be1, w2, b2, g2, be2) = params
    del b1, b2   # exactly cancelled by training-mode batch-stat BatchNorm (see header)

    x = x_nchw.astype(jnp.float32)
    Nb, C, H, W = x.shape
    Hp, Wp = H + 2, W + 2
    P = Hp * Wp
    NC = Nb * C
    G = Wp + 1                                   # halo reach of a 3x3 tap (flat shift)
    Pc = ((P + 127) // 128) * 128                # compute width: full vregs
    OFF = ((G + 31) // 32) * 32                  # small left margin (>= G)
    L = ((OFF + Pc + G + 63) // 64) * 64         # total input lane width

    # (N, C, H, W) -> (N*C, L): zero spatial halo + lane margins; rows are n*C+c so no
    # transpose is needed on either side of the kernel.
    xp = jnp.pad(x, ((0, 0), (0, 0), (1, 1), (1, 1))).reshape(NC, P)
    x_lin = jnp.pad(xp, ((0, 0), (OFF, L - OFF - P)))

    # Validity mask over the compute window (1 inside, 0 on halo ring and lane pad).
    mask = jnp.pad(
        jnp.pad(jnp.ones((H, W), jnp.float32), ((1, 1), (1, 1))).reshape(1, P),
        ((0, 0), (0, Pc - P)))

    def wcols(w):
        # (3, 3, Cin, Cout) HWIO -> (NC, 9*C) per-row weight columns:
        # wcols[n*C+co, (kh*3+kw)*C+ci] = w[kh, kw, ci, co]
        return jnp.tile(w.astype(jnp.float32).reshape(9 * C, C).T, (Nb, 1))

    def bnrows(g, b):
        # -> (2, NC, 1) row-expanded gamma / beta (row n*C+co -> channel co)
        return jnp.stack([jnp.tile(g.astype(jnp.float32), Nb),
                          jnp.tile(b.astype(jnp.float32), Nb)]).reshape(2, NC, 1)

    vmem = pl.BlockSpec(memory_space=pltpu.MemorySpace.VMEM)
    out = pl.pallas_call(
        _make_kernel(Nb, C, H, W, OFF, L, Pc),
        out_shape=jax.ShapeDtypeStruct((NC, Pc), jnp.float32),
        in_specs=[vmem, vmem, vmem, vmem, vmem, vmem],
        out_specs=vmem,
        scratch_shapes=[pltpu.VMEM((C, NC, L), jnp.float32)],
    )(x_lin, mask, wcols(w1), bnrows(g1, be1), wcols(w2), bnrows(g2, be2))

    # Crop lane pad + halo ring; rows are already n-major/channel-minor, i.e. NCHW.
    return out[:, :P].reshape(Nb, C, Hp, Wp)[:, :, 1:H + 1, 1:W + 1]


def init_params(key, channel):
    """Deterministic parameter init (conv weights in (3,3,Cin,Cout), BN gamma=1, beta=0)."""
    k1, k2, k3, k4 = jax.random.split(key, 4)
    fan_in = channel * 3 * 3
    bound = 1.0 / jnp.sqrt(fan_in)
    w1 = jax.random.uniform(k1, (3, 3, channel, channel), jnp.float32, -bound, bound)
    b1 = jax.random.uniform(k2, (channel,), jnp.float32, -bound, bound)
    w2 = jax.random.uniform(k3, (3, 3, channel, channel), jnp.float32, -bound, bound)
    b2 = jax.random.uniform(k4, (channel,), jnp.float32, -bound, bound)
    g1 = jnp.ones((channel,), jnp.float32)
    be1 = jnp.zeros((channel,), jnp.float32)
    g2 = jnp.ones((channel,), jnp.float32)
    be2 = jnp.zeros((channel,), jnp.float32)
    return (w1, b1, g1, be1, w2, b2, g2, be2)


def residual_block_ref(x_nchw, params):
    """Pure-JAX reference (faithful to the PyTorch module, incl. conv biases)."""
    (w1, b1, g1, be1, w2, b2, g2, be2) = params
    x = jnp.transpose(x_nchw, (0, 2, 3, 1)).astype(jnp.float32)
    dn = ('NHWC', 'HWIO', 'NHWC')

    def conv(h, w, b):
        y = lax.conv_general_dilated(h, w, (1, 1), 'SAME', dimension_numbers=dn,
                                     precision=lax.Precision.HIGHEST)
        return y + b

    def bn(h, g, be):
        m = jnp.mean(h, axis=(0, 1, 2), keepdims=True)
        v = jnp.mean(jnp.square(h - m), axis=(0, 1, 2), keepdims=True)
        return (h - m) * lax.rsqrt(v + BN_EPS) * g + be

    h = jnp.maximum(bn(conv(x, w1, b1), g1, be1), 0.0)
    h = bn(conv(h, w2, b2), g2, be2)
    out = jnp.maximum(h + x, 0.0)
    return jnp.transpose(out, (0, 3, 1, 2))


if __name__ == "__main__":
    key = jax.random.PRNGKey(0)
    kx, kp = jax.random.split(key)

    N, C, H, W = 2, 4, 16, 16
    x = jax.random.normal(kx, (N, C, H, W), jnp.float32)
    params = init_params(kp, C)

    out = jax.block_until_ready(residual_block(x, params))
    ref = residual_block_ref(x, params)

    assert out.shape == (N, C, H, W)
    assert jnp.allclose(out, ref, atol=1e-3, rtol=1e-3), "Pallas kernel mismatch vs reference"

    print("KERNEL_OK")
</pallas_src>

<mosaic_0001>
module attributes {stable_mosaic.version = 11 : i64} {
  func.func @kernel(%arg0: memref<8x448xf32, #tpu.memory_space<vmem>>, %arg1: memref<1x384xf32, #tpu.memory_space<vmem>>, %arg2: memref<8x36xf32, #tpu.memory_space<vmem>>, %arg3: memref<2x8x1xf32, #tpu.memory_space<vmem>>, %arg4: memref<8x36xf32, #tpu.memory_space<vmem>>, %arg5: memref<2x8x1xf32, #tpu.memory_space<vmem>>, %arg6: memref<8x384xf32, #tpu.memory_space<vmem>>, %arg7: memref<4x8x448xf32, #tpu.memory_space<vmem>>) attributes {dimension_semantics = [], scalar_prefetch = 0 : i64, scratch_operands = 1 : i64, tpu.core_type = #tpu.core_type<tc>} {
    %c0 = arith.constant 0 : index
    %c0_0 = arith.constant 0 : index
    %0 = vector.load %arg1[%c0, %c0_0] : memref<1x384xf32, #tpu.memory_space<vmem>>, vector<1x384xf32>
    %1 = vector.shape_cast %0 : vector<1x384xf32> to vector<1x384xf32>
    %2 = vector.broadcast %1 : vector<1x384xf32> to vector<8x384xf32>
    %cst = arith.constant 0.000000e+00 : f32
    %3 = vector.broadcast %cst : f32 to vector<8x384xf32>
    %4 = arith.cmpf ogt, %2, %3 : vector<8x384xf32>
    %c0_1 = arith.constant 0 : index
    %c0_2 = arith.constant 0 : index
    %5 = vector.load %arg0[%c0_1, %c0_2] : memref<8x448xf32, #tpu.memory_space<vmem>>, vector<1x448xf32>
    %6 = vector.shape_cast %5 : vector<1x448xf32> to vector<1x448xf32>
    %7 = vector.broadcast %6 : vector<1x448xf32> to vector<4x448xf32>
    %c4 = arith.constant 4 : index
    %c0_3 = arith.constant 0 : index
    %8 = vector.load %arg0[%c4, %c0_3] : memref<8x448xf32, #tpu.memory_space<vmem>>, vector<1x448xf32>
    %9 = vector.shape_cast %8 : vector<1x448xf32> to vector<1x448xf32>
    %10 = vector.broadcast %9 : vector<1x448xf32> to vector<4x448xf32>
    %11 = tpu.concatenate %7, %10 in 0 : vector<4x448xf32>, vector<4x448xf32> -> vector<8x448xf32>
    %c0_4 = arith.constant 0 : index
    %c0_5 = arith.constant 0 : index
    %c0_6 = arith.constant 0 : index
    %12 = vector.load %arg7[%c0_4, %c0_5, %c0_6] : memref<4x8x448xf32, #tpu.memory_space<vmem>>, vector<1x8x448xf32>
    %13 = vector.shape_cast %12 : vector<1x8x448xf32> to vector<8x448xf32>
    %14 = vector.shape_cast %11 : vector<8x448xf32> to vector<1x8x448xf32>
    tpu.vector_store %arg7[%c0_4, %c0_5, %c0_6], %14 {strides = array<i32>} : memref<4x8x448xf32, #tpu.memory_space<vmem>>, vector<1x8x448xf32>,
    %c1 = arith.constant 1 : index
    %c0_7 = arith.constant 0 : index
    %15 = vector.load %arg0[%c1, %c0_7] : memref<8x448xf32, #tpu.memory_space<vmem>>, vector<1x448xf32>
    %16 = vector.shape_cast %15 : vector<1x448xf32> to vector<1x448xf32>
    %17 = vector.broadcast %16 : vector<1x448xf32> to vector<4x448xf32>
    %c5 = arith.constant 5 : index
    %c0_8 = arith.constant 0 : index
    %18 = vector.load %arg0[%c5, %c0_8] : memref<8x448xf32, #tpu.memory_space<vmem>>, vector<1x448xf32>
    %19 = vector.shape_cast %18 : vector<1x448xf32> to vector<1x448xf32>
    %20 = vector.broadcast %19 : vector<1x448xf32> to vector<4x448xf32>
    %21 = tpu.concatenate %17, %20 in 0 : vector<4x448xf32>, vector<4x448xf32> -> vector<8x448xf32>
    %c1_9 = arith.constant 1 : index
    %c0_10 = arith.constant 0 : index
    %c0_11 = arith.constant 0 : index
    %22 = vector.load %arg7[%c1_9, %c0_10, %c0_11] : memref<4x8x448xf32, #tpu.memory_space<vmem>>, vector<1x8x448xf32>
    %23 = vector.shape_cast %22 : vector<1x8x448xf32> to vector<8x448xf32>
    %24 = vector.shape_cast %21 : vector<8x448xf32> to vector<1x8x448xf32>
    tpu.vector_store %arg7[%c1_9, %c0_10, %c0_11], %24 {strides = array<i32>} : memref<4x8x448xf32, #tpu.memory_space<vmem>>, vector<1x8x448xf32>,
    %c2 = arith.constant 2 : index
    %c0_12 = arith.constant 0 : index
    %25 = vector.load %arg0[%c2, %c0_12] : memref<8x448xf32, #tpu.memory_space<vmem>>, vector<1x448xf32>
    %26 = vector.shape_cast %25 : vector<1x448xf32> to vector<1x448xf32>
    %27 = vector.broadcast %26 : vector<1x448xf32> to vector<4x448xf32>
    %c6 = arith.constant 6 : index
    %c0_13 = arith.constant 0 : index
    %28 = vector.load %arg0[%c6, %c0_13] : memref<8x448xf32, #tpu.memory_space<vmem>>, vector<1x448xf32>
    %29 = vector.shape_cast %28 : vector<1x448xf32> to vector<1x448xf32>
    %30 = vector.broadcast %29 : vector<1x448xf32> to vector<4x448xf32>
    %31 = tpu.concatenate %27, %30 in 0 : vector<4x448xf32>, vector<4x448xf32> -> vector<8x448xf32>
    %c2_14 = arith.constant 2 : index
    %c0_15 = arith.constant 0 : index
    %c0_16 = arith.constant 0 : index
    %32 = vector.load %arg7[%c2_14, %c0_15, %c0_16] : memref<4x8x448xf32, #tpu.memory_space<vmem>>, vector<1x8x448xf32>
    %33 = vector.shape_cast %32 : vector<1x8x448xf32> to vector<8x448xf32>
    %34 = vector.shape_cast %31 : vector<8x448xf32> to vector<1x8x448xf32>
    tpu.vector_store %arg7[%c2_14, %c0_15, %c0_16], %34 {strides = array<i32>} : memref<4x8x448xf32, #tpu.memory_space<vmem>>, vector<1x8x448xf32>,
    %c3 = arith.constant 3 : index
    %c0_17 = arith.constant 0 : index
    %35 = vector.load %arg0[%c3, %c0_17] : memref<8x448xf32, #tpu.memory_space<vmem>>, vector<1x448xf32>
    %36 = vector.shape_cast %35 : vector<1x448xf32> to vector<1x448xf32>
    %37 = vector.broadcast %36 : vector<1x448xf32> to vector<4x448xf32>
    %c7 = arith.constant 7 : index
    %c0_18 = arith.constant 0 : index
    %38 = vector.load %arg0[%c7, %c0_18] : memref<8x448xf32, #tpu.memory_space<vmem>>, vector<1x448xf32>
    %39 = vector.shape_cast %38 : vector<1x448xf32> to vector<1x448xf32>
    %40 = vector.broadcast %39 : vector<1x448xf32> to vector<4x448xf32>
    %41 = tpu.concatenate %37, %40 in 0 : vector<4x448xf32>, vector<4x448xf32> -> vector<8x448xf32>
    %c3_19 = arith.constant 3 : index
    %c0_20 = arith.constant 0 : index
    %c0_21 = arith.constant 0 : index
    %42 = vector.load %arg7[%c3_19, %c0_20, %c0_21] : memref<4x8x448xf32, #tpu.memory_space<vmem>>, vector<1x8x448xf32>
    %43 = vector.shape_cast %42 : vector<1x8x448xf32> to vector<8x448xf32>
    %44 = vector.shape_cast %41 : vector<8x448xf32> to vector<1x8x448xf32>
    tpu.vector_store %arg7[%c3_19, %c0_20, %c0_21], %44 {strides = array<i32>} : memref<4x8x448xf32, #tpu.memory_space<vmem>>, vector<1x8x448xf32>,
    %cst_22 = arith.constant 0.000000e+00 : f32
    %45 = vector.broadcast %cst_22 : f32 to vector<8x384xf32>
    %c0_23 = arith.constant 0 : index
    %c0_24 = arith.constant 0 : index
    %c13 = arith.constant 13 : index
    %46 = vector.load %arg7[%c0_23, %c0_24, %c13] : memref<4x8x448xf32, #tpu.memory_space<vmem>>, vector<1x8x384xf32>
    %47 = vector.shape_cast %46 : vector<1x8x384xf32> to vector<8x384xf32>
    %c0_25 = arith.constant 0 : index
    %c0_26 = arith.constant 0 : index
    %48 = vector.load %arg2[%c0_25, %c0_26] : memref<8x36xf32, #tpu.memory_space<vmem>>, vector<8x1xf32>
    %49 = vector.broadcast %48 : vector<8x1xf32> to vector<8x384xf32>
    %50 = arith.mulf %47, %49 : vector<8x384xf32>
    %51 = arith.addf %45, %50 : vector<8x384xf32>
    %c1_27 = arith.constant 1 : index
    %c0_28 = arith.constant 0 : index
    %c13_29 = arith.constant 13 : index
    %52 = vector.load %arg7[%c1_27, %c0_28, %c13_29] : memref<4x8x448xf32, #tpu.memory_space<vmem>>, vector<1x8x384xf32>
    %53 = vector.shape_cast %52 : vector<1x8x384xf32> to vector<8x384xf32>
    %c0_30 = arith.constant 0 : index
    %c1_31 = arith.constant 1 : index
    %54 = vector.load %arg2[%c0_30, %c1_31] : memref<8x36xf32, #tpu.memory_space<vmem>>, vector<8x1xf32>
    %55 = vector.broadcast %54 : vector<8x1xf32> to vector<8x384xf32>
    %56 = arith.mulf %53, %55 : vector<8x384xf32>
    %57 = arith.addf %51, %56 : vector<8x384xf32>
    %c2_32 = arith.constant 2 : index
    %c0_33 = arith.constant 0 : index
    %c13_34 = arith.constant 13 : index
    %58 = vector.load %arg7[%c2_32, %c0_33, %c13_34] : memref<4x8x448xf32, #tpu.memory_space<vmem>>, vector<1x8x384xf32>
    %59 = vector.shape_cast %58 : vector<1x8x384xf32> to vector<8x384xf32>
    %c0_35 = arith.constant 0 : index
    %c2_36 = arith.constant 2 : index
    %60 = vector.load %arg2[%c0_35, %c2_36] : memref<8x36xf32, #tpu.memory_space<vmem>>, vector<8x1xf32>
    %61 = vector.broadcast %60 : vector<8x1xf32> to vector<8x384xf32>
    %62 = arith.mulf %59, %61 : vector<8x384xf32>
    %63 = arith.addf %57, %62 : vector<8x384xf32>
    %c3_37 = arith.constant 3 : index
    %c0_38 = arith.constant 0 : index
    %c13_39 = arith.constant 13 : index
    %64 = vector.load %arg7[%c3_37, %c0_38, %c13_39] : memref<4x8x448xf32, #tpu.memory_space<vmem>>, vector<1x8x384xf32>
    %65 = vector.shape_cast %64 : vector<1x8x384xf32> to vector<8x384xf32>
    %c0_40 = arith.constant 0 : index
    %c3_41 = arith.constant 3 : index
    %66 = vector.load %arg2[%c0_40, %c3_41] : memref<8x36xf32, #tpu.memory_space<vmem>>, vector<8x1xf32>
    %67 = vector.broadcast %66 : vector<8x1xf32> to vector<8x384xf32>
    %68 = arith.mulf %65, %67 : vector<8x384xf32>
    %69 = arith.addf %63, %68 : vector<8x384xf32>
    %c0_42 = arith.constant 0 : index
    %c0_43 = arith.constant 0 : index
    %c14 = arith.constant 14 : index
    %70 = vector.load %arg7[%c0_42, %c0_43, %c14] : memref<4x8x448xf32, #tpu.memory_space<vmem>>, vector<1x8x384xf32>
    %71 = vector.shape_cast %70 : vector<1x8x384xf32> to vector<8x384xf32>
    %c0_44 = arith.constant 0 : index
    %c4_45 = arith.constant 4 : index
    %72 = vector.load %arg2[%c0_44, %c4_45] : memref<8x36xf32, #tpu.memory_space<vmem>>, vector<8x1xf32>
    %73 = vector.broadcast %72 : vector<8x1xf32> to vector<8x384xf32>
    %74 = arith.mulf %71, %73 : vector<8x384xf32>
    %75 = arith.addf %69, %74 : vector<8x384xf32>
    %c1_46 = arith.constant 1 : index
    %c0_47 = arith.constant 0 : index
    %c14_48 = arith.constant 14 : index
    %76 = vector.load %arg7[%c1_46, %c0_47, %c14_48] : memref<4x8x448xf32, #tpu.memory_space<vmem>>, vector<1x8x384xf32>
    %77 = vector.shape_cast %76 : vector<1x8x384xf32> to vector<8x384xf32>
    %c0_49 = arith.constant 0 : index
    %c5_50 = arith.constant 5 : index
    %78 = vector.load %arg2[%c0_49, %c5_50] : memref<8x36xf32, #tpu.memory_space<vmem>>, vector<8x1xf32>
    %79 = vector.broadcast %78 : vector<8x1xf32> to vector<8x384xf32>
    %80 = arith.mulf %77, %79 : vector<8x384xf32>
    %81 = arith.addf %75, %80 : vector<8x384xf32>
    %c2_51 = arith.constant 2 : index
    %c0_52 = arith.constant 0 : index
    %c14_53 = arith.constant 14 : index
    %82 = vector.load %arg7[%c2_51, %c0_52, %c14_53] : memref<4x8x448xf32, #tpu.memory_space<vmem>>, vector<1x8x384xf32>
    %83 = vector.shape_cast %82 : vector<1x8x384xf32> to vector<8x384xf32>
    %c0_54 = arith.constant 0 : index
    %c6_55 = arith.constant 6 : index
    %84 = vector.load %arg2[%c0_54, %c6_55] : memref<8x36xf32, #tpu.memory_space<vmem>>, vector<8x1xf32>
    %85 = vector.broadcast %84 : vector<8x1xf32> to vector<8x384xf32>
    %86 = arith.mulf %83, %85 : vector<8x384xf32>
    %87 = arith.addf %81, %86 : vector<8x384xf32>
    %c3_56 = arith.constant 3 : index
    %c0_57 = arith.constant 0 : index
    %c14_58 = arith.constant 14 : index
    %88 = vector.load %arg7[%c3_56, %c0_57, %c14_58] : memref<4x8x448xf32, #tpu.memory_space<vmem>>, vector<1x8x384xf32>
    %89 = vector.shape_cast %88 : vector<1x8x384xf32> to vector<8x384xf32>
    %c0_59 = arith.constant 0 : index
    %c7_60 = arith.constant 7 : index
    %90 = vector.load %arg2[%c0_59, %c7_60] : memref<8x36xf32, #tpu.memory_space<vmem>>, vector<8x1xf32>
    %91 = vector.broadcast %90 : vector<8x1xf32> to vector<8x384xf32>
    %92 = arith.mulf %89, %91 : vector<8x384xf32>
    %93 = arith.addf %87, %92 : vector<8x384xf32>
    %c0_61 = arith.constant 0 : index
    %c0_62 = arith.constant 0 : index
    %c15 = arith.constant 15 : index
    %94 = vector.load %arg7[%c0_61, %c0_62, %c15] : memref<4x8x448xf32, #tpu.memory_space<vmem>>, vector<1x8x384xf32>
    %95 = vector.shape_cast %94 : vector<1x8x384xf32> to vector<8x384xf32>
    %c0_63 = arith.constant 0 : index
    %c8 = arith.constant 8 : index
    %96 = vector.load %arg2[%c0_63, %c8] : memref<8x36xf32, #tpu.memory_space<vmem>>, vector<8x1xf32>
    %97 = vector.broadcast %96 : vector<8x1xf32> to vector<8x384xf32>
    %98 = arith.mulf %95, %97 : vector<8x384xf32>
    %99 = arith.addf %93, %98 : vector<8x384xf32>
    %c1_64 = arith.constant 1 : index
    %c0_65 = arith.constant 0 : index
    %c15_66 = arith.constant 15 : index
    %100 = vector.load %arg7[%c1_64, %c0_65, %c15_66] : memref<4x8x448xf32, #tpu.memory_space<vmem>>, vector<1x8x384xf32>
    %101 = vector.shape_cast %100 : vector<1x8x384xf32> to vector<8x384xf32>
    %c0_67 = arith.constant 0 : index
    %c9 = arith.constant 9 : index
    %102 = vector.load %arg2[%c0_67, %c9] : memref<8x36xf32, #tpu.memory_space<vmem>>, vector<8x1xf32>
    %103 = vector.broadcast %102 : vector<8x1xf32> to vector<8x384xf32>
    %104 = arith.mulf %101, %103 : vector<8x384xf32>
    %105 = arith.addf %99, %104 : vector<8x384xf32>
    %c2_68 = arith.constant 2 : index
    %c0_69 = arith.constant 0 : index
    %c15_70 = arith.constant 15 : index
    %106 = vector.load %arg7[%c2_68, %c0_69, %c15_70] : memref<4x8x448xf32, #tpu.memory_space<vmem>>, vector<1x8x384xf32>
    %107 = vector.shape_cast %106 : vector<1x8x384xf32> to vector<8x384xf32>
    %c0_71 = arith.constant 0 : index
    %c10 = arith.constant 10 : index
    %108 = vector.load %arg2[%c0_71, %c10] : memref<8x36xf32, #tpu.memory_space<vmem>>, vector<8x1xf32>
    %109 = vector.broadcast %108 : vector<8x1xf32> to vector<8x384xf32>
    %110 = arith.mulf %107, %109 : vector<8x384xf32>
    %111 = arith.addf %105, %110 : vector<8x384xf32>
    %c3_72 = arith.constant 3 : index
    %c0_73 = arith.constant 0 : index
    %c15_74 = arith.constant 15 : index
    %112 = vector.load %arg7[%c3_72, %c0_73, %c15_74] : memref<4x8x448xf32, #tpu.memory_space<vmem>>, vector<1x8x384xf32>
    %113 = vector.shape_cast %112 : vector<1x8x384xf32> to vector<8x384xf32>
    %c0_75 = arith.constant 0 : index
    %c11 = arith.constant 11 : index
    %114 = vector.load %arg2[%c0_75, %c11] : memref<8x36xf32, #tpu.memory_space<vmem>>, vector<8x1xf32>
    %115 = vector.broadcast %114 : vector<8x1xf32> to vector<8x384xf32>
    %116 = arith.mulf %113, %115 : vector<8x384xf32>
    %117 = arith.addf %111, %116 : vector<8x384xf32>
    %c0_76 = arith.constant 0 : index
    %c0_77 = arith.constant 0 : index
    %c31 = arith.constant 31 : index
    %118 = vector.load %arg7[%c0_76, %c0_77, %c31] : memref<4x8x448xf32, #tpu.memory_space<vmem>>, vector<1x8x384xf32>
    %119 = vector.shape_cast %118 : vector<1x8x384xf32> to vector<8x384xf32>
    %c0_78 = arith.constant 0 : index
    %c12 = arith.constant 12 : index
    %120 = vector.load %arg2[%c0_78, %c12] : memref<8x36xf32, #tpu.memory_space<vmem>>, vector<8x1xf32>
    %121 = vector.broadcast %120 : vector<8x1xf32> to vector<8x384xf32>
    %122 = arith.mulf %119, %121 : vector<8x384xf32>
    %123 = arith.addf %117, %122 : vector<8x384xf32>
    %c1_79 = arith.constant 1 : index
    %c0_80 = arith.constant 0 : index
    %c31_81 = arith.constant 31 : index
    %124 = vector.load %arg7[%c1_79, %c0_80, %c31_81] : memref<4x8x448xf32, #tpu.memory_space<vmem>>, vector<1x8x384xf32>
    %125 = vector.shape_cast %124 : vector<1x8x384xf32> to vector<8x384xf32>
    %c0_82 = arith.constant 0 : index
    %c13_83 = arith.constant 13 : index
    %126 = vector.load %arg2[%c0_82, %c13_83] : memref<8x36xf32, #tpu.memory_space<vmem>>, vector<8x1xf32>
    %127 = vector.broadcast %126 : vector<8x1xf32> to vector<8x384xf32>
    %128 = arith.mulf %125, %127 : vector<8x384xf32>
    %129 = arith.addf %123, %128 : vector<8x384xf32>
    %c2_84 = arith.constant 2 : index
    %c0_85 = arith.constant 0 : index
    %c31_86 = arith.constant 31 : index
    %130 = vector.load %arg7[%c2_84, %c0_85, %c31_86] : memref<4x8x448xf32, #tpu.memory_space<vmem>>, vector<1x8x384xf32>
    %131 = vector.shape_cast %130 : vector<1x8x384xf32> to vector<8x384xf32>
    %c0_87 = arith.constant 0 : index
    %c14_88 = arith.constant 14 : index
    %132 = vector.load %arg2[%c0_87, %c14_88] : memref<8x36xf32, #tpu.memory_space<vmem>>, vector<8x1xf32>
    %133 = vector.broadcast %132 : vector<8x1xf32> to vector<8x384xf32>
    %134 = arith.mulf %131, %133 : vector<8x384xf32>
    %135 = arith.addf %129, %134 : vector<8x384xf32>
    %c3_89 = arith.constant 3 : index
    %c0_90 = arith.constant 0 : index
    %c31_91 = arith.constant 31 : index
    %136 = vector.load %arg7[%c3_89, %c0_90, %c31_91] : memref<4x8x448xf32, #tpu.memory_space<vmem>>, vector<1x8x384xf32>
    %137 = vector.shape_cast %136 : vector<1x8x384xf32> to vector<8x384xf32>
    %c0_92 = arith.constant 0 : index
    %c15_93 = arith.constant 15 : index
    %138 = vector.load %arg2[%c0_92, %c15_93] : memref<8x36xf32, #tpu.memory_space<vmem>>, vector<8x1xf32>
    %139 = vector.broadcast %138 : vector<8x1xf32> to vector<8x384xf32>
    %140 = arith.mulf %137, %139 : vector<8x384xf32>
    %141 = arith.addf %135, %140 : vector<8x384xf32>
    %c0_94 = arith.constant 0 : index
    %c0_95 = arith.constant 0 : index
    %c32 = arith.constant 32 : index
    %142 = vector.load %arg7[%c0_94, %c0_95, %c32] : memref<4x8x448xf32, #tpu.memory_space<vmem>>, vector<1x8x384xf32>
    %143 = vector.shape_cast %142 : vector<1x8x384xf32> to vector<8x384xf32>
    %c0_96 = arith.constant 0 : index
    %c16 = arith.constant 16 : index
    %144 = vector.load %arg2[%c0_96, %c16] : memref<8x36xf32, #tpu.memory_space<vmem>>, vector<8x1xf32>
    %145 = vector.broadcast %144 : vector<8x1xf32> to vector<8x384xf32>
    %146 = arith.mulf %143, %145 : vector<8x384xf32>
    %147 = arith.addf %141, %146 : vector<8x384xf32>
    %c1_97 = arith.constant 1 : index
    %c0_98 = arith.constant 0 : index
    %c32_99 = arith.constant 32 : index
    %148 = vector.load %arg7[%c1_97, %c0_98, %c32_99] : memref<4x8x448xf32, #tpu.memory_space<vmem>>, vector<1x8x384xf32>
    %149 = vector.shape_cast %148 : vector<1x8x384xf32> to vector<8x384xf32>
    %c0_100 = arith.constant 0 : index
    %c17 = arith.constant 17 : index
    %150 = vector.load %arg2[%c0_100, %c17] : memref<8x36xf32, #tpu.memory_space<vmem>>, vector<8x1xf32>
    %151 = vector.broadcast %150 : vector<8x1xf32> to vector<8x384xf32>
    %152 = arith.mulf %149, %151 : vector<8x384xf32>
    %153 = arith.addf %147, %152 : vector<8x384xf32>
    %c2_101 = arith.constant 2 : index
    %c0_102 = arith.constant 0 : index
    %c32_103 = arith.constant 32 : index
    %154 = vector.load %arg7[%c2_101, %c0_102, %c32_103] : memref<4x8x448xf32, #tpu.memory_space<vmem>>, vector<1x8x384xf32>
    %155 = vector.shape_cast %154 : vector<1x8x384xf32> to vector<8x384xf32>
    %c0_104 = arith.constant 0 : index
    %c18 = arith.constant 18 : index
    %156 = vector.load %arg2[%c0_104, %c18] : memref<8x36xf32, #tpu.memory_space<vmem>>, vector<8x1xf32>
    %157 = vector.broadcast %156 : vector<8x1xf32> to vector<8x384xf32>
    %158 = arith.mulf %155, %157 : vector<8x384xf32>
    %159 = arith.addf %153, %158 : vector<8x384xf32>
    %c3_105 = arith.constant 3 : index
    %c0_106 = arith.constant 0 : index
    %c32_107 = arith.constant 32 : index
    %160 = vector.load %arg7[%c3_105, %c0_106, %c32_107] : memref<4x8x448xf32, #tpu.memory_space<vmem>>, vector<1x8x384xf32>
    %161 = vector.shape_cast %160 : vector<1x8x384xf32> to vector<8x384xf32>
    %c0_108 = arith.constant 0 : index
    %c19 = arith.constant 19 : index
    %162 = vector.load %arg2[%c0_108, %c19] : memref<8x36xf32, #tpu.memory_space<vmem>>, vector<8x1xf32>
    %163 = vector.broadcast %162 : vector<8x1xf32> to vector<8x384xf32>
    %164 = arith.mulf %161, %163 : vector<8x384xf32>
    %165 = arith.addf %159, %164 : vector<8x384xf32>
    %c0_109 = arith.constant 0 : index
    %c0_110 = arith.constant 0 : index
    %c33 = arith.constant 33 : index
    %166 = vector.load %arg7[%c0_109, %c0_110, %c33] : memref<4x8x448xf32, #tpu.memory_space<vmem>>, vector<1x8x384xf32>
    %167 = vector.shape_cast %166 : vector<1x8x384xf32> to vector<8x384xf32>
    %c0_111 = arith.constant 0 : index
    %c20 = arith.constant 20 : index
    %168 = vector.load %arg2[%c0_111, %c20] : memref<8x36xf32, #tpu.memory_space<vmem>>, vector<8x1xf32>
    %169 = vector.broadcast %168 : vector<8x1xf32> to vector<8x384xf32>
    %170 = arith.mulf %167, %169 : vector<8x384xf32>
    %171 = arith.addf %165, %170 : vector<8x384xf32>
    %c1_112 = arith.constant 1 : index
    %c0_113 = arith.constant 0 : index
    %c33_114 = arith.constant 33 : index
    %172 = vector.load %arg7[%c1_112, %c0_113, %c33_114] : memref<4x8x448xf32, #tpu.memory_space<vmem>>, vector<1x8x384xf32>
    %173 = vector.shape_cast %172 : vector<1x8x384xf32> to vector<8x384xf32>
    %c0_115 = arith.constant 0 : index
    %c21 = arith.constant 21 : index
    %174 = vector.load %arg2[%c0_115, %c21] : memref<8x36xf32, #tpu.memory_space<vmem>>, vector<8x1xf32>
    %175 = vector.broadcast %174 : vector<8x1xf32> to vector<8x384xf32>
    %176 = arith.mulf %173, %175 : vector<8x384xf32>
    %177 = arith.addf %171, %176 : vector<8x384xf32>
    %c2_116 = arith.constant 2 : index
    %c0_117 = arith.constant 0 : index
    %c33_118 = arith.constant 33 : index
    %178 = vector.load %arg7[%c2_116, %c0_117, %c33_118] : memref<4x8x448xf32, #tpu.memory_space<vmem>>, vector<1x8x384xf32>
    %179 = vector.shape_cast %178 : vector<1x8x384xf32> to vector<8x384xf32>
    %c0_119 = arith.constant 0 : index
    %c22 = arith.constant 22 : index
    %180 = vector.load %arg2[%c0_119, %c22] : memref<8x36xf32, #tpu.memory_space<vmem>>, vector<8x1xf32>
    %181 = vector.broadcast %180 : vector<8x1xf32> to vector<8x384xf32>
    %182 = arith.mulf %179, %181 : vector<8x384xf32>
    %183 = arith.addf %177, %182 : vector<8x384xf32>
    %c3_120 = arith.constant 3 : index
    %c0_121 = arith.constant 0 : index
    %c33_122 = arith.constant 33 : index
    %184 = vector.load %arg7[%c3_120, %c0_121, %c33_122] : memref<4x8x448xf32, #tpu.memory_space<vmem>>, vector<1x8x384xf32>
    %185 = vector.shape_cast %184 : vector<1x8x384xf32> to vector<8x384xf32>
    %c0_123 = arith.constant 0 : index
    %c23 = arith.constant 23 : index
    %186 = vector.load %arg2[%c0_123, %c23] : memref<8x36xf32, #tpu.memory_space<vmem>>, vector<8x1xf32>
    %187 = vector.broadcast %186 : vector<8x1xf32> to vector<8x384xf32>
    %188 = arith.mulf %185, %187 : vector<8x384xf32>
    %189 = arith.addf %183, %188 : vector<8x384xf32>
    %c0_124 = arith.constant 0 : index
    %c0_125 = arith.constant 0 : index
    %c49 = arith.constant 49 : index
    %190 = vector.load %arg7[%c0_124, %c0_125, %c49] : memref<4x8x448xf32, #tpu.memory_space<vmem>>, vector<1x8x384xf32>
    %191 = vector.shape_cast %190 : vector<1x8x384xf32> to vector<8x384xf32>
    %c0_126 = arith.constant 0 : index
    %c24 = arith.constant 24 : index
    %192 = vector.load %arg2[%c0_126, %c24] : memref<8x36xf32, #tpu.memory_space<vmem>>, vector<8x1xf32>
    %193 = vector.broadcast %192 : vector<8x1xf32> to vector<8x384xf32>
    %194 = arith.mulf %191, %193 : vector<8x384xf32>
    %195 = arith.addf %189, %194 : vector<8x384xf32>
    %c1_127 = arith.constant 1 : index
    %c0_128 = arith.constant 0 : index
    %c49_129 = arith.constant 49 : index
    %196 = vector.load %arg7[%c1_127, %c0_128, %c49_129] : memref<4x8x448xf32, #tpu.memory_space<vmem>>, vector<1x8x384xf32>
    %197 = vector.shape_cast %196 : vector<1x8x384xf32> to vector<8x384xf32>
    %c0_130 = arith.constant 0 : index
    %c25 = arith.constant 25 : index
    %198 = vector.load %arg2[%c0_130, %c25] : memref<8x36xf32, #tpu.memory_space<vmem>>, vector<8x1xf32>
    %199 = vector.broadcast %198 : vector<8x1xf32> to vector<8x384xf32>
    %200 = arith.mulf %197, %199 : vector<8x384xf32>
    %201 = arith.addf %195, %200 : vector<8x384xf32>
    %c2_131 = arith.constant 2 : index
    %c0_132 = arith.constant 0 : index
    %c49_133 = arith.constant 49 : index
    %202 = vector.load %arg7[%c2_131, %c0_132, %c49_133] : memref<4x8x448xf32, #tpu.memory_space<vmem>>, vector<1x8x384xf32>
    %203 = vector.shape_cast %202 : vector<1x8x384xf32> to vector<8x384xf32>
    %c0_134 = arith.constant 0 : index
    %c26 = arith.constant 26 : index
    %204 = vector.load %arg2[%c0_134, %c26] : memref<8x36xf32, #tpu.memory_space<vmem>>, vector<8x1xf32>
    %205 = vector.broadcast %204 : vector<8x1xf32> to vector<8x384xf32>
    %206 = arith.mulf %203, %205 : vector<8x384xf32>
    %207 = arith.addf %201, %206 : vector<8x384xf32>
    %c3_135 = arith.constant 3 : index
    %c0_136 = arith.constant 0 : index
    %c49_137 = arith.constant 49 : index
    %208 = vector.load %arg7[%c3_135, %c0_136, %c49_137] : memref<4x8x448xf32, #tpu.memory_space<vmem>>, vector<1x8x384xf32>
    %209 = vector.shape_cast %208 : vector<1x8x384xf32> to vector<8x384xf32>
    %c0_138 = arith.constant 0 : index
    %c27 = arith.constant 27 : index
    %210 = vector.load %arg2[%c0_138, %c27] : memref<8x36xf32, #tpu.memory_space<vmem>>, vector<8x1xf32>
    %211 = vector.broadcast %210 : vector<8x1xf32> to vector<8x384xf32>
    %212 = arith.mulf %209, %211 : vector<8x384xf32>
    %213 = arith.addf %207, %212 : vector<8x384xf32>
    %c0_139 = arith.constant 0 : index
    %c0_140 = arith.constant 0 : index
    %c50 = arith.constant 50 : index
    %214 = vector.load %arg7[%c0_139, %c0_140, %c50] : memref<4x8x448xf32, #tpu.memory_space<vmem>>, vector<1x8x384xf32>
    %215 = vector.shape_cast %214 : vector<1x8x384xf32> to vector<8x384xf32>
    %c0_141 = arith.constant 0 : index
    %c28 = arith.constant 28 : index
    %216 = vector.load %arg2[%c0_141, %c28] : memref<8x36xf32, #tpu.memory_space<vmem>>, vector<8x1xf32>
    %217 = vector.broadcast %216 : vector<8x1xf32> to vector<8x384xf32>
    %218 = arith.mulf %215, %217 : vector<8x384xf32>
    %219 = arith.addf %213, %218 : vector<8x384xf32>
    %c1_142 = arith.constant 1 : index
    %c0_143 = arith.constant 0 : index
    %c50_144 = arith.constant 50 : index
    %220 = vector.load %arg7[%c1_142, %c0_143, %c50_144] : memref<4x8x448xf32, #tpu.memory_space<vmem>>, vector<1x8x384xf32>
    %221 = vector.shape_cast %220 : vector<1x8x384xf32> to vector<8x384xf32>
    %c0_145 = arith.constant 0 : index
    %c29 = arith.constant 29 : index
    %222 = vector.load %arg2[%c0_145, %c29] : memref<8x36xf32, #tpu.memory_space<vmem>>, vector<8x1xf32>
    %223 = vector.broadcast %222 : vector<8x1xf32> to vector<8x384xf32>
    %224 = arith.mulf %221, %223 : vector<8x384xf32>
    %225 = arith.addf %219, %224 : vector<8x384xf32>
    %c2_146 = arith.constant 2 : index
    %c0_147 = arith.constant 0 : index
    %c50_148 = arith.constant 50 : index
    %226 = vector.load %arg7[%c2_146, %c0_147, %c50_148] : memref<4x8x448xf32, #tpu.memory_space<vmem>>, vector<1x8x384xf32>
    %227 = vector.shape_cast %226 : vector<1x8x384xf32> to vector<8x384xf32>
    %c0_149 = arith.constant 0 : index
    %c30 = arith.constant 30 : index
    %228 = vector.load %arg2[%c0_149, %c30] : memref<8x36xf32, #tpu.memory_space<vmem>>, vector<8x1xf32>
    %229 = vector.broadcast %228 : vector<8x1xf32> to vector<8x384xf32>
    %230 = arith.mulf %227, %229 : vector<8x384xf32>
    %231 = arith.addf %225, %230 : vector<8x384xf32>
    %c3_150 = arith.constant 3 : index
    %c0_151 = arith.constant 0 : index
    %c50_152 = arith.constant 50 : index
    %232 = vector.load %arg7[%c3_150, %c0_151, %c50_152] : memref<4x8x448xf32, #tpu.memory_space<vmem>>, vector<1x8x384xf32>
    %233 = vector.shape_cast %232 : vector<1x8x384xf32> to vector<8x384xf32>
    %c0_153 = arith.constant 0 : index
    %c31_154 = arith.constant 31 : index
    %234 = vector.load %arg2[%c0_153, %c31_154] : memref<8x36xf32, #tpu.memory_space<vmem>>, vector<8x1xf32>
    %235 = vector.broadcast %234 : vector<8x1xf32> to vector<8x384xf32>
    %236 = arith.mulf %233, %235 : vector<8x384xf32>
    %237 = arith.addf %231, %236 : vector<8x384xf32>
    %c0_155 = arith.constant 0 : index
    %c0_156 = arith.constant 0 : index
    %c51 = arith.constant 51 : index
    %238 = vector.load %arg7[%c0_155, %c0_156, %c51] : memref<4x8x448xf32, #tpu.memory_space<vmem>>, vector<1x8x384xf32>
    %239 = vector.shape_cast %238 : vector<1x8x384xf32> to vector<8x384xf32>
    %c0_157 = arith.constant 0 : index
    %c32_158 = arith.constant 32 : index
    %240 = vector.load %arg2[%c0_157, %c32_158] : memref<8x36xf32, #tpu.memory_space<vmem>>, vector<8x1xf32>
    %241 = vector.broadcast %240 : vector<8x1xf32> to vector<8x384xf32>
    %242 = arith.mulf %239, %241 : vector<8x384xf32>
    %243 = arith.addf %237, %242 : vector<8x384xf32>
    %c1_159 = arith.constant 1 : index
    %c0_160 = arith.constant 0 : index
    %c51_161 = arith.constant 51 : index
    %244 = vector.load %arg7[%c1_159, %c0_160, %c51_161] : memref<4x8x448xf32, #tpu.memory_space<vmem>>, vector<1x8x384xf32>
    %245 = vector.shape_cast %244 : vector<1x8x384xf32> to vector<8x384xf32>
    %c0_162 = arith.constant 0 : index
    %c33_163 = arith.constant 33 : index
    %246 = vector.load %arg2[%c0_162, %c33_163] : memref<8x36xf32, #tpu.memory_space<vmem>>, vector<8x1xf32>
    %247 = vector.broadcast %246 : vector<8x1xf32> to vector<8x384xf32>
    %248 = arith.mulf %245, %247 : vector<8x384xf32>
    %249 = arith.addf %243, %248 : vector<8x384xf32>
    %c2_164 = arith.constant 2 : index
    %c0_165 = arith.constant 0 : index
    %c51_166 = arith.constant 51 : index
    %250 = vector.load %arg7[%c2_164, %c0_165, %c51_166] : memref<4x8x448xf32, #tpu.memory_space<vmem>>, vector<1x8x384xf32>
    %251 = vector.shape_cast %250 : vector<1x8x384xf32> to vector<8x384xf32>
    %c0_167 = arith.constant 0 : index
    %c34 = arith.constant 34 : index
    %252 = vector.load %arg2[%c0_167, %c34] : memref<8x36xf32, #tpu.memory_space<vmem>>, vector<8x1xf32>
    %253 = vector.broadcast %252 : vector<8x1xf32> to vector<8x384xf32>
    %254 = arith.mulf %251, %253 : vector<8x384xf32>
    %255 = arith.addf %249, %254 : vector<8x384xf32>
    %c3_168 = arith.constant 3 : index
    %c0_169 = arith.constant 0 : index
    %c51_170 = arith.constant 51 : index
    %256 = vector.load %arg7[%c3_168, %c0_169, %c51_170] : memref<4x8x448xf32, #tpu.memory_space<vmem>>, vector<1x8x384xf32>
    %257 = vector.shape_cast %256 : vector<1x8x384xf32> to vector<8x384xf32>
    %c0_171 = arith.constant 0 : index
    %c35 = arith.constant 35 : index
    %258 = vector.load %arg2[%c0_171, %c35] : memref<8x36xf32, #tpu.memory_space<vmem>>, vector<8x1xf32>
    %259 = vector.broadcast %258 : vector<8x1xf32> to vector<8x384xf32>
    %260 = arith.mulf %257, %259 : vector<8x384xf32>
    %261 = arith.addf %255, %260 : vector<8x384xf32>
    %cst_172 = arith.constant 0.000000e+00 : f32
    %262 = vector.broadcast %cst_172 : f32 to vector<8x384xf32>
    %263 = arith.select %4, %261, %262 : vector<8x384xi1>, vector<8x384xf32>
    %cst_173 = arith.constant dense<0.000000e+00> : vector<8xf32>
    %264 = vector.multi_reduction <add>, %263, %cst_173 [1] : vector<8x384xf32> to vector<8xf32>
    %265 = vector.shape_cast %264 : vector<8xf32> to vector<8x1xf32>
    %266 = vector.extract_strided_slice %265 {offsets = [0, 0], sizes = [4, 1], strides = [1, 1]} : vector<8x1xf32> to vector<4x1xf32>
    %267 = vector.extract_strided_slice %265 {offsets = [4, 0], sizes = [4, 1], strides = [1, 1]} : vector<8x1xf32> to vector<4x1xf32>
    %268 = arith.addf %266, %267 : vector<4x1xf32>
    %269 = tpu.concatenate %268, %268 in 0 : vector<4x1xf32>, vector<4x1xf32> -> vector<8x1xf32>
    %cst_174 = arith.constant 0.001953125 : f32
    %270 = vector.broadcast %cst_174 : f32 to vector<8x1xf32>
    %271 = arith.mulf %269, %270 : vector<8x1xf32>
    %272 = vector.broadcast %271 : vector<8x1xf32> to vector<8x384xf32>
    %273 = arith.subf %261, %272 : vector<8x384xf32>
    %cst_175 = arith.constant 0.000000e+00 : f32
    %274 = vector.broadcast %cst_175 : f32 to vector<8x384xf32>
    %275 = arith.select %4, %273, %274 : vector<8x384xi1>, vector<8x384xf32>
    %276 = arith.mulf %275, %275 : vector<8x384xf32>
    %cst_176 = arith.constant dense<0.000000e+00> : vector<8xf32>
    %277 = vector.multi_reduction <add>, %276, %cst_176 [1] : vector<8x384xf32> to vector<8xf32>
    %278 = vector.shape_cast %277 : vector<8xf32> to vector<8x1xf32>
    %279 = vector.extract_strided_slice %278 {offsets = [0, 0], sizes = [4, 1], strides = [1, 1]} : vector<8x1xf32> to vector<4x1xf32>
    %280 = vector.extract_strided_slice %278 {offsets = [4, 0], sizes = [4, 1], strides = [1, 1]} : vector<8x1xf32> to vector<4x1xf32>
    %281 = arith.addf %279, %280 : vector<4x1xf32>
    %282 = tpu.concatenate %281, %281 in 0 : vector<4x1xf32>, vector<4x1xf32> -> vector<8x1xf32>
    %cst_177 = arith.constant 0.001953125 : f32
    %283 = vector.broadcast %cst_177 : f32 to vector<8x1xf32>
    %284 = arith.mulf %282, %283 : vector<8x1xf32>
    %c0_178 = arith.constant 0 : index
    %c0_179 = arith.constant 0 : index
    %c0_180 = arith.constant 0 : index
    %285 = vector.load %arg3[%c0_178, %c0_179, %c0_180] : memref<2x8x1xf32, #tpu.memory_space<vmem>>, vector<1x8x1xf32>
    %286 = vector.shape_cast %285 : vector<1x8x1xf32> to vector<8x1xf32>
    %cst_181 = arith.constant 9.99999974E-6 : f32
    %287 = vector.broadcast %cst_181 : f32 to vector<8x1xf32>
    %288 = arith.addf %284, %287 : vector<8x1xf32>
    %289 = math.rsqrt %288 : vector<8x1xf32>
    %290 = arith.mulf %286, %289 : vector<8x1xf32>
    %c1_182 = arith.constant 1 : index
    %c0_183 = arith.constant 0 : index
    %c0_184 = arith.constant 0 : index
    %291 = vector.load %arg3[%c1_182, %c0_183, %c0_184] : memref<2x8x1xf32, #tpu.memory_space<vmem>>, vector<1x8x1xf32>
    %292 = vector.shape_cast %291 : vector<1x8x1xf32> to vector<8x1xf32>
    %293 = arith.mulf %271, %290 : vector<8x1xf32>
    %294 = arith.subf %292, %293 : vector<8x1xf32>
    %295 = vector.broadcast %290 : vector<8x1xf32> to vector<8x384xf32>
    %296 = arith.mulf %261, %295 : vector<8x384xf32>
    %297 = vector.broadcast %294 : vector<8x1xf32> to vector<8x384xf32>
    %298 = arith.addf %296, %297 : vector<8x384xf32>
    %cst_185 = arith.constant 0.000000e+00 : f32
    %299 = vector.broadcast %cst_185 : f32 to vector<8x384xf32>
    %300 = arith.maximumf %298, %299 : vector<8x384xf32>
    %cst_186 = arith.constant 0.000000e+00 : f32
    %301 = vector.broadcast %cst_186 : f32 to vector<8x384xf32>
    %302 = arith.select %4, %300, %301 : vector<8x384xi1>, vector<8x384xf32>
    %303 = vector.extract_strided_slice %302 {offsets = [0, 0], sizes = [1, 384], strides = [1, 1]} : vector<8x384xf32> to vector<1x384xf32>
    %304 = vector.shape_cast %303 : vector<1x384xf32> to vector<1x384xf32>
    %305 = vector.broadcast %304 : vector<1x384xf32> to vector<4x384xf32>
    %306 = vector.extract_strided_slice %302 {offsets = [4, 0], sizes = [1, 384], strides = [1, 1]} : vector<8x384xf32> to vector<1x384xf32>
    %307 = vector.shape_cast %306 : vector<1x384xf32> to vector<1x384xf32>
    %308 = vector.broadcast %307 : vector<1x384xf32> to vector<4x384xf32>
    %309 = tpu.concatenate %305, %308 in 0 : vector<4x384xf32>, vector<4x384xf32> -> vector<8x384xf32>
    %c0_187 = arith.constant 0 : index
    %c0_188 = arith.constant 0 : index
    %c32_189 = arith.constant 32 : index
    %310 = vector.load %arg7[%c0_187, %c0_188, %c32_189] : memref<4x8x448xf32, #tpu.memory_space<vmem>>, vector<1x8x384xf32>
    %311 = vector.shape_cast %310 : vector<1x8x384xf32> to vector<8x384xf32>
    %312 = vector.shape_cast %309 : vector<8x384xf32> to vector<1x8x384xf32>
    tpu.vector_store %arg7[%c0_187, %c0_188, %c32_189], %312 {strides = array<i32>} : memref<4x8x448xf32, #tpu.memory_space<vmem>>, vector<1x8x384xf32>,
    %313 = vector.extract_strided_slice %302 {offsets = [1, 0], sizes = [1, 384], strides = [1, 1]} : vector<8x384xf32> to vector<1x384xf32>
    %314 = vector.shape_cast %313 : vector<1x384xf32> to vector<1x384xf32>
    %315 = vector.broadcast %314 : vector<1x384xf32> to vector<4x384xf32>
    %316 = vector.extract_strided_slice %302 {offsets = [5, 0], sizes = [1, 384], strides = [1, 1]} : vector<8x384xf32> to vector<1x384xf32>
    %317 = vector.shape_cast %316 : vector<1x384xf32> to vector<1x384xf32>
    %318 = vector.broadcast %317 : vector<1x384xf32> to vector<4x384xf32>
    %319 = tpu.concatenate %315, %318 in 0 : vector<4x384xf32>, vector<4x384xf32> -> vector<8x384xf32>
    %c1_190 = arith.constant 1 : index
    %c0_191 = arith.constant 0 : index
    %c32_192 = arith.constant 32 : index
    %320 = vector.load %arg7[%c1_190, %c0_191, %c32_192] : memref<4x8x448xf32, #tpu.memory_space<vmem>>, vector<1x8x384xf32>
    %321 = vector.shape_cast %320 : vector<1x8x384xf32> to vector<8x384xf32>
    %322 = vector.shape_cast %319 : vector<8x384xf32> to vector<1x8x384xf32>
    tpu.vector_store %arg7[%c1_190, %c0_191, %c32_192], %322 {strides = array<i32>} : memref<4x8x448xf32, #tpu.memory_space<vmem>>, vector<1x8x384xf32>,
    %323 = vector.extract_strided_slice %302 {offsets = [2, 0], sizes = [1, 384], strides = [1, 1]} : vector<8x384xf32> to vector<1x384xf32>
    %324 = vector.shape_cast %323 : vector<1x384xf32> to vector<1x384xf32>
    %325 = vector.broadcast %324 : vector<1x384xf32> to vector<4x384xf32>
    %326 = vector.extract_strided_slice %302 {offsets = [6, 0], sizes = [1, 384], strides = [1, 1]} : vector<8x384xf32> to vector<1x384xf32>
    %327 = vector.shape_cast %326 : vector<1x384xf32> to vector<1x384xf32>
    %328 = vector.broadcast %327 : vector<1x384xf32> to vector<4x384xf32>
    %329 = tpu.concatenate %325, %328 in 0 : vector<4x384xf32>, vector<4x384xf32> -> vector<8x384xf32>
    %c2_193 = arith.constant 2 : index
    %c0_194 = arith.constant 0 : index
    %c32_195 = arith.constant 32 : index
    %330 = vector.load %arg7[%c2_193, %c0_194, %c32_195] : memref<4x8x448xf32, #tpu.memory_space<vmem>>, vector<1x8x384xf32>
    %331 = vector.shape_cast %330 : vector<1x8x384xf32> to vector<8x384xf32>
    %332 = vector.shape_cast %329 : vector<8x384xf32> to vector<1x8x384xf32>
    tpu.vector_store %arg7[%c2_193, %c0_194, %c32_195], %332 {strides = array<i32>} : memref<4x8x448xf32, #tpu.memory_space<vmem>>, vector<1x8x384xf32>,
    %333 = vector.extract_strided_slice %302 {offsets = [3, 0], sizes = [1, 384], strides = [1, 1]} : vector<8x384xf32> to vector<1x384xf32>
    %334 = vector.shape_cast %333 : vector<1x384xf32> to vector<1x384xf32>
    %335 = vector.broadcast %334 : vector<1x384xf32> to vector<4x384xf32>
    %336 = vector.extract_strided_slice %302 {offsets = [7, 0], sizes = [1, 384], strides = [1, 1]} : vector<8x384xf32> to vector<1x384xf32>
    %337 = vector.shape_cast %336 : vector<1x384xf32> to vector<1x384xf32>
    %338 = vector.broadcast %337 : vector<1x384xf32> to vector<4x384xf32>
    %339 = tpu.concatenate %335, %338 in 0 : vector<4x384xf32>, vector<4x384xf32> -> vector<8x384xf32>
    %c3_196 = arith.constant 3 : index
    %c0_197 = arith.constant 0 : index
    %c32_198 = arith.constant 32 : index
    %340 = vector.load %arg7[%c3_196, %c0_197, %c32_198] : memref<4x8x448xf32, #tpu.memory_space<vmem>>, vector<1x8x384xf32>
    %341 = vector.shape_cast %340 : vector<1x8x384xf32> to vector<8x384xf32>
    %342 = vector.shape_cast %339 : vector<8x384xf32> to vector<1x8x384xf32>
    tpu.vector_store %arg7[%c3_196, %c0_197, %c32_198], %342 {strides = array<i32>} : memref<4x8x448xf32, #tpu.memory_space<vmem>>, vector<1x8x384xf32>,
    %cst_199 = arith.constant 0.000000e+00 : f32
    %343 = vector.broadcast %cst_199 : f32 to vector<8x384xf32>
    %c0_200 = arith.constant 0 : index
    %c0_201 = arith.constant 0 : index
    %c13_202 = arith.constant 13 : index
    %344 = vector.load %arg7[%c0_200, %c0_201, %c13_202] : memref<4x8x448xf32, #tpu.memory_space<vmem>>, vector<1x8x384xf32>
    %345 = vector.shape_cast %344 : vector<1x8x384xf32> to vector<8x384xf32>
    %c0_203 = arith.constant 0 : index
    %c0_204 = arith.constant 0 : index
    %346 = vector.load %arg4[%c0_203, %c0_204] : memref<8x36xf32, #tpu.memory_space<vmem>>, vector<8x1xf32>
    %347 = vector.broadcast %346 : vector<8x1xf32> to vector<8x384xf32>
    %348 = arith.mulf %345, %347 : vector<8x384xf32>
    %349 = arith.addf %343, %348 : vector<8x384xf32>
    %c1_205 = arith.constant 1 : index
    %c0_206 = arith.constant 0 : index
    %c13_207 = arith.constant 13 : index
    %350 = vector.load %arg7[%c1_205, %c0_206, %c13_207] : memref<4x8x448xf32, #tpu.memory_space<vmem>>, vector<1x8x384xf32>
    %351 = vector.shape_cast %350 : vector<1x8x384xf32> to vector<8x384xf32>
    %c0_208 = arith.constant 0 : index
    %c1_209 = arith.constant 1 : index
    %352 = vector.load %arg4[%c0_208, %c1_209] : memref<8x36xf32, #tpu.memory_space<vmem>>, vector<8x1xf32>
    %353 = vector.broadcast %352 : vector<8x1xf32> to vector<8x384xf32>
    %354 = arith.mulf %351, %353 : vector<8x384xf32>
    %355 = arith.addf %349, %354 : vector<8x384xf32>
    %c2_210 = arith.constant 2 : index
    %c0_211 = arith.constant 0 : index
    %c13_212 = arith.constant 13 : index
    %356 = vector.load %arg7[%c2_210, %c0_211, %c13_212] : memref<4x8x448xf32, #tpu.memory_space<vmem>>, vector<1x8x384xf32>
    %357 = vector.shape_cast %356 : vector<1x8x384xf32> to vector<8x384xf32>
    %c0_213 = arith.constant 0 : index
    %c2_214 = arith.constant 2 : index
    %358 = vector.load %arg4[%c0_213, %c2_214] : memref<8x36xf32, #tpu.memory_space<vmem>>, vector<8x1xf32>
    %359 = vector.broadcast %358 : vector<8x1xf32> to vector<8x384xf32>
    %360 = arith.mulf %357, %359 : vector<8x384xf32>
    %361 = arith.addf %355, %360 : vector<8x384xf32>
    %c3_215 = arith.constant 3 : index
    %c0_216 = arith.constant 0 : index
    %c13_217 = arith.constant 13 : index
    %362 = vector.load %arg7[%c3_215, %c0_216, %c13_217] : memref<4x8x448xf32, #tpu.memory_space<vmem>>, vector<1x8x384xf32>
    %363 = vector.shape_cast %362 : vector<1x8x384xf32> to vector<8x384xf32>
    %c0_218 = arith.constant 0 : index
    %c3_219 = arith.constant 3 : index
    %364 = vector.load %arg4[%c0_218, %c3_219] : memref<8x36xf32, #tpu.memory_space<vmem>>, vector<8x1xf32>
    %365 = vector.broadcast %364 : vector<8x1xf32> to vector<8x384xf32>
    %366 = arith.mulf %363, %365 : vector<8x384xf32>
    %367 = arith.addf %361, %366 : vector<8x384xf32>
    %c0_220 = arith.constant 0 : index
    %c0_221 = arith.constant 0 : index
    %c14_222 = arith.constant 14 : index
    %368 = vector.load %arg7[%c0_220, %c0_221, %c14_222] : memref<4x8x448xf32, #tpu.memory_space<vmem>>, vector<1x8x384xf32>
    %369 = vector.shape_cast %368 : vector<1x8x384xf32> to vector<8x384xf32>
    %c0_223 = arith.constant 0 : index
    %c4_224 = arith.constant 4 : index
    %370 = vector.load %arg4[%c0_223, %c4_224] : memref<8x36xf32, #tpu.memory_space<vmem>>, vector<8x1xf32>
    %371 = vector.broadcast %370 : vector<8x1xf32> to vector<8x384xf32>
    %372 = arith.mulf %369, %371 : vector<8x384xf32>
    %373 = arith.addf %367, %372 : vector<8x384xf32>
    %c1_225 = arith.constant 1 : index
    %c0_226 = arith.constant 0 : index
    %c14_227 = arith.constant 14 : index
    %374 = vector.load %arg7[%c1_225, %c0_226, %c14_227] : memref<4x8x448xf32, #tpu.memory_space<vmem>>, vector<1x8x384xf32>
    %375 = vector.shape_cast %374 : vector<1x8x384xf32> to vector<8x384xf32>
    %c0_228 = arith.constant 0 : index
    %c5_229 = arith.constant 5 : index
    %376 = vector.load %arg4[%c0_228, %c5_229] : memref<8x36xf32, #tpu.memory_space<vmem>>, vector<8x1xf32>
    %377 = vector.broadcast %376 : vector<8x1xf32> to vector<8x384xf32>
    %378 = arith.mulf %375, %377 : vector<8x384xf32>
    %379 = arith.addf %373, %378 : vector<8x384xf32>
    %c2_230 = arith.constant 2 : index
    %c0_231 = arith.constant 0 : index
    %c14_232 = arith.constant 14 : index
    %380 = vector.load %arg7[%c2_230, %c0_231, %c14_232] : memref<4x8x448xf32, #tpu.memory_space<vmem>>, vector<1x8x384xf32>
    %381 = vector.shape_cast %380 : vector<1x8x384xf32> to vector<8x384xf32>
    %c0_233 = arith.constant 0 : index
    %c6_234 = arith.constant 6 : index
    %382 = vector.load %arg4[%c0_233, %c6_234] : memref<8x36xf32, #tpu.memory_space<vmem>>, vector<8x1xf32>
    %383 = vector.broadcast %382 : vector<8x1xf32> to vector<8x384xf32>
    %384 = arith.mulf %381, %383 : vector<8x384xf32>
    %385 = arith.addf %379, %384 : vector<8x384xf32>
    %c3_235 = arith.constant 3 : index
    %c0_236 = arith.constant 0 : index
    %c14_237 = arith.constant 14 : index
    %386 = vector.load %arg7[%c3_235, %c0_236, %c14_237] : memref<4x8x448xf32, #tpu.memory_space<vmem>>, vector<1x8x384xf32>
    %387 = vector.shape_cast %386 : vector<1x8x384xf32> to vector<8x384xf32>
    %c0_238 = arith.constant 0 : index
    %c7_239 = arith.constant 7 : index
    %388 = vector.load %arg4[%c0_238, %c7_239] : memref<8x36xf32, #tpu.memory_space<vmem>>, vector<8x1xf32>
    %389 = vector.broadcast %388 : vector<8x1xf32> to vector<8x384xf32>
    %390 = arith.mulf %387, %389 : vector<8x384xf32>
    %391 = arith.addf %385, %390 : vector<8x384xf32>
    %c0_240 = arith.constant 0 : index
    %c0_241 = arith.constant 0 : index
    %c15_242 = arith.constant 15 : index
    %392 = vector.load %arg7[%c0_240, %c0_241, %c15_242] : memref<4x8x448xf32, #tpu.memory_space<vmem>>, vector<1x8x384xf32>
    %393 = vector.shape_cast %392 : vector<1x8x384xf32> to vector<8x384xf32>
    %c0_243 = arith.constant 0 : index
    %c8_244 = arith.constant 8 : index
    %394 = vector.load %arg4[%c0_243, %c8_244] : memref<8x36xf32, #tpu.memory_space<vmem>>, vector<8x1xf32>
    %395 = vector.broadcast %394 : vector<8x1xf32> to vector<8x384xf32>
    %396 = arith.mulf %393, %395 : vector<8x384xf32>
    %397 = arith.addf %391, %396 : vector<8x384xf32>
    %c1_245 = arith.constant 1 : index
    %c0_246 = arith.constant 0 : index
    %c15_247 = arith.constant 15 : index
    %398 = vector.load %arg7[%c1_245, %c0_246, %c15_247] : memref<4x8x448xf32, #tpu.memory_space<vmem>>, vector<1x8x384xf32>
    %399 = vector.shape_cast %398 : vector<1x8x384xf32> to vector<8x384xf32>
    %c0_248 = arith.constant 0 : index
    %c9_249 = arith.constant 9 : index
    %400 = vector.load %arg4[%c0_248, %c9_249] : memref<8x36xf32, #tpu.memory_space<vmem>>, vector<8x1xf32>
    %401 = vector.broadcast %400 : vector<8x1xf32> to vector<8x384xf32>
    %402 = arith.mulf %399, %401 : vector<8x384xf32>
    %403 = arith.addf %397, %402 : vector<8x384xf32>
    %c2_250 = arith.constant 2 : index
    %c0_251 = arith.constant 0 : index
    %c15_252 = arith.constant 15 : index
    %404 = vector.load %arg7[%c2_250, %c0_251, %c15_252] : memref<4x8x448xf32, #tpu.memory_space<vmem>>, vector<1x8x384xf32>
    %405 = vector.shape_cast %404 : vector<1x8x384xf32> to vector<8x384xf32>
    %c0_253 = arith.constant 0 : index
    %c10_254 = arith.constant 10 : index
    %406 = vector.load %arg4[%c0_253, %c10_254] : memref<8x36xf32, #tpu.memory_space<vmem>>, vector<8x1xf32>
    %407 = vector.broadcast %406 : vector<8x1xf32> to vector<8x384xf32>
    %408 = arith.mulf %405, %407 : vector<8x384xf32>
    %409 = arith.addf %403, %408 : vector<8x384xf32>
    %c3_255 = arith.constant 3 : index
    %c0_256 = arith.constant 0 : index
    %c15_257 = arith.constant 15 : index
    %410 = vector.load %arg7[%c3_255, %c0_256, %c15_257] : memref<4x8x448xf32, #tpu.memory_space<vmem>>, vector<1x8x384xf32>
    %411 = vector.shape_cast %410 : vector<1x8x384xf32> to vector<8x384xf32>
    %c0_258 = arith.constant 0 : index
    %c11_259 = arith.constant 11 : index
    %412 = vector.load %arg4[%c0_258, %c11_259] : memref<8x36xf32, #tpu.memory_space<vmem>>, vector<8x1xf32>
    %413 = vector.broadcast %412 : vector<8x1xf32> to vector<8x384xf32>
    %414 = arith.mulf %411, %413 : vector<8x384xf32>
    %415 = arith.addf %409, %414 : vector<8x384xf32>
    %c0_260 = arith.constant 0 : index
    %c0_261 = arith.constant 0 : index
    %c31_262 = arith.constant 31 : index
    %416 = vector.load %arg7[%c0_260, %c0_261, %c31_262] : memref<4x8x448xf32, #tpu.memory_space<vmem>>, vector<1x8x384xf32>
    %417 = vector.shape_cast %416 : vector<1x8x384xf32> to vector<8x384xf32>
    %c0_263 = arith.constant 0 : index
    %c12_264 = arith.constant 12 : index
    %418 = vector.load %arg4[%c0_263, %c12_264] : memref<8x36xf32, #tpu.memory_space<vmem>>, vector<8x1xf32>
    %419 = vector.broadcast %418 : vector<8x1xf32> to vector<8x384xf32>
    %420 = arith.mulf %417, %419 : vector<8x384xf32>
    %421 = arith.addf %415, %420 : vector<8x384xf32>
    %c1_265 = arith.constant 1 : index
    %c0_266 = arith.constant 0 : index
    %c31_267 = arith.constant 31 : index
    %422 = vector.load %arg7[%c1_265, %c0_266, %c31_267] : memref<4x8x448xf32, #tpu.memory_space<vmem>>, vector<1x8x384xf32>
    %423 = vector.shape_cast %422 : vector<1x8x384xf32> to vector<8x384xf32>
    %c0_268 = arith.constant 0 : index
    %c13_269 = arith.constant 13 : index
    %424 = vector.load %arg4[%c0_268, %c13_269] : memref<8x36xf32, #tpu.memory_space<vmem>>, vector<8x1xf32>
    %425 = vector.broadcast %424 : vector<8x1xf32> to vector<8x384xf32>
    %426 = arith.mulf %423, %425 : vector<8x384xf32>
    %427 = arith.addf %421, %426 : vector<8x384xf32>
    %c2_270 = arith.constant 2 : index
    %c0_271 = arith.constant 0 : index
    %c31_272 = arith.constant 31 : index
    %428 = vector.load %arg7[%c2_270, %c0_271, %c31_272] : memref<4x8x448xf32, #tpu.memory_space<vmem>>, vector<1x8x384xf32>
    %429 = vector.shape_cast %428 : vector<1x8x384xf32> to vector<8x384xf32>
    %c0_273 = arith.constant 0 : index
    %c14_274 = arith.constant 14 : index
    %430 = vector.load %arg4[%c0_273, %c14_274] : memref<8x36xf32, #tpu.memory_space<vmem>>, vector<8x1xf32>
    %431 = vector.broadcast %430 : vector<8x1xf32> to vector<8x384xf32>
    %432 = arith.mulf %429, %431 : vector<8x384xf32>
    %433 = arith.addf %427, %432 : vector<8x384xf32>
    %c3_275 = arith.constant 3 : index
    %c0_276 = arith.constant 0 : index
    %c31_277 = arith.constant 31 : index
    %434 = vector.load %arg7[%c3_275, %c0_276, %c31_277] : memref<4x8x448xf32, #tpu.memory_space<vmem>>, vector<1x8x384xf32>
    %435 = vector.shape_cast %434 : vector<1x8x384xf32> to vector<8x384xf32>
    %c0_278 = arith.constant 0 : index
    %c15_279 = arith.constant 15 : index
    %436 = vector.load %arg4[%c0_278, %c15_279] : memref<8x36xf32, #tpu.memory_space<vmem>>, vector<8x1xf32>
    %437 = vector.broadcast %436 : vector<8x1xf32> to vector<8x384xf32>
    %438 = arith.mulf %435, %437 : vector<8x384xf32>
    %439 = arith.addf %433, %438 : vector<8x384xf32>
    %c0_280 = arith.constant 0 : index
    %c0_281 = arith.constant 0 : index
    %c32_282 = arith.constant 32 : index
    %440 = vector.load %arg7[%c0_280, %c0_281, %c32_282] : memref<4x8x448xf32, #tpu.memory_space<vmem>>, vector<1x8x384xf32>
    %441 = vector.shape_cast %440 : vector<1x8x384xf32> to vector<8x384xf32>
    %c0_283 = arith.constant 0 : index
    %c16_284 = arith.constant 16 : index
    %442 = vector.load %arg4[%c0_283, %c16_284] : memref<8x36xf32, #tpu.memory_space<vmem>>, vector<8x1xf32>
    %443 = vector.broadcast %442 : vector<8x1xf32> to vector<8x384xf32>
    %444 = arith.mulf %441, %443 : vector<8x384xf32>
    %445 = arith.addf %439, %444 : vector<8x384xf32>
    %c1_285 = arith.constant 1 : index
    %c0_286 = arith.constant 0 : index
    %c32_287 = arith.constant 32 : index
    %446 = vector.load %arg7[%c1_285, %c0_286, %c32_287] : memref<4x8x448xf32, #tpu.memory_space<vmem>>, vector<1x8x384xf32>
    %447 = vector.shape_cast %446 : vector<1x8x384xf32> to vector<8x384xf32>
    %c0_288 = arith.constant 0 : index
    %c17_289 = arith.constant 17 : index
    %448 = vector.load %arg4[%c0_288, %c17_289] : memref<8x36xf32, #tpu.memory_space<vmem>>, vector<8x1xf32>
    %449 = vector.broadcast %448 : vector<8x1xf32> to vector<8x384xf32>
    %450 = arith.mulf %447, %449 : vector<8x384xf32>
    %451 = arith.addf %445, %450 : vector<8x384xf32>
    %c2_290 = arith.constant 2 : index
    %c0_291 = arith.constant 0 : index
    %c32_292 = arith.constant 32 : index
    %452 = vector.load %arg7[%c2_290, %c0_291, %c32_292] : memref<4x8x448xf32, #tpu.memory_space<vmem>>, vector<1x8x384xf32>
    %453 = vector.shape_cast %452 : vector<1x8x384xf32> to vector<8x384xf32>
    %c0_293 = arith.constant 0 : index
    %c18_294 = arith.constant 18 : index
    %454 = vector.load %arg4[%c0_293, %c18_294] : memref<8x36xf32, #tpu.memory_space<vmem>>, vector<8x1xf32>
    %455 = vector.broadcast %454 : vector<8x1xf32> to vector<8x384xf32>
    %456 = arith.mulf %453, %455 : vector<8x384xf32>
    %457 = arith.addf %451, %456 : vector<8x384xf32>
    %c3_295 = arith.constant 3 : index
    %c0_296 = arith.constant 0 : index
    %c32_297 = arith.constant 32 : index
    %458 = vector.load %arg7[%c3_295, %c0_296, %c32_297] : memref<4x8x448xf32, #tpu.memory_space<vmem>>, vector<1x8x384xf32>
    %459 = vector.shape_cast %458 : vector<1x8x384xf32> to vector<8x384xf32>
    %c0_298 = arith.constant 0 : index
    %c19_299 = arith.constant 19 : index
    %460 = vector.load %arg4[%c0_298, %c19_299] : memref<8x36xf32, #tpu.memory_space<vmem>>, vector<8x1xf32>
    %461 = vector.broadcast %460 : vector<8x1xf32> to vector<8x384xf32>
    %462 = arith.mulf %459, %461 : vector<8x384xf32>
    %463 = arith.addf %457, %462 : vector<8x384xf32>
    %c0_300 = arith.constant 0 : index
    %c0_301 = arith.constant 0 : index
    %c33_302 = arith.constant 33 : index
    %464 = vector.load %arg7[%c0_300, %c0_301, %c33_302] : memref<4x8x448xf32, #tpu.memory_space<vmem>>, vector<1x8x384xf32>
    %465 = vector.shape_cast %464 : vector<1x8x384xf32> to vector<8x384xf32>
    %c0_303 = arith.constant 0 : index
    %c20_304 = arith.constant 20 : index
    %466 = vector.load %arg4[%c0_303, %c20_304] : memref<8x36xf32, #tpu.memory_space<vmem>>, vector<8x1xf32>
    %467 = vector.broadcast %466 : vector<8x1xf32> to vector<8x384xf32>
    %468 = arith.mulf %465, %467 : vector<8x384xf32>
    %469 = arith.addf %463, %468 : vector<8x384xf32>
    %c1_305 = arith.constant 1 : index
    %c0_306 = arith.constant 0 : index
    %c33_307 = arith.constant 33 : index
    %470 = vector.load %arg7[%c1_305, %c0_306, %c33_307] : memref<4x8x448xf32, #tpu.memory_space<vmem>>, vector<1x8x384xf32>
    %471 = vector.shape_cast %470 : vector<1x8x384xf32> to vector<8x384xf32>
    %c0_308 = arith.constant 0 : index
    %c21_309 = arith.constant 21 : index
    %472 = vector.load %arg4[%c0_308, %c21_309] : memref<8x36xf32, #tpu.memory_space<vmem>>, vector<8x1xf32>
    %473 = vector.broadcast %472 : vector<8x1xf32> to vector<8x384xf32>
    %474 = arith.mulf %471, %473 : vector<8x384xf32>
    %475 = arith.addf %469, %474 : vector<8x384xf32>
    %c2_310 = arith.constant 2 : index
    %c0_311 = arith.constant 0 : index
    %c33_312 = arith.constant 33 : index
    %476 = vector.load %arg7[%c2_310, %c0_311, %c33_312] : memref<4x8x448xf32, #tpu.memory_space<vmem>>, vector<1x8x384xf32>
    %477 = vector.shape_cast %476 : vector<1x8x384xf32> to vector<8x384xf32>
    %c0_313 = arith.constant 0 : index
    %c22_314 = arith.constant 22 : index
    %478 = vector.load %arg4[%c0_313, %c22_314] : memref<8x36xf32, #tpu.memory_space<vmem>>, vector<8x1xf32>
    %479 = vector.broadcast %478 : vector<8x1xf32> to vector<8x384xf32>
    %480 = arith.mulf %477, %479 : vector<8x384xf32>
    %481 = arith.addf %475, %480 : vector<8x384xf32>
    %c3_315 = arith.constant 3 : index
    %c0_316 = arith.constant 0 : index
    %c33_317 = arith.constant 33 : index
    %482 = vector.load %arg7[%c3_315, %c0_316, %c33_317] : memref<4x8x448xf32, #tpu.memory_space<vmem>>, vector<1x8x384xf32>
    %483 = vector.shape_cast %482 : vector<1x8x384xf32> to vector<8x384xf32>
    %c0_318 = arith.constant 0 : index
    %c23_319 = arith.constant 23 : index
    %484 = vector.load %arg4[%c0_318, %c23_319] : memref<8x36xf32, #tpu.memory_space<vmem>>, vector<8x1xf32>
    %485 = vector.broadcast %484 : vector<8x1xf32> to vector<8x384xf32>
    %486 = arith.mulf %483, %485 : vector<8x384xf32>
    %487 = arith.addf %481, %486 : vector<8x384xf32>
    %c0_320 = arith.constant 0 : index
    %c0_321 = arith.constant 0 : index
    %c49_322 = arith.constant 49 : index
    %488 = vector.load %arg7[%c0_320, %c0_321, %c49_322] : memref<4x8x448xf32, #tpu.memory_space<vmem>>, vector<1x8x384xf32>
    %489 = vector.shape_cast %488 : vector<1x8x384xf32> to vector<8x384xf32>
    %c0_323 = arith.constant 0 : index
    %c24_324 = arith.constant 24 : index
    %490 = vector.load %arg4[%c0_323, %c24_324] : memref<8x36xf32, #tpu.memory_space<vmem>>, vector<8x1xf32>
    %491 = vector.broadcast %490 : vector<8x1xf32> to vector<8x384xf32>
    %492 = arith.mulf %489, %491 : vector<8x384xf32>
    %493 = arith.addf %487, %492 : vector<8x384xf32>
    %c1_325 = arith.constant 1 : index
    %c0_326 = arith.constant 0 : index
    %c49_327 = arith.constant 49 : index
    %494 = vector.load %arg7[%c1_325, %c0_326, %c49_327] : memref<4x8x448xf32, #tpu.memory_space<vmem>>, vector<1x8x384xf32>
    %495 = vector.shape_cast %494 : vector<1x8x384xf32> to vector<8x384xf32>
    %c0_328 = arith.constant 0 : index
    %c25_329 = arith.constant 25 : index
    %496 = vector.load %arg4[%c0_328, %c25_329] : memref<8x36xf32, #tpu.memory_space<vmem>>, vector<8x1xf32>
    %497 = vector.broadcast %496 : vector<8x1xf32> to vector<8x384xf32>
    %498 = arith.mulf %495, %497 : vector<8x384xf32>
    %499 = arith.addf %493, %498 : vector<8x384xf32>
    %c2_330 = arith.constant 2 : index
    %c0_331 = arith.constant 0 : index
    %c49_332 = arith.constant 49 : index
    %500 = vector.load %arg7[%c2_330, %c0_331, %c49_332] : memref<4x8x448xf32, #tpu.memory_space<vmem>>, vector<1x8x384xf32>
    %501 = vector.shape_cast %500 : vector<1x8x384xf32> to vector<8x384xf32>
    %c0_333 = arith.constant 0 : index
    %c26_334 = arith.constant 26 : index
    %502 = vector.load %arg4[%c0_333, %c26_334] : memref<8x36xf32, #tpu.memory_space<vmem>>, vector<8x1xf32>
    %503 = vector.broadcast %502 : vector<8x1xf32> to vector<8x384xf32>
    %504 = arith.mulf %501, %503 : vector<8x384xf32>
    %505 = arith.addf %499, %504 : vector<8x384xf32>
    %c3_335 = arith.constant 3 : index
    %c0_336 = arith.constant 0 : index
    %c49_337 = arith.constant 49 : index
    %506 = vector.load %arg7[%c3_335, %c0_336, %c49_337] : memref<4x8x448xf32, #tpu.memory_space<vmem>>, vector<1x8x384xf32>
    %507 = vector.shape_cast %506 : vector<1x8x384xf32> to vector<8x384xf32>
    %c0_338 = arith.constant 0 : index
    %c27_339 = arith.constant 27 : index
    %508 = vector.load %arg4[%c0_338, %c27_339] : memref<8x36xf32, #tpu.memory_space<vmem>>, vector<8x1xf32>
    %509 = vector.broadcast %508 : vector<8x1xf32> to vector<8x384xf32>
    %510 = arith.mulf %507, %509 : vector<8x384xf32>
    %511 = arith.addf %505, %510 : vector<8x384xf32>
    %c0_340 = arith.constant 0 : index
    %c0_341 = arith.constant 0 : index
    %c50_342 = arith.constant 50 : index
    %512 = vector.load %arg7[%c0_340, %c0_341, %c50_342] : memref<4x8x448xf32, #tpu.memory_space<vmem>>, vector<1x8x384xf32>
    %513 = vector.shape_cast %512 : vector<1x8x384xf32> to vector<8x384xf32>
    %c0_343 = arith.constant 0 : index
    %c28_344 = arith.constant 28 : index
    %514 = vector.load %arg4[%c0_343, %c28_344] : memref<8x36xf32, #tpu.memory_space<vmem>>, vector<8x1xf32>
    %515 = vector.broadcast %514 : vector<8x1xf32> to vector<8x384xf32>
    %516 = arith.mulf %513, %515 : vector<8x384xf32>
    %517 = arith.addf %511, %516 : vector<8x384xf32>
    %c1_345 = arith.constant 1 : index
    %c0_346 = arith.constant 0 : index
    %c50_347 = arith.constant 50 : index
    %518 = vector.load %arg7[%c1_345, %c0_346, %c50_347] : memref<4x8x448xf32, #tpu.memory_space<vmem>>, vector<1x8x384xf32>
    %519 = vector.shape_cast %518 : vector<1x8x384xf32> to vector<8x384xf32>
    %c0_348 = arith.constant 0 : index
    %c29_349 = arith.constant 29 : index
    %520 = vector.load %arg4[%c0_348, %c29_349] : memref<8x36xf32, #tpu.memory_space<vmem>>, vector<8x1xf32>
    %521 = vector.broadcast %520 : vector<8x1xf32> to vector<8x384xf32>
    %522 = arith.mulf %519, %521 : vector<8x384xf32>
    %523 = arith.addf %517, %522 : vector<8x384xf32>
    %c2_350 = arith.constant 2 : index
    %c0_351 = arith.constant 0 : index
    %c50_352 = arith.constant 50 : index
    %524 = vector.load %arg7[%c2_350, %c0_351, %c50_352] : memref<4x8x448xf32, #tpu.memory_space<vmem>>, vector<1x8x384xf32>
    %525 = vector.shape_cast %524 : vector<1x8x384xf32> to vector<8x384xf32>
    %c0_353 = arith.constant 0 : index
    %c30_354 = arith.constant 30 : index
    %526 = vector.load %arg4[%c0_353, %c30_354] : memref<8x36xf32, #tpu.memory_space<vmem>>, vector<8x1xf32>
    %527 = vector.broadcast %526 : vector<8x1xf32> to vector<8x384xf32>
    %528 = arith.mulf %525, %527 : vector<8x384xf32>
    %529 = arith.addf %523, %528 : vector<8x384xf32>
    %c3_355 = arith.constant 3 : index
    %c0_356 = arith.constant 0 : index
    %c50_357 = arith.constant 50 : index
    %530 = vector.load %arg7[%c3_355, %c0_356, %c50_357] : memref<4x8x448xf32, #tpu.memory_space<vmem>>, vector<1x8x384xf32>
    %531 = vector.shape_cast %530 : vector<1x8x384xf32> to vector<8x384xf32>
    %c0_358 = arith.constant 0 : index
    %c31_359 = arith.constant 31 : index
    %532 = vector.load %arg4[%c0_358, %c31_359] : memref<8x36xf32, #tpu.memory_space<vmem>>, vector<8x1xf32>
    %533 = vector.broadcast %532 : vector<8x1xf32> to vector<8x384xf32>
    %534 = arith.mulf %531, %533 : vector<8x384xf32>
    %535 = arith.addf %529, %534 : vector<8x384xf32>
    %c0_360 = arith.constant 0 : index
    %c0_361 = arith.constant 0 : index
    %c51_362 = arith.constant 51 : index
    %536 = vector.load %arg7[%c0_360, %c0_361, %c51_362] : memref<4x8x448xf32, #tpu.memory_space<vmem>>, vector<1x8x384xf32>
    %537 = vector.shape_cast %536 : vector<1x8x384xf32> to vector<8x384xf32>
    %c0_363 = arith.constant 0 : index
    %c32_364 = arith.constant 32 : index
    %538 = vector.load %arg4[%c0_363, %c32_364] : memref<8x36xf32, #tpu.memory_space<vmem>>, vector<8x1xf32>
    %539 = vector.broadcast %538 : vector<8x1xf32> to vector<8x384xf32>
    %540 = arith.mulf %537, %539 : vector<8x384xf32>
    %541 = arith.addf %535, %540 : vector<8x384xf32>
    %c1_365 = arith.constant 1 : index
    %c0_366 = arith.constant 0 : index
    %c51_367 = arith.constant 51 : index
    %542 = vector.load %arg7[%c1_365, %c0_366, %c51_367] : memref<4x8x448xf32, #tpu.memory_space<vmem>>, vector<1x8x384xf32>
    %543 = vector.shape_cast %542 : vector<1x8x384xf32> to vector<8x384xf32>
    %c0_368 = arith.constant 0 : index
    %c33_369 = arith.constant 33 : index
    %544 = vector.load %arg4[%c0_368, %c33_369] : memref<8x36xf32, #tpu.memory_space<vmem>>, vector<8x1xf32>
    %545 = vector.broadcast %544 : vector<8x1xf32> to vector<8x384xf32>
    %546 = arith.mulf %543, %545 : vector<8x384xf32>
    %547 = arith.addf %541, %546 : vector<8x384xf32>
    %c2_370 = arith.constant 2 : index
    %c0_371 = arith.constant 0 : index
    %c51_372 = arith.constant 51 : index
    %548 = vector.load %arg7[%c2_370, %c0_371, %c51_372] : memref<4x8x448xf32, #tpu.memory_space<vmem>>, vector<1x8x384xf32>
    %549 = vector.shape_cast %548 : vector<1x8x384xf32> to vector<8x384xf32>
    %c0_373 = arith.constant 0 : index
    %c34_374 = arith.constant 34 : index
    %550 = vector.load %arg4[%c0_373, %c34_374] : memref<8x36xf32, #tpu.memory_space<vmem>>, vector<8x1xf32>
    %551 = vector.broadcast %550 : vector<8x1xf32> to vector<8x384xf32>
    %552 = arith.mulf %549, %551 : vector<8x384xf32>
    %553 = arith.addf %547, %552 : vector<8x384xf32>
    %c3_375 = arith.constant 3 : index
    %c0_376 = arith.constant 0 : index
    %c51_377 = arith.constant 51 : index
    %554 = vector.load %arg7[%c3_375, %c0_376, %c51_377] : memref<4x8x448xf32, #tpu.memory_space<vmem>>, vector<1x8x384xf32>
    %555 = vector.shape_cast %554 : vector<1x8x384xf32> to vector<8x384xf32>
    %c0_378 = arith.constant 0 : index
    %c35_379 = arith.constant 35 : index
    %556 = vector.load %arg4[%c0_378, %c35_379] : memref<8x36xf32, #tpu.memory_space<vmem>>, vector<8x1xf32>
    %557 = vector.broadcast %556 : vector<8x1xf32> to vector<8x384xf32>
    %558 = arith.mulf %555, %557 : vector<8x384xf32>
    %559 = arith.addf %553, %558 : vector<8x384xf32>
    %cst_380 = arith.constant 0.000000e+00 : f32
    %560 = vector.broadcast %cst_380 : f32 to vector<8x384xf32>
    %561 = arith.select %4, %559, %560 : vector<8x384xi1>, vector<8x384xf32>
    %cst_381 = arith.constant dense<0.000000e+00> : vector<8xf32>
    %562 = vector.multi_reduction <add>, %561, %cst_381 [1] : vector<8x384xf32> to vector<8xf32>
    %563 = vector.shape_cast %562 : vector<8xf32> to vector<8x1xf32>
    %564 = vector.extract_strided_slice %563 {offsets = [0, 0], sizes = [4, 1], strides = [1, 1]} : vector<8x1xf32> to vector<4x1xf32>
    %565 = vector.extract_strided_slice %563 {offsets = [4, 0], sizes = [4, 1], strides = [1, 1]} : vector<8x1xf32> to vector<4x1xf32>
    %566 = arith.addf %564, %565 : vector<4x1xf32>
    %567 = tpu.concatenate %566, %566 in 0 : vector<4x1xf32>, vector<4x1xf32> -> vector<8x1xf32>
    %cst_382 = arith.constant 0.001953125 : f32
    %568 = vector.broadcast %cst_382 : f32 to vector<8x1xf32>
    %569 = arith.mulf %567, %568 : vector<8x1xf32>
    %570 = vector.broadcast %569 : vector<8x1xf32> to vector<8x384xf32>
    %571 = arith.subf %559, %570 : vector<8x384xf32>
    %cst_383 = arith.constant 0.000000e+00 : f32
    %572 = vector.broadcast %cst_383 : f32 to vector<8x384xf32>
    %573 = arith.select %4, %571, %572 : vector<8x384xi1>, vector<8x384xf32>
    %574 = arith.mulf %573, %573 : vector<8x384xf32>
    %cst_384 = arith.constant dense<0.000000e+00> : vector<8xf32>
    %575 = vector.multi_reduction <add>, %574, %cst_384 [1] : vector<8x384xf32> to vector<8xf32>
    %576 = vector.shape_cast %575 : vector<8xf32> to vector<8x1xf32>
    %577 = vector.extract_strided_slice %576 {offsets = [0, 0], sizes = [4, 1], strides = [1, 1]} : vector<8x1xf32> to vector<4x1xf32>
    %578 = vector.extract_strided_slice %576 {offsets = [4, 0], sizes = [4, 1], strides = [1, 1]} : vector<8x1xf32> to vector<4x1xf32>
    %579 = arith.addf %577, %578 : vector<4x1xf32>
    %580 = tpu.concatenate %579, %579 in 0 : vector<4x1xf32>, vector<4x1xf32> -> vector<8x1xf32>
    %cst_385 = arith.constant 0.001953125 : f32
    %581 = vector.broadcast %cst_385 : f32 to vector<8x1xf32>
    %582 = arith.mulf %580, %581 : vector<8x1xf32>
    %c0_386 = arith.constant 0 : index
    %c0_387 = arith.constant 0 : index
    %c0_388 = arith.constant 0 : index
    %583 = vector.load %arg5[%c0_386, %c0_387, %c0_388] : memref<2x8x1xf32, #tpu.memory_space<vmem>>, vector<1x8x1xf32>
    %584 = vector.shape_cast %583 : vector<1x8x1xf32> to vector<8x1xf32>
    %cst_389 = arith.constant 9.99999974E-6 : f32
    %585 = vector.broadcast %cst_389 : f32 to vector<8x1xf32>
    %586 = arith.addf %582, %585 : vector<8x1xf32>
    %587 = math.rsqrt %586 : vector<8x1xf32>
    %588 = arith.mulf %584, %587 : vector<8x1xf32>
    %c1_390 = arith.constant 1 : index
    %c0_391 = arith.constant 0 : index
    %c0_392 = arith.constant 0 : index
    %589 = vector.load %arg5[%c1_390, %c0_391, %c0_392] : memref<2x8x1xf32, #tpu.memory_space<vmem>>, vector<1x8x1xf32>
    %590 = vector.shape_cast %589 : vector<1x8x1xf32> to vector<8x1xf32>
    %591 = arith.mulf %569, %588 : vector<8x1xf32>
    %592 = arith.subf %590, %591 : vector<8x1xf32>
    %593 = vector.broadcast %588 : vector<8x1xf32> to vector<8x384xf32>
    %594 = arith.mulf %559, %593 : vector<8x384xf32>
    %595 = vector.broadcast %592 : vector<8x1xf32> to vector<8x384xf32>
    %596 = arith.addf %594, %595 : vector<8x384xf32>
    %c0_393 = arith.constant 0 : index
    %c32_394 = arith.constant 32 : index
    %597 = vector.load %arg0[%c0_393, %c32_394] : memref<8x448xf32, #tpu.memory_space<vmem>>, vector<8x384xf32>
    %598 = arith.addf %596, %597 : vector<8x384xf32>
    %cst_395 = arith.constant 0.000000e+00 : f32
    %599 = vector.broadcast %cst_395 : f32 to vector<8x384xf32>
    %600 = arith.maximumf %598, %599 : vector<8x384xf32>
    %c0_396 = arith.constant 0 : index
    %c0_397 = arith.constant 0 : index
    %601 = vector.load %arg6[%c0_396, %c0_397] : memref<8x384xf32, #tpu.memory_space<vmem>>, vector<8x384xf32>
    tpu.vector_store %arg6[%c0_396, %c0_397], %600 {strides = array<i32>} : memref<8x384xf32, #tpu.memory_space<vmem>>, vector<8x384xf32>,
    return
  }
}

</mosaic_0001>

<bundles_post_ra>
// kernel: tile.38
= control target key start
LH: loop header
LB: loop body
LE: loop exit
PB: predicated region body
PF: predicated region fallthrough
CT: control target
= control target key end

     0   :  { %s22_s0 = inlined_call_operand.vmem [shape: f32[4], index: 0, kind: input, shape index: {}]   ;;  %s23_s1 = inlined_call_operand.vmem [shape: f32[2,4], index: 1, kind: output, shape index: {}]  }
   0x1   :  { %v4_v0 = vld [vmem:[%s22_s0] ss:$0 sm:$0xff] }
   0x2   :  { %5 = vst [vmem:[%s23_s1] sm:$0x3] %v4_v0 }

// kernel: tile.43
= control target key start
LH: loop header
LB: loop body
LE: loop exit
PB: predicated region body
PF: predicated region fallthrough
CT: control target
= control target key end

     0   :  { %vm7_vm0 = vcmask 31744   ;;  %vm13_vm1 = vcmask 64544   ;;  %s39_s0 = inlined_call_operand.vmem [shape: f32[2,4], index: 0, kind: input, shape index: {}]   ;;  %s40_s1 = inlined_call_operand.vmem [shape: f32[1,8], index: 1, kind: output, shape index: {}]  }
   0x1   :  { %v4_v0 = vld [vmem:[%s39_s0] sm:$0x3]  ;;  %s22_s0 = smov 4  }
   0x2   :  { %5 = vst [vmem:[#allocation1] sm:$0x3] %v4_v0 }
   0x9   :  { %v10_v1 = vld [vmem:[#allocation1 + $0x1] sm:$0x1]   ;;  %v6_v2 = vld [vmem:[#allocation1] sm:$0x1]  }
   0xa   :  { %11 = vrot.lane.b32.xlu0 %v10_v1, %s22_s0  ;;  %8 = vst.msk [vmem:[#allocation0] sm:$0x1] %vm7_vm0, %v6_v2  }
  0x7c   :  { %v12_v3 = vpop.permute.xlu0 %11  }
  0x7d   :  { %14 = vst.msk [vmem:[#allocation0] sm:$0x1] %vm13_vm1, %v12_v3  }
  0x84   :  { %v18_v4 = vld [vmem:[#allocation0] sm:$0x1] }
  0x85   :  { %20 = vst [vmem:[%s40_s1] sm:$0x1] %v18_v4 }

// kernel: residual_block.1
= control target key start
LH: loop header
LB: loop body
LE: loop exit
PB: predicated region body
PF: predicated region fallthrough
CT: control target
= control target key end

     0   :  { %v5583_v0 = vmov 6   ;;  %v5585_v1 = vmov 4   ;;  %v3004_v3 = vmov 7   ;;  %v5584_v4 = vmov 5   ;;  %s3038_s14 = smov 127   ;;  %s3039_s15 = smov 126   ;;  %s5554_s2 = inlined_call_operand.vmem [shape: f32[8,36], index: 2, kind: input, shape index: {}]   ;;  %s5555_s0 = inlined_call_operand.vmem [shape: f32[8,448], index: 0, kind: input, shape index: {}]   ;;  %s5556_s1 = inlined_call_operand.vmem [shape: f32[1,384], index: 1, kind: input, shape index: {}]   ;;  %s5557_s4 = inlined_call_operand.vmem [shape: f32[8,36], index: 4, kind: input, shape index: {}]   ;;  %s5558_s3 = inlined_call_operand.vmem [shape: f32[2,8,1], index: 3, kind: input, shape index: {}]   ;;  %s5559_s5 = inlined_call_operand.vmem [shape: f32[2,8,1], index: 5, kind: input, shape index: {}]   ;;  %s5560_s6 = inlined_call_operand.vmem [shape: f32[8,384], index: 6, kind: output, shape index: {}]  }
   0x1   :  { %2924 = vset.pattern.permute.xlu1 %v5583_v0  ;;  %2922 = vset.pattern.permute.xlu0 %v5585_v1  ;;  %v3088_v2 = vld [vmem:[%s5554_s2] sm:$0xff]  ;;  %v25_v5 = vlaneseq  ;;  %v5582_v6 = vmov 8   ;;  %v5581_v7 = vmov 9   ;;  %v5596_v20 = vmov 10   ;;  %s3040_s16 = smov 110   ;;  %s3041_s17 = smov 109  }
   0x2   :  { %393 = vperm.xlu1 %2924, %v3088_v2   ;;  %330 = vperm.xlu0 %2922, %v3088_v2   ;;  %v43_v10 = vld [vmem:[%s5555_s0] ss:$8 sm:$0xf]  ;;  %v2867_v13 = vld [vmem:[%s5555_s0 + $0x4] ss:$8 sm:$0xf] }
   0x3   :  { %v3098_v8 = vshrl.u32 %v25_v5, 7  ;;  %v2868_v19 = vld [vmem:[%s5555_s0 + $0x1] ss:$8 sm:$0xf]  ;;  %v5579_v21 = vmov 12   ;;  %vm88_vm0 = vcmask 1043456  }
   0x4   :  { %v2869_v25 = vld [vmem:[%s5555_s0 + $0x5] ss:$8 sm:$0xf]  ;;  %vm96_vm1 = vcmask 523264   ;;  %v5580_v43 = vmov 11   ;;  %v5577_v44 = vmov 15  }
   0x5   :  { %5693 = vst [vmem:[#allocation3_spill] sm:$0xff] %v3098_v8  ;;  %v3103_v9 = vsub.s32 2, %v3098_v8  ;;  %v3109_v11 = vsub.s32 0, %v3098_v8  ;;  %v3112_v12 = vsub.s32 1, %v3098_v8  ;;  %v3118_v14 = vsub.s32 3, %v3098_v8  ;;  %s3042_s18 = smov 108  }
   0x6   :  { %2925 = vset.pattern.permute.xlu1 %v3004_v3  ;;  %2923 = vset.pattern.permute.xlu0 %v5584_v4  ;;  %v2870_v37 = vld [vmem:[%s5555_s0 + $0x2] ss:$8 sm:$0xf]  ;;  %v2871_v38 = vld [vmem:[%s5555_s0 + $0x6] ss:$8 sm:$0xf] }
   0x7   :  { %424 = vperm.xlu1 %2925, %v3088_v2   ;;  %362 = vperm.xlu0 %2923, %v3088_v2   ;;  %5694 = vst [vmem:[#allocation4_spill] sm:$0xff] %v3103_v9  ;;  %5695 = vst [vmem:[#allocation5_spill] sm:$0xff] %v3109_v11  ;;  %v56_v15 = vrot.slane %v43_v10, %v3103_v9  ;;  %v79_v16 = vrot.slane %v2867_v13, %v3103_v9  ;;  %v2872_v51 = vld [vmem:[%s5555_s0 + $0x3] ss:$8 sm:$0xf]  ;;  %s3043_s19 = smov 92  }
   0x8   :  { %5696 = vst [vmem:[#allocation6_spill] sm:$0xff] %v3112_v12  ;;  %5697 = vst [vmem:[#allocation7_spill] sm:$0xff] %v3118_v14  ;;  %v48_v17 = vrot.slane %v43_v10, %v3109_v11  ;;  %v71_v18 = vrot.slane %v2867_v13, %v3109_v11  ;;  %v52_v22 = vrot.slane %v43_v10, %v3112_v12  ;;  %v2873_v56 = vld [vmem:[%s5555_s0 + $0x7] ss:$8 sm:$0xf]  ;;  %s3044_s20 = smov 91  }
   0x9   :  { %v75_v23 = vrot.slane %v2867_v13, %v3112_v12  ;;  %v104_v24 = vrot.slane %v2868_v19, %v3109_v11  ;;  %v3138_v26 = vsel %vm88_vm0, %v56_v15, %v79_v16  ;;  %v127_v28 = vrot.slane %v2869_v25, %v3109_v11  ;;  %s3045_s21 = smov 90   ;;  %s3046_s22 = smov 115  }
   0xa   :  { %v3141_v27 = vsel %vm88_vm0, %v48_v17, %v71_v18  ;;  %v60_v30 = vrot.slane %v43_v10, %v3118_v14  ;;  %v83_v31 = vrot.slane %v2867_v13, %v3118_v14  ;;  %v112_v32 = vrot.slane %v2868_v19, %v3103_v9 }
   0xb   :  { %2926 = vset.pattern.permute.xlu1 %v5582_v6  ;;  %2927 = vset.pattern.permute.xlu0 %v5581_v7  ;;  %93 = vst [vmem:[#allocation2] sm:$0xff] %v3141_v27  ;;  %v3146_v29 = vsel %vm88_vm0, %v52_v22, %v75_v23  ;;  %v3152_v33 = vsel %vm88_vm0, %v104_v24, %v127_v28  ;;  %v5595_v10 = vmov 13   ;;  %v5575_v13 = vmov 18  }
   0xc   :  { %455 = vperm.xlu1 %2926, %v3088_v2   ;;  %487 = vperm.xlu0 %2927, %v3088_v2   ;;  %v135_v34 = vrot.slane %v2869_v25, %v3103_v9  ;;  %v108_v35 = vrot.slane %v2868_v19, %v3112_v12  ;;  %v131_v36 = vrot.slane %v2869_v25, %v3112_v12  ;;  %v5573_v28 = vmov 21  }
   0xd   :  { %149 = vst [vmem:[#allocation2 + $0x20] sm:$0xff] %v3152_v33  ;;  %v92_v39 = vsel %vm88_vm0, %v60_v30, %v83_v31  ;;  %v159_v40 = vrot.slane %v2870_v37, %v3109_v11  ;;  %v182_v41 = vrot.slane %v2871_v38, %v3109_v11  ;;  %v116_v42 = vrot.slane %v2868_v19, %v3118_v14 }
   0xe   :  { %97 = vst.msk [vmem:[#allocation2 + $0x18] sm:$0xff] %vm96_vm1, %v92_v39  ;;  %v3172_v45 = vsel %vm88_vm0, %v112_v32, %v135_v34  ;;  %v3175_v46 = vsel %vm88_vm0, %v108_v35, %v131_v36  ;;  %v139_v47 = vrot.slane %v2869_v25, %v3118_v14  ;;  %v167_v49 = vrot.slane %v2870_v37, %v3103_v9 }
   0xf   :  { %v3181_v48 = vsel %vm88_vm0, %v159_v40, %v182_v41  ;;  %v190_v50 = vrot.slane %v2871_v38, %v3103_v9  ;;  %v163_v53 = vrot.slane %v2870_v37, %v3112_v12  ;;  %v186_v54 = vrot.slane %v2871_v38, %v3112_v12 }
  0x10   :  { %2928 = vset.pattern.permute.xlu1 %v5596_v20  ;;  %2930 = vset.pattern.permute.xlu0 %v5579_v21  ;;  %204 = vst [vmem:[#allocation2 + $0x40] sm:$0xff] %v3181_v48  ;;  %v147_v52 = vsel %vm88_vm0, %v116_v42, %v139_v47  ;;  %v214_v55 = vrot.slane %v2872_v51, %v3109_v11  ;;  %v5578_v25 = vmov 14   ;;  %v5594_v30 = vmov 16  }
  0x11   :  { %518 = vperm.xlu1 %2928, %v3088_v2   ;;  %580 = vperm.xlu0 %2930, %v3088_v2   ;;  %152 = vst.msk [vmem:[#allocation2 + $0x38] sm:$0xff] %vm96_vm1, %v147_v52  ;;  %v3198_v57 = vsel %vm88_vm0, %v167_v49, %v190_v50  ;;  %v237_v58 = vrot.slane %v2873_v56, %v3109_v11  ;;  %v5571_v31 = vmov 24   ;;  %v5576_v32 = vmov 17  }
  0x12   :  { %v171_v59 = vrot.slane %v2870_v37, %v3118_v14  ;;  %v194_v60 = vrot.slane %v2871_v38, %v3118_v14  ;;  %v3204_v61 = vsel %vm88_vm0, %v163_v53, %v186_v54  ;;  %v222_v62 = vrot.slane %v2872_v51, %v3103_v9 }
  0x13   :  { %v245_v63 = vrot.slane %v2873_v56, %v3103_v9  ;;  %v218_v5 = vrot.slane %v2872_v51, %v3112_v12  ;;  %v3212_v15 = vsel %vm88_vm0, %v214_v55, %v237_v58  ;;  %v241_v17 = vrot.slane %v2873_v56, %v3112_v12 }
  0x14   :  { %v202_v16 = vsel %vm88_vm0, %v171_v59, %v194_v60  ;;  %259 = vst [vmem:[#allocation2 + $0x60] sm:$0xff] %v3212_v15  ;;  %v226_v19 = vrot.slane %v2872_v51, %v3118_v14  ;;  %v249_v22 = vrot.slane %v2873_v56, %v3118_v14  ;;  %v5569_v34 = vmov 27  }
  0x15   :  { %2929 = vset.pattern.permute.xlu1 %v5580_v43  ;;  %2933 = vset.pattern.permute.xlu0 %v5577_v44  ;;  %207 = vst.msk [vmem:[#allocation2 + $0x58] sm:$0xff] %vm96_vm1, %v202_v16  ;;  %v3221_v18 = vsel %vm88_vm0, %v222_v62, %v245_v63  ;;  %v3226_v23 = vsel %vm88_vm0, %v218_v5, %v241_v17  ;;  %v5593_v35 = vmov 19   ;;  %v5567_v36 = vmov 30  }
  0x16   :  { %549 = vperm.xlu1 %2929, %v3088_v2   ;;  %674 = vperm.xlu0 %2933, %v3088_v2   ;;  %v257_v24 = vsel %vm88_vm0, %v226_v19, %v249_v22  ;;  %v5574_v37 = vmov 20   ;;  %v5565_v38 = vmov 31   ;;  %v5592_v39 = vmov 22  }
  0x17   :  { %262 = vst.msk [vmem:[#allocation2 + $0x78] sm:$0xff] %vm96_vm1, %v257_v24  ;;  %v5563_v40 = vmov 3   ;;  %v5572_v41 = vmov 23   ;;  %v5561_v42 = vmov 35   ;;  %v5591_v47 = vmov 25  }
  0x18   :  { %v5570_v49 = vmov 26   ;;  %v5590_v50 = vmov 28   ;;  %v5568_v51 = vmov 29   ;;  %v5586_v52 = vmov 0  }
  0x19   :  { %v5589_v53 = vmov 2   ;;  %v5564_v54 = vmov 32   ;;  %v5588_v55 = vmov 33   ;;  %v5562_v56 = vmov 34  }
  0x1a   :  { %2931 = vset.pattern.permute.xlu1 %v5595_v10  ;;  %2936 = vset.pattern.permute.xlu0 %v5575_v13  ;;  %vm349_vm2 = vcmask 1039360   ;;  %vm474_vm3 = vcmask 1031168   ;;  %vm599_vm4 = vcmask 900096   ;;  %vm724_vm5 = vcmask 891904  }
  0x1b   :  { %612 = vperm.xlu1 %2931, %v3088_v2   ;;  %768 = vperm.xlu0 %2936, %v3088_v2   ;;  %vm849_vm6 = vcmask 883712   ;;  %vm974_vm7 = vcmask 752640   ;;  %vm1099_vm8 = vcmask 744448   ;;  %vm1224_vm9 = vcmask 736256  }
  0x1c   :  { %vm1341_vm10 = vcmask 941056   ;;  %vm1504_vm14 = vcmask 1047808   ;;  %vm1497_vm15 = vcmask 261120  }
  0x1f   :  { %2932 = vset.pattern.permute.xlu1 %v5578_v25  ;;  %2939 = vset.pattern.permute.xlu0 %v5573_v28 }
  0x20   :  { %643 = vperm.xlu1 %2932, %v3088_v2   ;;  %862 = vperm.xlu0 %2939, %v3088_v2  }
  0x24   :  { %2934 = vset.pattern.permute.xlu1 %v5594_v30  ;;  %2942 = vset.pattern.permute.xlu0 %v5571_v31 }
  0x25   :  { %705 = vperm.xlu1 %2934, %v3088_v2   ;;  %955 = vperm.xlu0 %2942, %v3088_v2  }
  0x29   :  { %2935 = vset.pattern.permute.xlu1 %v5576_v32  ;;  %2945 = vset.pattern.permute.xlu0 %v5569_v34 }
  0x2a   :  { %737 = vperm.xlu1 %2935, %v3088_v2   ;;  %1049 = vperm.xlu0 %2945, %v3088_v2  }
  0x2e   :  { %2937 = vset.pattern.permute.xlu1 %v5593_v35  ;;  %2948 = vset.pattern.permute.xlu0 %v5567_v36 }
  0x2f   :  { %799 = vperm.xlu1 %2937, %v3088_v2   ;;  %1143 = vperm.xlu0 %2948, %v3088_v2  }
  0x33   :  { %2938 = vset.pattern.permute.xlu1 %v5574_v37  ;;  %2951 = vset.pattern.permute.xlu0 %v5565_v38  ;;  %v3320_v38 = vld [vmem:[#allocation2 + $0x78] sm:$0xff] }
  0x34   :  { %830 = vperm.xlu1 %2938, %v3088_v2   ;;  %1174 = vperm.xlu0 %2951, %v3088_v2  }
  0x38   :  { %2940 = vset.pattern.permute.xlu1 %v5592_v39  ;;  %2954 = vset.pattern.permute.xlu0 %v5563_v40  ;;  %v3306_v40 = vld [vmem:[#allocation2 + $0x58] sm:$0xff] }
  0x39   :  { %893 = vperm.xlu1 %2940, %v3088_v2   ;;  %318 = vperm.xlu0 %2954, %v3088_v2  }
  0x3d   :  { %2941 = vset.pattern.permute.xlu1 %v5572_v41  ;;  %2957 = vset.pattern.permute.xlu0 %v5561_v42  ;;  %v3296_v42 = vld [vmem:[#allocation2 + $0x38] sm:$0xff] }
  0x3e   :  { %924 = vperm.xlu1 %2941, %v3088_v2   ;;  %1299 = vperm.xlu0 %2957, %v3088_v2  }
  0x42   :  { %2943 = vset.pattern.permute.xlu1 %v5591_v47  ;;  %2962 = vset.pattern.permute.xlu0 %v3004_v3  ;;  %v5566_v3 = vmov 1  }
  0x43   :  { %987 = vperm.xlu1 %2943, %v3088_v2  }
  0x47   :  { %2944 = vset.pattern.permute.xlu1 %v5570_v49 }
  0x48   :  { %1018 = vperm.xlu1 %2944, %v3088_v2  }
  0x4c   :  { %2946 = vset.pattern.permute.xlu1 %v5590_v50 }
  0x4d   :  { %1080 = vperm.xlu1 %2946, %v3088_v2  }
  0x51   :  { %2947 = vset.pattern.permute.xlu1 %v5568_v51 }
  0x52   :  { %1112 = vperm.xlu1 %2947, %v3088_v2  }
  0x56   :  { %2949 = vset.pattern.permute.xlu1 %v5586_v52 }
  0x57   :  { %270 = vperm.xlu1 %2949, %v3088_v2  }
  0x5b   :  { %2950 = vset.pattern.permute.xlu1 %v5566_v3 }
  0x5c   :  { %286 = vperm.xlu1 %2950, %v3088_v2  }
  0x60   :  { %2952 = vset.pattern.permute.xlu1 %v5589_v53 }
  0x61   :  { %302 = vperm.xlu1 %2952, %v3088_v2  }
  0x65   :  { %2953 = vset.pattern.permute.xlu1 %v5564_v54 }
  0x66   :  { %1205 = vperm.xlu1 %2953, %v3088_v2  }
  0x6a   :  { %2955 = vset.pattern.permute.xlu1 %v5588_v55 }
  0x6b   :  { %1237 = vperm.xlu1 %2955, %v3088_v2  }
  0x6f   :  { %2956 = vset.pattern.permute.xlu1 %v5562_v56 }
  0x70   :  { %1268 = vperm.xlu1 %2956, %v3088_v2   ;;  %v3286_v2 = vld [vmem:[#allocation2 + $0x18] sm:$0xff] }
  0x74   :  { %2958 = vset.pattern.permute.xlu1 %v5586_v52 }
  0x81   :  { %v331_v58 = vpop.permute.xlu0 %330  ;;  %v394_v59 = vpop.permute.xlu1 %393 }
  0x82   :  { %v335_v60 = vmul.f32 %v331_v58, %v3138_v26  ;;  %v333_v62 = vmul.f32 %v331_v58, %v3141_v27  ;;  %v334_v5 = vmul.f32 %v331_v58, %v3146_v29  ;;  %v336_v22 = vmul.f32 %v331_v58, %v3286_v2 }
  0x83   :  { %v398_v58 = vmul.f32 %v394_v59, %v3198_v57 }
  0x84   :  { %345 = vrot.lane.b32.xlu0 %v335_v60, %s3038_s14  ;;  %341 = vrot.lane.b32.xlu1 %v333_v62, %s3038_s14  ;;  %v396_v62 = vmul.f32 %v394_v59, %v3181_v48 }
  0x86   :  { %v363_v63 = vpop.permute.xlu0 %362  ;;  %v425_v16 = vpop.permute.xlu1 %424 }
  0x87   :  { %v365_v17 = vmul.f32 %v363_v63, %v3152_v33  ;;  %v367_v19 = vmul.f32 %v363_v63, %v3172_v45  ;;  %v366_v60 = vmul.f32 %v363_v63, %v3175_v46  ;;  %v427_v56 = vmul.f32 %v425_v16, %v3212_v15 }
  0x88   :  { %343 = vrot.lane.b32.xlu1 %v334_v5, %s3038_s14 }
  0x89   :  { %373 = vrot.lane.b32.xlu0 %v365_v17, %s3038_s14  ;;  %v368_v17 = vmul.f32 %v363_v63, %v3296_v42 }
  0x8b   :  { %v456_v24 = vpop.permute.xlu1 %455 }
  0x8c   :  { %347 = vrot.lane.b32.xlu1 %v336_v22, %s3038_s14  ;;  %v397_v22 = vmul.f32 %v394_v59, %v3204_v61  ;;  %v459_v3 = vmul.f32 %v456_v24, %v3146_v29 }
  0x8d   :  { %377 = vrot.lane.b32.xlu0 %v367_v19, %s3038_s14 }
  0x90   :  { %375 = vrot.lane.b32.xlu1 %v366_v60, %s3038_s14  ;;  %v519_v5 = vpop.permute.xlu1 %518  ;;  %v399_v60 = vmul.f32 %v394_v59, %v3306_v40  ;;  %v488_v59 = vpop.permute.xlu0 %487 }
  0x91   :  { %404 = vrot.lane.b32.xlu0 %v396_v62, %s3038_s14  ;;  %v429_v62 = vmul.f32 %v425_v16, %v3221_v18  ;;  %v521_v36 = vmul.f32 %v519_v5, %v3181_v48 }
  0x94   :  { %379 = vrot.lane.b32.xlu1 %v368_v17, %s3038_s14  ;;  %v428_v17 = vmul.f32 %v425_v16, %v3226_v23 }
  0x95   :  { %408 = vrot.lane.b32.xlu0 %v398_v58, %s3038_s14  ;;  %v550_v19 = vpop.permute.xlu1 %549  ;;  %v458_v58 = vmul.f32 %v456_v24, %v3141_v27 }
  0x96   :  { %v553_v34 = vmul.f32 %v550_v19, %v3226_v23 }
  0x98   :  { %406 = vrot.lane.b32.xlu1 %v397_v22, %s3038_s14  ;;  %v460_v22 = vmul.f32 %v456_v24, %v3138_v26 }
  0x99   :  { %435 = vrot.lane.b32.xlu0 %v427_v56, %s3038_s14  ;;  %v430_v56 = vmul.f32 %v425_v16, %v3320_v38  ;;  %v492_v16 = vmul.f32 %v488_v59, %v3172_v45 }
  0x9a   :  { %v3311_v63 = vpop.permute.xlu1 %612 }
  0x9b   :  { %v615_v49 = vmul.f32 %v3311_v63, %v3152_v33 }
  0x9c   :  { %410 = vrot.lane.b32.xlu1 %v399_v60, %s3038_s14 }
  0x9d   :  { %439 = vrot.lane.b32.xlu0 %v429_v62, %s3038_s14  ;;  %v490_v62 = vmul.f32 %v488_v59, %v3152_v33 }
  0x9f   :  { %v3318_v54 = vpop.permute.xlu1 %643 }
  0xa0   :  { %437 = vrot.lane.b32.xlu1 %v428_v17, %s3038_s14  ;;  %v646_v41 = vmul.f32 %v3318_v54, %v3181_v48  ;;  %v649_v37 = vmul.f32 %v3318_v54, %v3306_v40 }
  0xa1   :  { %466 = vrot.lane.b32.xlu0 %v458_v58, %s3039_s15  ;;  %v461_v58 = vmul.f32 %v456_v24, %v3286_v2  ;;  %v522_v24 = vmul.f32 %v519_v5, %v3204_v61 }
  0xa4   :  { %441 = vrot.lane.b32.xlu1 %v430_v56, %s3038_s14  ;;  %v3327_v60 = vpop.permute.xlu1 %705  ;;  %v491_v56 = vmul.f32 %v488_v59, %v3175_v46 }
  0xa5   :  { %470 = vrot.lane.b32.xlu0 %v460_v22, %s3039_s15 }
  0xa8   :  { %468 = vrot.lane.b32.xlu1 %v459_v3, %s3039_s15  ;;  %v493_v3 = vmul.f32 %v488_v59, %v3296_v42  ;;  %v581_v59 = vpop.permute.xlu0 %580 }
  0xa9   :  { %498 = vrot.lane.b32.xlu0 %v490_v62, %s3039_s15  ;;  %v3334_v17 = vpop.permute.xlu1 %737  ;;  %v523_v62 = vmul.f32 %v519_v5, %v3198_v57 }
  0xaa   :  { %v740_v25 = vmul.f32 %v3334_v17, %v3152_v33  ;;  %v741_v21 = vmul.f32 %v3334_v17, %v3175_v46  ;;  %v743_v43 = vmul.f32 %v3334_v17, %v3296_v42 }
  0xac   :  { %472 = vrot.lane.b32.xlu1 %v461_v58, %s3039_s15 }
  0xad   :  { %502 = vrot.lane.b32.xlu0 %v492_v16, %s3039_s15  ;;  %v552_v16 = vmul.f32 %v550_v19, %v3212_v15 }
  0xae   :  { %v3341_v22 = vpop.permute.xlu1 %799 }
  0xaf   :  { %v804_v6 = vmul.f32 %v3341_v22, %v3221_v18 }
  0xb0   :  { %500 = vrot.lane.b32.xlu1 %v491_v56, %s3039_s15  ;;  %v554_v56 = vmul.f32 %v550_v19, %v3221_v18 }
  0xb1   :  { %529 = vrot.lane.b32.xlu0 %v521_v36, %s3039_s15  ;;  %v524_v36 = vmul.f32 %v519_v5, %v3306_v40  ;;  %v585_v5 = vmul.f32 %v581_v59, %v3138_v26 }
  0xb3   :  { %v3348_v51 = vpop.permute.xlu1 %830 }
  0xb4   :  { %504 = vrot.lane.b32.xlu1 %v493_v3, %s3039_s15  ;;  %v833_v4 = vmul.f32 %v3348_v51, %v3141_v27  ;;  %v835_v1 = vmul.f32 %v3348_v51, %v3138_v26 }
  0xb5   :  { %533 = vrot.lane.b32.xlu0 %v523_v62, %s3039_s15  ;;  %v583_v62 = vmul.f32 %v581_v59, %v3141_v27 }
  0xb8   :  { %531 = vrot.lane.b32.xlu1 %v522_v24, %s3039_s15  ;;  %v3355_v58 = vpop.permute.xlu1 %893  ;;  %v555_v24 = vmul.f32 %v550_v19, %v3320_v38  ;;  %v586_v19 = vmul.f32 %v581_v59, %v3286_v2 }
  0xb9   :  { %560 = vrot.lane.b32.xlu0 %v552_v16, %s3039_s15  ;;  %v896_v47 = vmul.f32 %v3355_v58, %v3181_v48  ;;  %v898_v39 = vmul.f32 %v3355_v58, %v3198_v57 }
  0xbc   :  { %535 = vrot.lane.b32.xlu1 %v524_v36, %s3039_s15  ;;  %v675_v36 = vpop.permute.xlu0 %674 }
  0xbd   :  { %564 = vrot.lane.b32.xlu0 %v554_v56, %s3039_s15  ;;  %v3362_v3 = vpop.permute.xlu1 %924  ;;  %v584_v56 = vmul.f32 %v581_v59, %v3146_v29  ;;  %v618_v59 = vmul.f32 %v3311_v63, %v3296_v42 }
  0xbe   :  { %v927_v30 = vmul.f32 %v3362_v3, %v3212_v15  ;;  %v929_v10 = vmul.f32 %v3362_v3, %v3221_v18 }
  0xc0   :  { %562 = vrot.lane.b32.xlu1 %v553_v34, %s3039_s15 }
  0xc1   :  { %591 = vrot.lane.b32.xlu0 %v583_v62, %s3040_s16  ;;  %v3380_v62 = vpop.permute.xlu0 %768 }
  0xc2   :  { %v3370_v16 = vpop.permute.xlu1 %987 }
  0xc3   :  { %v990_v12 = vmul.f32 %v3370_v16, %v3152_v33  ;;  %v992_v11 = vmul.f32 %v3370_v16, %v3172_v45 }
  0xc4   :  { %566 = vrot.lane.b32.xlu1 %v555_v24, %s3039_s15  ;;  %v617_v24 = vmul.f32 %v3311_v63, %v3172_v45 }
  0xc5   :  { %595 = vrot.lane.b32.xlu0 %v585_v5, %s3040_s16  ;;  %v3390_v31 = vpop.permute.xlu0 %862 }
  0xc6   :  { %v865_v55 = vmul.f32 %v3390_v31, %v3152_v33  ;;  %v867_v53 = vmul.f32 %v3390_v31, %v3172_v45 }
  0xc7   :  { %v3377_v34 = vpop.permute.xlu1 %1018 }
  0xc8   :  { %593 = vrot.lane.b32.xlu1 %v584_v56, %s3040_s16  ;;  %v616_v56 = vmul.f32 %v3311_v63, %v3175_v46 }
  0xc9   :  { %623 = vrot.lane.b32.xlu0 %v615_v49, %s3040_s16 }
  0xcc   :  { %597 = vrot.lane.b32.xlu1 %v586_v19, %s3040_s16  ;;  %v3387_v5 = vpop.permute.xlu1 %1080  ;;  %v648_v19 = vmul.f32 %v3318_v54, %v3198_v57 }
  0xcd   :  { %627 = vrot.lane.b32.xlu0 %v617_v24, %s3040_s16  ;;  %v3404_v24 = vpop.permute.xlu0 %955 }
  0xce   :  { %v958_v14 = vmul.f32 %v3404_v24, %v3141_v27  ;;  %v960_v8 = vmul.f32 %v3404_v24, %v3138_v26 }
  0xd0   :  { %625 = vrot.lane.b32.xlu1 %v616_v56, %s3040_s16  ;;  %v647_v56 = vmul.f32 %v3318_v54, %v3204_v61  ;;  %v680_v54 = vmul.f32 %v675_v36, %v3320_v38 }
  0xd1   :  { %654 = vrot.lane.b32.xlu0 %v646_v41, %s3040_s16  ;;  %v3398_v49 = vpop.permute.xlu1 %1112  ;;  %v677_v41 = vmul.f32 %v675_v36, %v3212_v15  ;;  %v3415_v63 = vpop.permute.xlu0 %1049 }
  0xd4   :  { %629 = vrot.lane.b32.xlu1 %v618_v59, %s3040_s16  ;;  %v679_v59 = vmul.f32 %v675_v36, %v3221_v18 }
  0xd5   :  { %658 = vrot.lane.b32.xlu0 %v648_v19, %s3040_s16  ;;  %v678_v19 = vmul.f32 %v675_v36, %v3226_v23  ;;  %v3427_v32 = vpop.permute.xlu0 %1143  ;;  %v711_v36 = vmul.f32 %v3327_v60, %v3286_v2 }
  0xd6   :  { %v3408_v28 = vpop.permute.xlu1 %270 }
  0xd8   :  { %656 = vrot.lane.b32.xlu1 %v647_v56, %s3040_s16  ;;  %v708_v56 = vmul.f32 %v3327_v60, %v3141_v27 }
  0xd9   :  { %685 = vrot.lane.b32.xlu0 %v677_v41, %s3040_s16  ;;  %v3440_v44 = vpop.permute.xlu0 %1174 }
  0xdb   :  { %v3419_v13 = vpop.permute.xlu1 %286 }
  0xdc   :  { %660 = vrot.lane.b32.xlu1 %v649_v37, %s3040_s16  ;;  %v710_v37 = vmul.f32 %v3327_v60, %v3138_v26 }
  0xdd   :  { %689 = vrot.lane.b32.xlu0 %v679_v59, %s3040_s16 }
  0xe0   :  { %687 = vrot.lane.b32.xlu1 %v678_v19, %s3040_s16  ;;  %v3430_v41 = vpop.permute.xlu1 %302  ;;  %v709_v19 = vmul.f32 %v3327_v60, %v3146_v29 }
  0xe1   :  { %716 = vrot.lane.b32.xlu0 %v708_v56, %s3041_s17 }
  0xe4   :  { %691 = vrot.lane.b32.xlu1 %v680_v54, %s3040_s16  ;;  %v742_v54 = vmul.f32 %v3334_v17, %v3172_v45 }
  0xe5   :  { %720 = vrot.lane.b32.xlu0 %v710_v37, %s3041_s17  ;;  %v3438_v59 = vpop.permute.xlu1 %1205  ;;  %v3454_v37 = vpop.permute.xlu0 %318 }
  0xe8   :  { %718 = vrot.lane.b32.xlu1 %v709_v19, %s3041_s17 }
  0xe9   :  { %748 = vrot.lane.b32.xlu0 %v740_v25, %s3041_s17  ;;  %v771_v25 = vmul.f32 %v3380_v62, %v3181_v48  ;;  %v3465_v19 = vpop.permute.xlu0 %1299 }
  0xea   :  { %v3450_v56 = vpop.permute.xlu1 %1237 }
  0xec   :  { %722 = vrot.lane.b32.xlu1 %v711_v36, %s3041_s17  ;;  %v773_v36 = vmul.f32 %v3380_v62, %v3198_v57 }
  0xed   :  { %752 = vrot.lane.b32.xlu0 %v742_v54, %s3041_s17 }
  0xef   :  { %v3463_v60 = vpop.permute.xlu1 %1268 }
  0xf0   :  { %750 = vrot.lane.b32.xlu1 %v741_v21, %s3041_s17  ;;  %v772_v21 = vmul.f32 %v3380_v62, %v3204_v61 }
  0xf1   :  { %779 = vrot.lane.b32.xlu0 %v771_v25, %s3041_s17  ;;  %v802_v25 = vmul.f32 %v3341_v22, %v3212_v15 }
  0xf4   :  { %754 = vrot.lane.b32.xlu1 %v743_v43, %s3041_s17  ;;  %v774_v43 = vmul.f32 %v3380_v62, %v3306_v40 }
  0xf5   :  { %783 = vrot.lane.b32.xlu0 %v773_v36, %s3041_s17 }
  0xf6   :  { %v3474_v54 = vpop.permute.xlu0 %345  ;;  %v3476_v7 = vpop.permute.xlu1 %341 }
  0xf8   :  { %781 = vrot.lane.b32.xlu1 %v772_v21, %s3041_s17  ;;  %v803_v21 = vmul.f32 %v3341_v22, %v3226_v23 }
  0xf9   :  { %810 = vrot.lane.b32.xlu0 %v802_v25, %s3041_s17 }
  0xfa   :  { %v3484_v17 = vpop.permute.xlu1 %343 }
  0xfb   :  { %v3488_v36 = vpop.permute.xlu0 %373 }
  0xfc   :  { %785 = vrot.lane.b32.xlu1 %v774_v43, %s3041_s17 }
  0xfd   :  { %814 = vrot.lane.b32.xlu0 %v804_v6, %s3041_s17  ;;  %v805_v6 = vmul.f32 %v3341_v22, %v3320_v38 }
  0xfe   :  { %v3494_v0 = vpop.permute.xlu1 %347 }
  0xff   :  { %v3498_v25 = vpop.permute.xlu0 %377 }
 0x100   :  { %812 = vrot.lane.b32.xlu1 %v803_v21, %s3041_s17  ;;  %v834_v21 = vmul.f32 %v3348_v51, %v3146_v29 }
 0x101   :  { %841 = vrot.lane.b32.xlu0 %v833_v4, %s3042_s18 }
 0x102   :  { %v3504_v62 = vpop.permute.xlu1 %375 }
 0x103   :  { %v3508_v43 = vpop.permute.xlu0 %404 }
 0x104   :  { %816 = vrot.lane.b32.xlu1 %v805_v6, %s3041_s17  ;;  %v836_v6 = vmul.f32 %v3348_v51, %v3286_v2 }
 0x105   :  { %845 = vrot.lane.b32.xlu0 %v835_v1, %s3042_s18 }
 0x106   :  { %v3514_v52 = vpop.permute.xlu1 %379 }
 0x107   :  { %v3518_v4 = vpop.permute.xlu0 %408 }
 0x108   :  { %843 = vrot.lane.b32.xlu1 %v834_v21, %s3042_s18  ;;  %v866_v21 = vmul.f32 %v3390_v31, %v3175_v46 }
 0x109   :  { %873 = vrot.lane.b32.xlu0 %v865_v55, %s3042_s18 }
 0x10a   :  { %v3524_v22 = vpop.permute.xlu1 %406 }
 0x10b   :  { %v3528_v1 = vpop.permute.xlu0 %435 }
 0x10c   :  { %847 = vrot.lane.b32.xlu1 %v836_v6, %s3042_s18  ;;  %v868_v6 = vmul.f32 %v3390_v31, %v3296_v42 }
 0x10d   :  { %877 = vrot.lane.b32.xlu0 %v867_v53, %s3042_s18 }
 0x10e   :  { %v3534_v50 = vpop.permute.xlu1 %410 }
 0x10f   :  { %v3538_v55 = vpop.permute.xlu0 %439 }
 0x110   :  { %875 = vrot.lane.b32.xlu1 %v866_v21, %s3042_s18  ;;  %v897_v21 = vmul.f32 %v3355_v58, %v3204_v61 }
 0x111   :  { %904 = vrot.lane.b32.xlu0 %v896_v47, %s3042_s18 }
 0x112   :  { %v3544_v51 = vpop.permute.xlu1 %437 }
 0x113   :  { %v3548_v53 = vpop.permute.xlu0 %466 }
 0x114   :  { %879 = vrot.lane.b32.xlu1 %v868_v6, %s3042_s18  ;;  %v899_v6 = vmul.f32 %v3355_v58, %v3306_v40 }
 0x115   :  { %908 = vrot.lane.b32.xlu0 %v898_v39, %s3042_s18 }
 0x116   :  { %v3554_v35 = vpop.permute.xlu1 %441 }
 0x117   :  { %v3558_v47 = vpop.permute.xlu0 %470 }
 0x118   :  { %906 = vrot.lane.b32.xlu1 %v897_v21, %s3042_s18  ;;  %v928_v21 = vmul.f32 %v3362_v3, %v3226_v23 }
 0x119   :  { %935 = vrot.lane.b32.xlu0 %v927_v30, %s3042_s18 }
 0x11a   :  { %v3564_v31 = vpop.permute.xlu1 %468 }
 0x11b   :  { %v3568_v39 = vpop.permute.xlu0 %498 }
 0x11c   :  { %910 = vrot.lane.b32.xlu1 %v899_v6, %s3042_s18 }
 0x11d   :  { %939 = vrot.lane.b32.xlu0 %v929_v10, %s3042_s18  ;;  %v930_v10 = vmul.f32 %v3362_v3, %v3320_v38 }
 0x11e   :  { %v3574_v20 = vpop.permute.xlu1 %472 }
 0x11f   :  { %v3578_v30 = vpop.permute.xlu0 %502 }
 0x120   :  { %937 = vrot.lane.b32.xlu1 %v928_v21, %s3042_s18  ;;  %v959_v21 = vmul.f32 %v3404_v24, %v3146_v29 }
 0x121   :  { %966 = vrot.lane.b32.xlu0 %v958_v14, %s3043_s19 }
 0x122   :  { %v3584_v58 = vpop.permute.xlu1 %500 }
 0x123   :  { %v3588_v6 = vpop.permute.xlu0 %529 }
 0x124   :  { %941 = vrot.lane.b32.xlu1 %v930_v10, %s3042_s18  ;;  %v961_v10 = vmul.f32 %v3404_v24, %v3286_v2 }
 0x125   :  { %970 = vrot.lane.b32.xlu0 %v960_v8, %s3043_s19 }
 0x126   :  { %v3594_v9 = vpop.permute.xlu1 %504 }
 0x127   :  { %5698 = vst [vmem:[#allocation8_spill] sm:$0xff] %v3594_v9  ;;  %v3598_v14 = vpop.permute.xlu0 %533 }
 0x128   :  { %5699 = vst [vmem:[#allocation9_spill] sm:$0xff] %v3598_v14  ;;  %968 = vrot.lane.b32.xlu1 %v959_v21, %s3043_s19  ;;  %v991_v21 = vmul.f32 %v3370_v16, %v3175_v46  ;;  %v1021_v14 = vmul.f32 %v3377_v34, %v3181_v48 }
 0x129   :  { %998 = vrot.lane.b32.xlu0 %v990_v12, %s3043_s19 }
 0x12a   :  { %v3604_v3 = vpop.permute.xlu1 %531 }
 0x12b   :  { %v3608_v8 = vpop.permute.xlu0 %560 }
 0x12c   :  { %5700 = vst [vmem:[#allocation10_spill] sm:$0xff] %v3608_v8  ;;  %972 = vrot.lane.b32.xlu1 %v961_v10, %s3043_s19  ;;  %v993_v10 = vmul.f32 %v3370_v16, %v3296_v42  ;;  %v1052_v8 = vmul.f32 %v3415_v63, %v3212_v15 }
 0x12d   :  { %1002 = vrot.lane.b32.xlu0 %v992_v11, %s3043_s19 }
 0x12e   :  { %v3614_v9 = vpop.permute.xlu1 %535 }
 0x12f   :  { %5701 = vst [vmem:[#allocation11_spill] sm:$0xff] %v3614_v9  ;;  %v3618_v12 = vpop.permute.xlu0 %564  ;;  %v1023_v9 = vmul.f32 %v3377_v34, %v3198_v57 }
 0x130   :  { %5702 = vst [vmem:[#allocation12_spill] sm:$0xff] %v3618_v12  ;;  %1000 = vrot.lane.b32.xlu1 %v991_v21, %s3043_s19  ;;  %v1022_v21 = vmul.f32 %v3377_v34, %v3204_v61 }
 0x131   :  { %1029 = vrot.lane.b32.xlu0 %v1021_v14, %s3043_s19 }
 0x132   :  { %v3624_v24 = vpop.permute.xlu1 %562 }
 0x133   :  { %v3628_v11 = vpop.permute.xlu0 %591 }
 0x134   :  { %5703 = vst [vmem:[#allocation13_spill] sm:$0xff] %v3628_v11  ;;  %1004 = vrot.lane.b32.xlu1 %v993_v10, %s3043_s19  ;;  %v1024_v10 = vmul.f32 %v3377_v34, %v3306_v40  ;;  %v1083_v11 = vmul.f32 %v3387_v5, %v3141_v27 }
 0x135   :  { %1033 = vrot.lane.b32.xlu0 %v1023_v9, %s3043_s19 }
 0x136   :  { %v3634_v12 = vpop.permute.xlu1 %566 }
 0x137   :  { %5704 = vst [vmem:[#allocation14_spill] sm:$0xff] %v3634_v12  ;;  %v3638_v14 = vpop.permute.xlu0 %595  ;;  %v1054_v12 = vmul.f32 %v3415_v63, %v3221_v18 }
 0x138   :  { %5705 = vst [vmem:[#allocation15_spill] sm:$0xff] %v3638_v14  ;;  %1031 = vrot.lane.b32.xlu1 %v1022_v21, %s3043_s19  ;;  %v1053_v21 = vmul.f32 %v3415_v63, %v3226_v23 }
 0x139   :  { %1060 = vrot.lane.b32.xlu0 %v1052_v8, %s3043_s19 }
 0x13a   :  { %v3644_v16 = vpop.permute.xlu1 %593 }
 0x13b   :  { %v3648_v9 = vpop.permute.xlu0 %623 }
 0x13c   :  { %5706 = vst [vmem:[#allocation16_spill] sm:$0xff] %v3648_v9  ;;  %1035 = vrot.lane.b32.xlu1 %v1024_v10, %s3043_s19  ;;  %v1115_v9 = vmul.f32 %v3398_v49, %v3152_v33 }
 0x13d   :  { %1064 = vrot.lane.b32.xlu0 %v1054_v12, %s3043_s19  ;;  %v1055_v12 = vmul.f32 %v3415_v63, %v3320_v38 }
 0x13e   :  { %v3654_v14 = vpop.permute.xlu1 %597 }
 0x13f   :  { %5707 = vst [vmem:[#allocation17_spill] sm:$0xff] %v3654_v14  ;;  %v3658_v8 = vpop.permute.xlu0 %627  ;;  %v1085_v14 = vmul.f32 %v3387_v5, %v3138_v26 }
 0x140   :  { %5708 = vst [vmem:[#allocation18_spill] sm:$0xff] %v3658_v8  ;;  %1062 = vrot.lane.b32.xlu1 %v1053_v21, %s3043_s19  ;;  %v1084_v21 = vmul.f32 %v3387_v5, %v3146_v29 }
 0x141   :  { %1091 = vrot.lane.b32.xlu0 %v1083_v11, %s3044_s20 }
 0x142   :  { %v3664_v34 = vpop.permute.xlu1 %625 }
 0x143   :  { %v3668_v10 = vpop.permute.xlu0 %654 }
 0x144   :  { %5709 = vst [vmem:[#allocation19_spill] sm:$0xff] %v3668_v10  ;;  %1066 = vrot.lane.b32.xlu1 %v1055_v12, %s3043_s19  ;;  %v1086_v12 = vmul.f32 %v3387_v5, %v3286_v2  ;;  %v1146_v10 = vmul.f32 %v3427_v32, %v3181_v48 }
 0x145   :  { %1095 = vrot.lane.b32.xlu0 %v1085_v14, %s3044_s20 }
 0x146   :  { %v3674_v8 = vpop.permute.xlu1 %629 }
 0x147   :  { %5710 = vst [vmem:[#allocation20_spill] sm:$0xff] %v3674_v8  ;;  %v3678_v11 = vpop.permute.xlu0 %658  ;;  %v1117_v8 = vmul.f32 %v3398_v49, %v3172_v45 }
 0x148   :  { %5711 = vst [vmem:[#allocation21_spill] sm:$0xff] %v3678_v11  ;;  %1093 = vrot.lane.b32.xlu1 %v1084_v21, %s3044_s20  ;;  %v1116_v21 = vmul.f32 %v3398_v49, %v3175_v46 }
 0x149   :  { %1123 = vrot.lane.b32.xlu0 %v1115_v9, %s3044_s20 }
 0x14a   :  { %v3684_v63 = vpop.permute.xlu1 %656 }
 0x14b   :  { %v3688_v14 = vpop.permute.xlu0 %685 }
 0x14c   :  { %5712 = vst [vmem:[#allocation22_spill] sm:$0xff] %v3688_v14  ;;  %1097 = vrot.lane.b32.xlu1 %v1086_v12, %s3044_s20  ;;  %v1118_v12 = vmul.f32 %v3398_v49, %v3296_v42  ;;  %v1177_v14 = vmul.f32 %v3440_v44, %v3212_v15 }
 0x14d   :  { %1127 = vrot.lane.b32.xlu0 %v1117_v8, %s3044_s20 }
 0x14e   :  { %v3694_v11 = vpop.permute.xlu1 %660 }
 0x14f   :  { %5713 = vst [vmem:[#allocation23_spill] sm:$0xff] %v3694_v11  ;;  %v3698_v9 = vpop.permute.xlu0 %689  ;;  %v1148_v11 = vmul.f32 %v3427_v32, %v3198_v57 }
 0x150   :  { %5714 = vst [vmem:[#allocation24_spill] sm:$0xff] %v3698_v9  ;;  %1125 = vrot.lane.b32.xlu1 %v1116_v21, %s3044_s20  ;;  %v1147_v21 = vmul.f32 %v3427_v32, %v3204_v61 }
 0x151   :  { %1154 = vrot.lane.b32.xlu0 %v1146_v10, %s3044_s20 }
 0x152   :  { %v3704_v5 = vpop.permute.xlu1 %687 }
 0x153   :  { %v3708_v8 = vpop.permute.xlu0 %716 }
 0x154   :  { %5715 = vst [vmem:[#allocation25_spill] sm:$0xff] %v3708_v8  ;;  %1129 = vrot.lane.b32.xlu1 %v1118_v12, %s3044_s20  ;;  %v1149_v12 = vmul.f32 %v3427_v32, %v3306_v40  ;;  %v1208_v8 = vmul.f32 %v3438_v59, %v3141_v27 }
 0x155   :  { %1158 = vrot.lane.b32.xlu0 %v1148_v11, %s3044_s20 }
 0x156   :  { %v3714_v9 = vpop.permute.xlu1 %691 }
 0x157   :  { %5716 = vst [vmem:[#allocation26_spill] sm:$0xff] %v3714_v9  ;;  %v3718_v10 = vpop.permute.xlu0 %720  ;;  %v1179_v9 = vmul.f32 %v3440_v44, %v3221_v18 }
 0x158   :  { %5717 = vst [vmem:[#allocation27_spill] sm:$0xff] %v3718_v10  ;;  %1156 = vrot.lane.b32.xlu1 %v1147_v21, %s3044_s20  ;;  %v1178_v21 = vmul.f32 %v3440_v44, %v3226_v23 }
 0x159   :  { %1185 = vrot.lane.b32.xlu0 %v1177_v14, %s3044_s20 }
 0x15a   :  { %v3724_v49 = vpop.permute.xlu1 %718 }
 0x15b   :  { %v3728_v11 = vpop.permute.xlu0 %748 }
 0x15c   :  { %1160 = vrot.lane.b32.xlu1 %v1149_v12, %s3044_s20 }
 0x15d   :  { %1189 = vrot.lane.b32.xlu0 %v1179_v9, %s3044_s20  ;;  %v1180_v9 = vmul.f32 %v3440_v44, %v3320_v38 }
 0x15e   :  { %v3734_v10 = vpop.permute.xlu1 %722 }
 0x15f   :  { %5718 = vst [vmem:[#allocation28_spill] sm:$0xff] %v3734_v10  ;;  %v3738_v14 = vpop.permute.xlu0 %752  ;;  %v1210_v10 = vmul.f32 %v3438_v59, %v3138_v26 }
 0x160   :  { %5719 = vst [vmem:[#allocation29_spill] sm:$0xff] %v3738_v14  ;;  %1187 = vrot.lane.b32.xlu1 %v1178_v21, %s3044_s20  ;;  %v1209_v21 = vmul.f32 %v3438_v59, %v3146_v29  ;;  %v1240_v14 = vmul.f32 %v3450_v56, %v3152_v33  ;;  %v1241_v33 = vmul.f32 %v3450_v56, %v3175_v46 }
 0x161   :  { %1216 = vrot.lane.b32.xlu0 %v1208_v8, %s3045_s21 }
 0x162   :  { %v3744_v32 = vpop.permute.xlu1 %750 }
 0x163   :  { %v3748_v12 = vpop.permute.xlu0 %779 }
 0x164   :  { %1191 = vrot.lane.b32.xlu1 %v1180_v9, %s3044_s20  ;;  %v1211_v9 = vmul.f32 %v3438_v59, %v3286_v2 }
 0x165   :  { %1220 = vrot.lane.b32.xlu0 %v1210_v10, %s3045_s21 }
 0x166   :  { %v3754_v27 = vpop.permute.xlu1 %754 }
 0x167   :  { %5720 = vst [vmem:[#allocation30_spill] sm:$0xff] %v3754_v27  ;;  %v3758_v8 = vpop.permute.xlu0 %783  ;;  %v1242_v27 = vmul.f32 %v3450_v56, %v3172_v45 }
 0x168   :  { %5721 = vst [vmem:[#allocation31_spill] sm:$0xff] %v3758_v8  ;;  %1218 = vrot.lane.b32.xlu1 %v1209_v21, %s3045_s21  ;;  %v1271_v21 = vmul.f32 %v3463_v60, %v3181_v48 }
 0x169   :  { %1248 = vrot.lane.b32.xlu0 %v1240_v14, %s3045_s21 }
 0x16a   :  { %v3764_v44 = vpop.permute.xlu1 %781 }
 0x16b   :  { %v3768_v10 = vpop.permute.xlu0 %810 }
 0x16c   :  { %5722 = vst [vmem:[#allocation32_spill] sm:$0xff] %v3768_v10  ;;  %1222 = vrot.lane.b32.xlu1 %v1211_v9, %s3045_s21  ;;  %v1243_v9 = vmul.f32 %v3450_v56, %v3296_v42  ;;  %v1302_v10 = vmul.f32 %v3465_v19, %v3212_v15 }
 0x16d   :  { %1252 = vrot.lane.b32.xlu0 %v1242_v27, %s3045_s21 }
 0x16e   :  { %v3774_v8 = vpop.permute.xlu1 %785 }
 0x16f   :  { %5723 = vst [vmem:[#allocation33_spill] sm:$0xff] %v3774_v8  ;;  %v3778_v14 = vpop.permute.xlu0 %814  ;;  %v1273_v8 = vmul.f32 %v3463_v60, %v3198_v57 }
 0x170   :  { %5724 = vst [vmem:[#allocation34_spill] sm:$0xff] %v3778_v14  ;;  %1250 = vrot.lane.b32.xlu1 %v1241_v33, %s3045_s21  ;;  %v1272_v33 = vmul.f32 %v3463_v60, %v3204_v61 }
 0x171   :  { %1279 = vrot.lane.b32.xlu0 %v1271_v21, %s3045_s21 }
 0x172   :  { %v3784_v59 = vpop.permute.xlu1 %812 }
 0x173   :  { %5725 = vst [vmem:[#allocation35_spill] sm:$0xff] %v3784_v59  ;;  %v3788_v27 = vpop.permute.xlu0 %841 }
 0x174   :  { %5726 = vst [vmem:[#allocation36_spill] sm:$0xff] %v3788_v27  ;;  %1254 = vrot.lane.b32.xlu1 %v1243_v9, %s3045_s21  ;;  %v1274_v9 = vmul.f32 %v3463_v60, %v3306_v40  ;;  %v1305_v60 = vmul.f32 %v3465_v19, %v3320_v38 }
 0x175   :  { %1283 = vrot.lane.b32.xlu0 %v1273_v8, %s3045_s21 }
 0x176   :  { %v3794_v14 = vpop.permute.xlu1 %816 }
 0x177   :  { %5727 = vst [vmem:[#allocation37_spill] sm:$0xff] %v3794_v14  ;;  %v3798_v21 = vpop.permute.xlu0 %845  ;;  %v1304_v14 = vmul.f32 %v3465_v19, %v3221_v18 }
 0x178   :  { %5728 = vst [vmem:[#allocation38_spill] sm:$0xff] %v3798_v21  ;;  %1281 = vrot.lane.b32.xlu1 %v1272_v33, %s3045_s21  ;;  %v1303_v33 = vmul.f32 %v3465_v19, %v3226_v23 }
 0x179   :  { %1310 = vrot.lane.b32.xlu0 %v1302_v10, %s3045_s21 }
 0x17a   :  { %v3804_v56 = vpop.permute.xlu1 %843 }
 0x17b   :  { %5729 = vst [vmem:[#allocation39_spill] sm:$0xff] %v3804_v56  ;;  %v3808_v8 = vpop.permute.xlu0 %873 }
 0x17c   :  { %5730 = vst [vmem:[#allocation40_spill] sm:$0xff] %v3808_v8  ;;  %1285 = vrot.lane.b32.xlu1 %v1274_v9, %s3045_s21 }
 0x17d   :  { %1314 = vrot.lane.b32.xlu0 %v1304_v14, %s3045_s21 }
 0x17e   :  { %v3814_v21 = vpop.permute.xlu1 %847 }
 0x17f   :  { %5731 = vst [vmem:[#allocation41_spill] sm:$0xff] %v3814_v21  ;;  %v3818_v10 = vpop.permute.xlu0 %877 }
 0x180   :  { %5732 = vst [vmem:[#allocation42_spill] sm:$0xff] %v3818_v10  ;;  %1312 = vrot.lane.b32.xlu1 %v1303_v33, %s3045_s21 }
 0x182   :  { %v3821_v27 = vpop.permute.xlu1 %875 }
 0x183   :  { %5733 = vst [vmem:[#allocation43_spill] sm:$0xff] %v3821_v27  ;;  %v3825_v8 = vpop.permute.xlu0 %904 }
 0x184   :  { %5734 = vst [vmem:[#allocation44_spill] sm:$0xff] %v3825_v8  ;;  %1316 = vrot.lane.b32.xlu1 %v1305_v60, %s3045_s21 }
 0x186   :  { %v3828_v9 = vpop.permute.xlu1 %879 }
 0x187   :  { %5735 = vst [vmem:[#allocation45_spill] sm:$0xff] %v3828_v9  ;;  %v3830_v14 = vpop.permute.xlu0 %908 }
 0x188   :  { %5736 = vst [vmem:[#allocation46_spill] sm:$0xff] %v3830_v14 }
 0x18a   :  { %v3832_v21 = vpop.permute.xlu1 %906 }
 0x18b   :  { %5737 = vst [vmem:[#allocation47_spill] sm:$0xff] %v3832_v21  ;;  %v3834_v56 = vpop.permute.xlu0 %935 }
 0x18c   :  { %5738 = vst [vmem:[#allocation48_spill] sm:$0xff] %v3834_v56 }
 0x18e   :  { %v3836_v10 = vpop.permute.xlu1 %910 }
 0x18f   :  { %5739 = vst [vmem:[#allocation49_spill] sm:$0xff] %v3836_v10  ;;  %v3838_v33 = vpop.permute.xlu0 %939 }
 0x190   :  { %5740 = vst [vmem:[#allocation50_spill] sm:$0xff] %v3838_v33 }
 0x192   :  { %v3840_v27 = vpop.permute.xlu1 %937 }
 0x193   :  { %5741 = vst [vmem:[#allocation51_spill] sm:$0xff] %v3840_v27  ;;  %v3842_v59 = vpop.permute.xlu0 %966 }
 0x194   :  { %5742 = vst [vmem:[#allocation52_spill] sm:$0xff] %v3842_v59  ;;  %v3000_v59 = vld [vmem:[#allocation2 + $0x20] sm:$0xff] }
 0x196   :  { %v3844_v19 = vpop.permute.xlu1 %941 }
 0x197   :  { %5743 = vst [vmem:[#allocation53_spill] sm:$0xff] %v3844_v19  ;;  %v3846_v8 = vpop.permute.xlu0 %970  ;;  %v289_v19 = vmul.f32 %v3000_v59, %v3419_v13  ;;  %v292_v59 = vmul.f32 %v3419_v13, %v3296_v42  ;;  %v322_v42 = vmul.f32 %v3454_v37, %v3226_v23  ;;  %v350_v23 = vsel %vm349_vm2, %v3476_v7, %v3484_v17 }
 0x198   :  { %5744 = vst [vmem:[#allocation54_spill] sm:$0xff] %v3846_v8  ;;  %v290_v8 = vmul.f32 %v3419_v13, %v3175_v46  ;;  %v291_v46 = vmul.f32 %v3419_v13, %v3172_v45  ;;  %v275_v45 = vmul.f32 %v3408_v28, %v3138_v26  ;;  %v307_v13 = vmul.f32 %v3430_v41, %v3198_v57 }
 0x199   :  { %v351_v26 = vsel %vm349_vm2, %v3484_v17, %v3474_v54  ;;  %v382_v7 = vsel %vm349_vm2, %v3504_v62, %v3498_v25 }
 0x19a   :  { %v3848_v60 = vpop.permute.xlu1 %968 }
 0x19b   :  { %5745 = vst [vmem:[#allocation55_spill] sm:$0xff] %v3848_v60  ;;  %v3850_v9 = vpop.permute.xlu0 %998 }
 0x19c   :  { %5746 = vst [vmem:[#allocation56_spill] sm:$0xff] %v3850_v9 }
 0x19e   :  { %v3852_v14 = vpop.permute.xlu1 %972 }
 0x19f   :  { %5747 = vst [vmem:[#allocation57_spill] sm:$0xff] %v3852_v14  ;;  %v3854_v21 = vpop.permute.xlu0 %1002  ;;  %v3001_v14 = vld [vmem:[#allocation2] sm:$0xff] }
 0x1a0   :  { %5748 = vst [vmem:[#allocation58_spill] sm:$0xff] %v3854_v21  ;;  %v273_v21 = vmul.f32 %v3001_v14, %v3408_v28 }
 0x1a2   :  { %v3856_v56 = vpop.permute.xlu1 %1000 }
 0x1a3   :  { %5749 = vst [vmem:[#allocation59_spill] sm:$0xff] %v3856_v56  ;;  %v3858_v10 = vpop.permute.xlu0 %1029 }
 0x1a4   :  { %5750 = vst [vmem:[#allocation60_spill] sm:$0xff] %v3858_v10  ;;  %v274_v10 = vmul.f32 %v3408_v28, %v3146_v29  ;;  %v276_v29 = vmul.f32 %v3408_v28, %v3286_v2 }
 0x1a6   :  { %v3860_v33 = vpop.permute.xlu1 %1004  ;;  %v296_v2 = vadd.f32 %v292_v59, %v276_v29 }
 0x1a7   :  { %5751 = vst [vmem:[#allocation61_spill] sm:$0xff] %v3860_v33  ;;  %v3862_v27 = vpop.permute.xlu0 %1033  ;;  %v305_v33 = vmul.f32 %v3430_v41, %v3181_v48  ;;  %v308_v48 = vmul.f32 %v3430_v41, %v3306_v40 }
 0x1a8   :  { %5752 = vst [vmem:[#allocation62_spill] sm:$0xff] %v3862_v27  ;;  %v306_v27 = vmul.f32 %v3430_v41, %v3204_v61  ;;  %v321_v61 = vmul.f32 %v3454_v37, %v3212_v15  ;;  %v324_v15 = vmul.f32 %v3454_v37, %v3320_v38  ;;  %v323_v41 = vmul.f32 %v3454_v37, %v3221_v18 }
 0x1a9   :  { %v312_v40 = vadd.f32 %v308_v48, %v296_v2  ;;  %v381_v38 = vsel %vm349_vm2, %v3488_v36, %v3504_v62  ;;  %v412_v18 = vsel %vm349_vm2, %v3508_v43, %v3524_v22  ;;  %v413_v37 = vsel %vm349_vm2, %v3524_v22, %v3518_v4 }
 0x1aa   :  { %v3867_v60 = vpop.permute.xlu1 %1031  ;;  %v443_v43 = vsel %vm349_vm2, %v3528_v1, %v3544_v51  ;;  %v444_v22 = vsel %vm349_vm2, %v3544_v51, %v3538_v55  ;;  %v476_v1 = vsel %vm474_vm3, %v3564_v31, %v3558_v47 }
 0x1ab   :  { %5753 = vst [vmem:[#allocation63_spill] sm:$0xff] %v3867_v60  ;;  %v3869_v9 = vpop.permute.xlu0 %1060  ;;  %v293_v60 = vadd.f32 %v289_v19, %v273_v21  ;;  %v328_v17 = vadd.f32 %v324_v15, %v312_v40 }
 0x1ac   :  { %5754 = vst [vmem:[#allocation64_spill] sm:$0xff] %v3869_v9  ;;  %v294_v9 = vadd.f32 %v290_v8, %v274_v10  ;;  %v295_v10 = vadd.f32 %v291_v46, %v275_v45  ;;  %v352_v46 = vsel %vm349_vm2, %v3474_v54, %v3494_v0  ;;  %v383_v54 = vsel %vm349_vm2, %v3498_v25, %v3514_v52 }
 0x1ad   :  { %v309_v21 = vadd.f32 %v305_v33, %v293_v60  ;;  %v475_v25 = vsel %vm474_vm3, %v3548_v53, %v3564_v31  ;;  %v507_v53 = vsel %vm474_vm3, %v3584_v58, %v3578_v30 }
 0x1ae   :  { %v3882_v56 = vpop.permute.xlu1 %1035  ;;  %v310_v8 = vadd.f32 %v306_v27, %v294_v9  ;;  %v311_v57 = vadd.f32 %v307_v13, %v295_v10 }
 0x1af   :  { %v3892_v14 = vpop.permute.xlu0 %1064  ;;  %v325_v27 = vadd.f32 %v321_v61, %v309_v21  ;;  %v360_v61 = vadd.f32 %v3494_v0, %v328_v17  ;;  %v414_v0 = vsel %vm349_vm2, %v3518_v4, %v3534_v50  ;;  %v506_v4 = vsel %vm474_vm3, %v3568_v39, %v3584_v58  ;;  %v5755_v39 = vld [vmem:[#allocation9_spill] sm:$0xff]  ;;  %v5758_v17 = vld [vmem:[#allocation12_spill] sm:$0xff] }
 0x1b0   :  { %v326_v9 = vadd.f32 %v322_v42, %v310_v8  ;;  %v327_v62 = vadd.f32 %v323_v41, %v311_v57 }
 0x1b1   :  { %v357_v33 = vadd.f32 %v350_v23, %v325_v27  ;;  %v391_v8 = vadd.f32 %v3514_v52, %v360_v61  ;;  %v445_v52 = vsel %vm349_vm2, %v3538_v55, %v3554_v35  ;;  %v537_v55 = vsel %vm474_vm3, %v3588_v6, %v3604_v3 }
 0x1b2   :  { %v3898_v19 = vpop.permute.xlu1 %1062  ;;  %v358_v60 = vadd.f32 %v351_v26, %v326_v9  ;;  %v359_v42 = vadd.f32 %v352_v46, %v327_v62  ;;  %v538_v27 = vsel %vm474_vm3, %v3604_v3, %v5755_v39  ;;  %v569_v3 = vsel %vm474_vm3, %v3624_v24, %v5758_v17 }
 0x1b3   :  { %v3908_v28 = vpop.permute.xlu0 %1091  ;;  %v388_v29 = vadd.f32 %v381_v38, %v357_v33  ;;  %v422_v15 = vadd.f32 %v3534_v50, %v391_v8  ;;  %v477_v50 = vsel %vm474_vm3, %v3558_v47, %v3574_v20  ;;  %v5756_v33 = vld [vmem:[#allocation8_spill] sm:$0xff]  ;;  %v5762_v8 = vld [vmem:[#allocation14_spill] sm:$0xff] }
 0x1b4   :  { %v389_v48 = vadd.f32 %v382_v7, %v358_v60  ;;  %v390_v2 = vadd.f32 %v383_v54, %v359_v42  ;;  %v508_v47 = vsel %vm474_vm3, %v3578_v30, %v5756_v33  ;;  %v5757_v60 = vld [vmem:[#allocation10_spill] sm:$0xff]  ;;  %v5760_v30 = vld [vmem:[#allocation13_spill] sm:$0xff]  ;;  %v5761_v54 = vld [vmem:[#allocation15_spill] sm:$0xff] }
 0x1b5   :  { %v419_v45 = vadd.f32 %v412_v18, %v388_v29  ;;  %v453_v41 = vadd.f32 %v3554_v35, %v422_v15  ;;  %v568_v6 = vsel %vm474_vm3, %v5757_v60, %v3624_v24  ;;  %v600_v61 = vsel %vm599_vm4, %v5760_v30, %v3644_v16 }
 0x1b6   :  { %v3918_v59 = vpop.permute.xlu1 %1066  ;;  %v420_v13 = vadd.f32 %v413_v37, %v389_v48  ;;  %v421_v31 = vadd.f32 %v414_v0, %v390_v2  ;;  %v570_v0 = vsel %vm474_vm3, %v5758_v17, %v5762_v8  ;;  %v5764_v2 = vld [vmem:[#allocation18_spill] sm:$0xff] }
 0x1b7   :  { %v3929_v36 = vpop.permute.xlu0 %1095  ;;  %v450_v10 = vadd.f32 %v443_v43, %v419_v45  ;;  %v485_v35 = vadd.f32 %v3574_v20, %v453_v41  ;;  %v5759_v20 = vld [vmem:[#allocation11_spill] sm:$0xff]  ;;  %v601_v43 = vsel %vm599_vm4, %v3644_v16, %v5761_v54  ;;  %v5767_v41 = vld [vmem:[#allocation21_spill] sm:$0xff] }
 0x1b8   :  { %v451_v40 = vadd.f32 %v444_v22, %v420_v13  ;;  %v452_v9 = vadd.f32 %v445_v52, %v421_v31  ;;  %v539_v48 = vsel %vm474_vm3, %v5755_v39, %v5759_v20 }
 0x1b9   :  { %v482_v23 = vadd.f32 %v475_v25, %v450_v10  ;;  %v516_v29 = vadd.f32 %v5756_v33, %v485_v35  ;;  %v5763_v25 = vld [vmem:[#allocation16_spill] sm:$0xff]  ;;  %v632_v10 = vsel %vm599_vm4, %v3664_v34, %v5764_v2  ;;  %v5769_v35 = vld [vmem:[#allocation22_spill] sm:$0xff] }
 0x1ba   :  { %v3941_v21 = vpop.permute.xlu1 %1093  ;;  %v483_v26 = vadd.f32 %v476_v1, %v451_v40  ;;  %v484_v46 = vadd.f32 %v477_v50, %v452_v9  ;;  %v631_v1 = vsel %vm599_vm4, %v5763_v25, %v3664_v34  ;;  %v663_v50 = vsel %vm599_vm4, %v3684_v63, %v5767_v41 }
 0x1bb   :  { %v3953_v51 = vpop.permute.xlu0 %1123  ;;  %v513_v38 = vadd.f32 %v506_v4, %v482_v23  ;;  %v547_v13 = vadd.f32 %v5759_v20, %v516_v29  ;;  %v5766_v23 = vld [vmem:[#allocation19_spill] sm:$0xff]  ;;  %v693_v33 = vsel %vm599_vm4, %v5769_v35, %v3704_v5  ;;  %v5772_v29 = vld [vmem:[#allocation25_spill] sm:$0xff] }
 0x1bc   :  { %v514_v7 = vadd.f32 %v507_v53, %v483_v26  ;;  %v515_v22 = vadd.f32 %v508_v47, %v484_v46  ;;  %v5765_v53 = vld [vmem:[#allocation17_spill] sm:$0xff]  ;;  %v662_v26 = vsel %vm599_vm4, %v5766_v23, %v3684_v63  ;;  %v5770_v47 = vld [vmem:[#allocation24_spill] sm:$0xff]  ;;  %v725_v20 = vsel %vm724_vm5, %v5772_v29, %v3724_v49 }
 0x1bd   :  { %v544_v18 = vadd.f32 %v537_v55, %v513_v38  ;;  %v578_v4 = vadd.f32 %v5762_v8, %v547_v13  ;;  %v602_v31 = vsel %vm599_vm4, %v5761_v54, %v5765_v53  ;;  %v5768_v38 = vld [vmem:[#allocation20_spill] sm:$0xff]  ;;  %v694_v63 = vsel %vm599_vm4, %v3704_v5, %v5770_v47  ;;  %v5775_v8 = vld [vmem:[#allocation29_spill] sm:$0xff] }
 0x1be   :  { %v3965_v57 = vpop.permute.xlu1 %1097  ;;  %v545_v37 = vadd.f32 %v538_v27, %v514_v7  ;;  %v546_v16 = vadd.f32 %v539_v48, %v515_v22  ;;  %v633_v7 = vsel %vm599_vm4, %v5764_v2, %v5768_v38  ;;  %v5773_v48 = vld [vmem:[#allocation27_spill] sm:$0xff]  ;;  %v756_v13 = vsel %vm724_vm5, %v3728_v11, %v3744_v32 }
 0x1bf   :  { %v3977_v58 = vpop.permute.xlu0 %1127  ;;  %v575_v42 = vadd.f32 %v568_v6, %v544_v18  ;;  %v610_v9 = vadd.f32 %v5765_v53, %v578_v4  ;;  %v5771_v18 = vld [vmem:[#allocation23_spill] sm:$0xff]  ;;  %v726_v30 = vsel %vm724_vm5, %v3724_v49, %v5773_v48 }
 0x1c0   :  { %v576_v45 = vadd.f32 %v569_v3, %v545_v37  ;;  %v577_v55 = vadd.f32 %v570_v0, %v546_v16  ;;  %v664_v37 = vsel %vm599_vm4, %v5767_v41, %v5771_v18  ;;  %v757_v0 = vsel %vm724_vm5, %v3744_v32, %v5775_v8  ;;  %v5776_v16 = vld [vmem:[#allocation28_spill] sm:$0xff]  ;;  %v5777_v11 = vld [vmem:[#allocation31_spill] sm:$0xff]  ;;  %v5778_v41 = vld [vmem:[#allocation30_spill] sm:$0xff] }
 0x1c1   :  { %v607_v40 = vadd.f32 %v600_v61, %v575_v42  ;;  %v641_v46 = vadd.f32 %v5768_v38, %v610_v9  ;;  %v5774_v42 = vld [vmem:[#allocation26_spill] sm:$0xff]  ;;  %v788_v4 = vsel %vm724_vm5, %v3764_v44, %v5777_v11 }
 0x1c2   :  { %v3989_v62 = vpop.permute.xlu1 %1125  ;;  %v608_v15 = vadd.f32 %v601_v43, %v576_v45  ;;  %v609_v60 = vadd.f32 %v602_v31, %v577_v55  ;;  %v695_v45 = vsel %vm599_vm4, %v5770_v47, %v5774_v42  ;;  %v5779_v55 = vld [vmem:[#allocation35_spill] sm:$0xff]  ;;  %v5782_v47 = vld [vmem:[#allocation33_spill] sm:$0xff] }
 0x1c3   :  { %v4001_v24 = vpop.permute.xlu0 %1154  ;;  %v638_v39 = vadd.f32 %v631_v1, %v607_v40  ;;  %v672_v22 = vadd.f32 %v5771_v18, %v641_v46  ;;  %v727_v40 = vsel %vm724_vm5, %v5773_v48, %v5776_v16  ;;  %v5785_v46 = vld [vmem:[#allocation38_spill] sm:$0xff] }
 0x1c4   :  { %v639_v27 = vadd.f32 %v632_v10, %v608_v15  ;;  %v640_v61 = vadd.f32 %v633_v7, %v609_v60  ;;  %v787_v15 = vsel %vm724_vm5, %v3748_v12, %v3764_v44  ;;  %v5783_v60 = vld [vmem:[#allocation39_spill] sm:$0xff] }
 0x1c5   :  { %v669_v6 = vadd.f32 %v662_v26, %v638_v39  ;;  %v703_v10 = vadd.f32 %v5774_v42, %v672_v22  ;;  %v5780_v39 = vld [vmem:[#allocation32_spill] sm:$0xff]  ;;  %v851_v18 = vsel %vm849_vm6, %v5783_v60, %v5785_v46 }
 0x1c6   :  { %v4013_v52 = vpop.permute.xlu1 %1129  ;;  %v670_v17 = vadd.f32 %v663_v50, %v639_v27  ;;  %v671_v49 = vadd.f32 %v664_v37, %v640_v61  ;;  %v758_v50 = vsel %vm724_vm5, %v5775_v8, %v5778_v41  ;;  %v818_v12 = vsel %vm724_vm5, %v5780_v39, %v5779_v55  ;;  %v5781_v27 = vld [vmem:[#allocation34_spill] sm:$0xff]  ;;  %v5786_v61 = vld [vmem:[#allocation37_spill] sm:$0xff]  ;;  %v5788_v22 = vld [vmem:[#allocation40_spill] sm:$0xff] }
 0x1c7   :  { %v4025_v34 = vpop.permute.xlu0 %1158  ;;  %v700_v54 = vadd.f32 %v693_v33, %v669_v6  ;;  %v735_v26 = vadd.f32 %v5776_v16, %v703_v10  ;;  %v819_v44 = vsel %vm724_vm5, %v5779_v55, %v5781_v27  ;;  %v5784_v6 = vld [vmem:[#allocation36_spill] sm:$0xff]  ;;  %v5790_v10 = vld [vmem:[#allocation41_spill] sm:$0xff] }
 0x1c8   :  { %v701_v43 = vadd.f32 %v694_v63, %v670_v17  ;;  %v702_v53 = vadd.f32 %v695_v45, %v671_v49  ;;  %v789_v63 = vsel %vm724_vm5, %v5777_v11, %v5782_v47  ;;  %v850_v17 = vsel %vm849_vm6, %v5784_v6, %v5783_v60  ;;  %v5789_v45 = vld [vmem:[#allocation42_spill] sm:$0xff]  ;;  %v5794_v55 = vld [vmem:[#allocation45_spill] sm:$0xff] }
 0x1c9   :  { %v732_v25 = vadd.f32 %v725_v20, %v700_v54  ;;  %v766_v33 = vadd.f32 %v5778_v41, %v735_v26  ;;  %v820_v54 = vsel %vm724_vm5, %v5781_v27, %v5786_v61  ;;  %v852_v16 = vsel %vm849_vm6, %v5785_v46, %v5790_v10  ;;  %v5796_v27 = vld [vmem:[#allocation48_spill] sm:$0xff]  ;;  %v5798_v6 = vld [vmem:[#allocation49_spill] sm:$0xff]  ;;  %v5799_v46 = vld [vmem:[#allocation55_spill] sm:$0xff] }
 0x1ca   :  { %v4037_v3 = vpop.permute.xlu1 %1156  ;;  %v733_v1 = vadd.f32 %v726_v30, %v701_v43  ;;  %v734_v9 = vadd.f32 %v727_v40, %v702_v53  ;;  %v5787_v43 = vld [vmem:[#allocation43_spill] sm:$0xff]  ;;  %v883_v39 = vsel %vm849_vm6, %v5789_v45, %v5794_v55 }
 0x1cb   :  { %v4049_v5 = vpop.permute.xlu0 %1185  ;;  %v763_v31 = vadd.f32 %v756_v13, %v732_v25  ;;  %v797_v30 = vadd.f32 %v5782_v47, %v766_v33  ;;  %v881_v42 = vsel %vm849_vm6, %v5788_v22, %v5787_v43  ;;  %v882_v13 = vsel %vm849_vm6, %v5787_v43, %v5789_v45  ;;  %v5791_v40 = vld [vmem:[#allocation47_spill] sm:$0xff] }
 0x1cc   :  { %v764_v23 = vadd.f32 %v757_v0, %v733_v1  ;;  %v765_v29 = vadd.f32 %v758_v50, %v734_v9  ;;  %v5797_v9 = vld [vmem:[#allocation50_spill] sm:$0xff] }
 0x1cd   :  { %v794_v38 = vadd.f32 %v787_v15, %v763_v31  ;;  %v828_v1 = vadd.f32 %v5786_v61, %v797_v30  ;;  %v5792_v15 = vld [vmem:[#allocation44_spill] sm:$0xff] }
 0x1ce   :  { %v4061_v2 = vpop.permute.xlu1 %1160  ;;  %v795_v7 = vadd.f32 %v788_v4, %v764_v23  ;;  %v796_v8 = vadd.f32 %v789_v63, %v765_v29  ;;  %v912_v11 = vsel %vm849_vm6, %v5792_v15, %v5791_v40  ;;  %v5793_v4 = vld [vmem:[#allocation46_spill] sm:$0xff] }
 0x1cf   :  { %v4073_v32 = vpop.permute.xlu0 %1189  ;;  %v825_v20 = vadd.f32 %v818_v12, %v794_v38  ;;  %v913_v53 = vsel %vm849_vm6, %v5791_v40, %v5793_v4  ;;  %v860_v50 = vadd.f32 %v5790_v10, %v828_v1  ;;  %v5795_v12 = vld [vmem:[#allocation51_spill] sm:$0xff] }
 0x1d0   :  { %v826_v48 = vadd.f32 %v819_v44, %v795_v7  ;;  %v827_v23 = vadd.f32 %v820_v54, %v796_v8  ;;  %v943_v44 = vsel %vm849_vm6, %v5796_v27, %v5795_v12  ;;  %v944_v38 = vsel %vm849_vm6, %v5795_v12, %v5797_v9  ;;  %v5804_v8 = vld [vmem:[#allocation56_spill] sm:$0xff] }
 0x1d1   :  { %v857_v0 = vadd.f32 %v850_v17, %v825_v20  ;;  %v891_v60 = vadd.f32 %v5794_v55, %v860_v50  ;;  %v914_v17 = vsel %vm849_vm6, %v5793_v4, %v5798_v6  ;;  %v5801_v20 = vld [vmem:[#allocation54_spill] sm:$0xff]  ;;  %v5806_v4 = vld [vmem:[#allocation57_spill] sm:$0xff] }
 0x1d2   :  { %v4085_v35 = vpop.permute.xlu1 %1187  ;;  %v858_v49 = vadd.f32 %v851_v18, %v826_v48  ;;  %v859_v7 = vadd.f32 %v852_v16, %v827_v23  ;;  %v5800_v18 = vld [vmem:[#allocation52_spill] sm:$0xff]  ;;  %v976_v48 = vsel %vm974_vm7, %v5799_v46, %v5801_v20  ;;  %v5807_v23 = vld [vmem:[#allocation63_spill] sm:$0xff]  ;;  %v5809_v50 = vld [vmem:[#allocation62_spill] sm:$0xff] }
 0x1d3   :  { %v4097_v37 = vpop.permute.xlu0 %1216  ;;  %v888_v26 = vadd.f32 %v881_v42, %v857_v0  ;;  %v975_v29 = vsel %vm974_vm7, %v5800_v18, %v5799_v46  ;;  %v922_v22 = vadd.f32 %v5798_v6, %v891_v60  ;;  %v5802_v42 = vld [vmem:[#allocation53_spill] sm:$0xff]  ;;  %v1038_v55 = vsel %vm974_vm7, %v5807_v23, %v5809_v50 }
 0x1d4   :  { %v889_v41 = vadd.f32 %v882_v13, %v858_v49  ;;  %v890_v61 = vadd.f32 %v883_v39, %v859_v7  ;;  %v945_v45 = vsel %vm849_vm6, %v5797_v9, %v5802_v42  ;;  %v5803_v13 = vld [vmem:[#allocation59_spill] sm:$0xff]  ;;  %v5805_v49 = vld [vmem:[#allocation58_spill] sm:$0xff]  ;;  %v1069_v60 = vsel %vm974_vm7, %v3898_v19, %v3892_v14 }
 0x1d5   :  { %v919_v33 = vadd.f32 %v912_v11, %v888_v26  ;;  %v1006_v0 = vsel %vm974_vm7, %v5804_v8, %v5803_v13  ;;  %v1007_v1 = vsel %vm974_vm7, %v5803_v13, %v5805_v49  ;;  %v953_v11 = vadd.f32 %v5802_v42, %v922_v22  ;;  %v5808_v26 = vld [vmem:[#allocation60_spill] sm:$0xff] }
 0x1d6   :  { %v4109_v25 = vpop.permute.xlu1 %1191  ;;  %v920_v47 = vadd.f32 %v913_v53, %v889_v41  ;;  %v921_v10 = vadd.f32 %v914_v17, %v890_v61  ;;  %v977_v53 = vsel %vm974_vm7, %v5801_v20, %v5806_v4  ;;  %v1037_v41 = vsel %vm974_vm7, %v5808_v26, %v5807_v23 }
 0x1d7   :  { %v4121_v31 = vpop.permute.xlu0 %1220  ;;  %v950_v54 = vadd.f32 %v943_v44, %v919_v33  ;;  %v985_v9 = vadd.f32 %v5806_v4, %v953_v11  ;;  %v5811_v33 = vld [vmem:[#allocation64_spill] sm:$0xff]  ;;  %v1039_v20 = vsel %vm974_vm7, %v5809_v50, %v3882_v56  ;;  %v1101_v61 = vsel %vm1099_vm8, %v3941_v21, %v3929_v36 }
 0x1d8   :  { %v951_v43 = vadd.f32 %v944_v38, %v920_v47  ;;  %v952_v12 = vadd.f32 %v945_v45, %v921_v10  ;;  %v5810_v38 = vld [vmem:[#allocation61_spill] sm:$0xff]  ;;  %v1068_v47 = vsel %vm974_vm7, %v5811_v33, %v3898_v19  ;;  %v1070_v45 = vsel %vm974_vm7, %v3892_v14, %v3918_v59 }
 0x1d9   :  { %v982_v16 = vadd.f32 %v975_v29, %v950_v54  ;;  %v1008_v7 = vsel %vm974_vm7, %v5805_v49, %v5810_v38  ;;  %v1016_v29 = vadd.f32 %v5810_v38, %v985_v9  ;;  %v1131_v13 = vsel %vm1099_vm8, %v3953_v51, %v3989_v62 }
 0x1da   :  { %v4133_v63 = vpop.permute.xlu1 %1218  ;;  %v983_v40 = vadd.f32 %v976_v48, %v951_v43  ;;  %v984_v6 = vadd.f32 %v977_v53, %v952_v12  ;;  %v1100_v48 = vsel %vm1099_vm8, %v3908_v28, %v3941_v21  ;;  %v1132_v28 = vsel %vm1099_vm8, %v3989_v62, %v3977_v58 }
 0x1db   :  { %v4145_v30 = vpop.permute.xlu0 %1248  ;;  %v1013_v27 = vadd.f32 %v1006_v0, %v982_v16  ;;  %v1047_v42 = vadd.f32 %v3882_v56, %v1016_v29  ;;  %v1102_v56 = vsel %vm1099_vm8, %v3929_v36, %v3965_v57  ;;  %v1162_v14 = vsel %vm1099_vm8, %v4001_v24, %v4037_v3 }
 0x1dc   :  { %v1014_v44 = vadd.f32 %v1007_v1, %v983_v40  ;;  %v1015_v19 = vadd.f32 %v1008_v7, %v984_v6  ;;  %v1163_v51 = vsel %vm1099_vm8, %v4037_v3, %v4025_v34  ;;  %v1193_v36 = vsel %vm1099_vm8, %v4049_v5, %v4085_v35 }
 0x1dd   :  { %v1044_v17 = vadd.f32 %v1037_v41, %v1013_v27  ;;  %v1078_v1 = vadd.f32 %v3918_v59, %v1047_v42  ;;  %v1133_v59 = vsel %vm1099_vm8, %v3977_v58, %v4013_v52  ;;  %v1194_v24 = vsel %vm1099_vm8, %v4085_v35, %v4073_v32 }
 0x1de   :  { %v4157_v15 = vpop.permute.xlu1 %1222  ;;  %v1045_v46 = vadd.f32 %v1038_v55, %v1014_v44  ;;  %v1046_v8 = vadd.f32 %v1039_v20, %v1015_v19  ;;  %v1225_v58 = vsel %vm1224_vm9, %v4097_v37, %v4133_v63  ;;  %v1226_v5 = vsel %vm1224_vm9, %v4133_v63, %v4121_v31 }
 0x1df   :  { %v4169_v39 = vpop.permute.xlu0 %1252  ;;  %v1075_v43 = vadd.f32 %v1068_v47, %v1044_v17  ;;  %v1110_v11 = vadd.f32 %v3965_v57, %v1078_v1  ;;  %v1164_v57 = vsel %vm1099_vm8, %v4025_v34, %v4061_v2 }
 0x1e0   :  { %v1076_v22 = vadd.f32 %v1069_v60, %v1045_v46  ;;  %v1077_v62 = vadd.f32 %v1070_v45, %v1046_v8  ;;  %v5812_v8 = vld [vmem:[#allocation5_spill] sm:$0xff] }
 0x1e1   :  { %v1107_v21 = vadd.f32 %v1100_v48, %v1075_v43  ;;  %v1141_v26 = vadd.f32 %v4013_v52, %v1110_v11  ;;  %v1195_v52 = vsel %vm1099_vm8, %v4073_v32, %v4109_v25 }
 0x1e2   :  { %v1251_v18 = vpop.permute.xlu1 %1250  ;;  %v1108_v0 = vadd.f32 %v1101_v61, %v1076_v22  ;;  %v1109_v3 = vadd.f32 %v1102_v56, %v1077_v62 }
 0x1e3   :  { %v1280_v54 = vpop.permute.xlu0 %1279  ;;  %v1138_v16 = vadd.f32 %v1131_v13, %v1107_v21  ;;  %v1172_v12 = vadd.f32 %v4061_v2, %v1141_v26  ;;  %v1256_v34 = vsel %vm1224_vm9, %v4145_v30, %v1251_v18  ;;  %v1257_v37 = vsel %vm1224_vm9, %v1251_v18, %v4169_v39 }
 0x1e4   :  { %v1139_v40 = vadd.f32 %v1132_v28, %v1108_v0  ;;  %v1140_v41 = vadd.f32 %v1133_v59, %v1109_v3  ;;  %v1227_v2 = vsel %vm1224_vm9, %v4121_v31, %v4157_v15  ;;  %v23_v28 = vld [vmem:[%s5556_s1] sm:$0x7]  ;;  %v5813_v0 = vld [vmem:[#allocation6_spill] sm:$0xff]  ;;  %v5821_v59 = vmov 0 }
 0x1e5   :  { %v1169_v4 = vadd.f32 %v1162_v14, %v1138_v16  ;;  %v1203_v38 = vadd.f32 %v4109_v25, %v1172_v12  ;;  %v28_v21 = vrot.slane %v23_v28, %v5812_v8  ;;  %v5814_v14 = vld [vmem:[#allocation4_spill] sm:$0xff]  ;;  %v5818_v16 = vmov 0 }
 0x1e6   :  { %v1255_v49 = vpop.permute.xlu1 %1254  ;;  %v1170_v53 = vadd.f32 %v1163_v51, %v1139_v40  ;;  %v1171_v27 = vadd.f32 %v1164_v57, %v1140_v41  ;;  %v36_v51 = vrot.slane %v23_v28, %v5814_v14  ;;  %v4298_v57 = vld [vmem:[%s5557_s4] sm:$0xff]  ;;  %v5826_v41 = vmov 16  }
 0x1e7   :  { %v1284_v10 = vpop.permute.xlu0 %1283  ;;  %v1200_v35 = vadd.f32 %v1193_v36, %v1169_v4  ;;  %v1235_v60 = vadd.f32 %v4157_v15, %v1203_v38  ;;  %v1258_v6 = vsel %vm1224_vm9, %v4169_v39, %v1255_v49  ;;  %vm4274_vm11 = vcmp.gt.f32.partialorder %v28_v21, 0.0 }
 0x1e8   :  { %v1201_v50 = vadd.f32 %v1194_v24, %v1170_v53  ;;  %v1202_v33 = vadd.f32 %v1195_v52, %v1171_v27  ;;  %vm4283_vm13 = vcmp.gt.f32.partialorder %v36_v51, 0.0  ;;  %v5830_v12 = vmov 28  }
 0x1e9   :  { %v1232_v44 = vadd.f32 %v1225_v58, %v1200_v35  ;;  %v1266_v20 = vadd.f32 %v1255_v49, %v1235_v60  ;;  %v32_v49 = vrot.slane %v23_v28, %v5813_v0  ;;  %v5822_v59 = vsel %vm4283_vm13, 4294967295, %v5821_v59 }
 0x1ea   :  { %v1282_v23 = vpop.permute.xlu1 %1281  ;;  %v1233_v9 = vadd.f32 %v1226_v5, %v1201_v50  ;;  %v1234_v17 = vadd.f32 %v1227_v2, %v1202_v33  ;;  %5823 = vst [vmem:[#allocation10_spill] sm:$0xff] %v5822_v59  ;;  %v5824_v58 = vmov 10   ;;  %v5825_v5 = vmov 13  }
 0x1eb   :  { %v1311_v55 = vpop.permute.xlu0 %1310  ;;  %v1287_v7 = vsel %vm1224_vm9, %v1280_v54, %v1282_v23  ;;  %v1288_v32 = vsel %vm1224_vm9, %v1282_v23, %v1284_v10  ;;  %v1263_v47 = vadd.f32 %v1256_v34, %v1232_v44  ;;  %vm4279_vm12 = vcmp.gt.f32.partialorder %v32_v49, 0.0 }
 0x1ec   :  { %v1264_v30 = vadd.f32 %v1257_v37, %v1233_v9  ;;  %v1265_v54 = vadd.f32 %v1258_v6, %v1234_v17  ;;  %v5819_v16 = vsel %vm4279_vm12, 4294967295, %v5818_v16  ;;  %v5827_v35 = vmov 19  }
 0x1ed   :  { %v1294_v46 = vadd.f32 %v1287_v7, %v1263_v47  ;;  %5820 = vst [vmem:[#allocation8_spill] sm:$0xff] %v5819_v16  ;;  %v5828_v50 = vmov 22   ;;  %v5831_v52 = vmov 2   ;;  %v5832_v34 = vmov 33  }
 0x1ee   :  { %v1286_v63 = vpop.permute.xlu1 %1285  ;;  %v1295_v18 = vadd.f32 %v1288_v32, %v1264_v30  ;;  %v5833_v37 = vmov 0   ;;  %v5834_v7 = vmov 4   ;;  %v5835_v32 = vmov 5  }
 0x1ef   :  { %v1315_v25 = vpop.permute.xlu0 %1314  ;;  %v1289_v31 = vsel %vm1224_vm9, %v1284_v10, %v1286_v63  ;;  %v1297_v15 = vadd.f32 %v1286_v63, %v1266_v20  ;;  %v5815_v10 = vmov 0  ;;  %v5836_v33 = vmov 6  }
 0x1f0   :  { %v1296_v22 = vadd.f32 %v1289_v31, %v1265_v54  ;;  %v5816_v10 = vsel %vm4274_vm11, 4294967295, %v5815_v10  ;;  %v5841_v20 = vmov 14   ;;  %v5842_v31 = vmov 15  }
 0x1f1   :  { %5817 = vst [vmem:[#allocation9_spill] sm:$0xff] %v5816_v10  ;;  %v5845_v54 = vmov 20  }
 0x1f2   :  { %v1313_v29 = vpop.permute.xlu1 %1312 }
 0x1f3   :  { %v1318_v48 = vsel %vm1224_vm9, %v1311_v55, %v1313_v29  ;;  %v1319_v61 = vsel %vm1224_vm9, %v1313_v29, %v1315_v25  ;;  %v5829_v55 = vmov 25   ;;  %v5840_v29 = vmov 12  }
 0x1f4   :  { %v4251_v19 = vadd.f32 %v1318_v48, %v1294_v46  ;;  %v4253_v43 = vadd.f32 %v1319_v61, %v1295_v18  ;;  %v5837_v46 = vmov 8   ;;  %v5838_v18 = vmov 9  }
 0x1f5   :  { %v5843_v48 = vmov 17   ;;  %v5844_v61 = vmov 18  }
 0x1f6   :  { %1335 = vrot.lane.b32.xlu1 %v4253_v43, %s3046_s22  ;;  %v1317_v39 = vpop.permute.xlu1 %1316  ;;  %1333 = vrot.lane.b32.xlu0 %v4251_v19, %s3046_s22 }
 0x1f7   :  { %v1320_v42 = vsel %vm1224_vm9, %v1315_v25, %v1317_v39  ;;  %v4260_v45 = vadd.f32 %v1317_v39, %v1297_v15  ;;  %v5839_v25 = vmov 11   ;;  %v5846_v15 = vmov 21  }
 0x1f8   :  { %v4262_v13 = vadd.f32 %v1320_v42, %v1296_v22  ;;  %v5847_v22 = vmov 23   ;;  %v5848_v39 = vmov 24  }
 0x1fa   :  { %1339 = vrot.lane.b32.xlu1 %v4260_v45, %s3046_s22  ;;  %1337 = vrot.lane.b32.xlu0 %v4262_v13, %s3046_s22 }
 0x268   :  { %v1336_v1 = vpop.permute.xlu1 %1335  ;;  %v1334_v56 = vpop.permute.xlu0 %1333 }
 0x269   :  { %v1342_v62 = vsel %vm1341_vm10, %v1334_v56, %v1336_v1 }
 0x26a   :  { %v1348_v3 = vsel %vm4274_vm11, %v1342_v62, 0.0 }
 0x26c   :  { %v1340_v40 = vpop.permute.xlu1 %1339  ;;  %v1338_v11 = vpop.permute.xlu0 %1337 }
 0x26d   :  { %v1343_v36 = vsel %vm1341_vm10, %v1336_v1, %v1338_v11  ;;  %v1344_v24 = vsel %vm1341_vm10, %v1338_v11, %v1340_v40 }
 0x26e   :  { %v1349_v4 = vsel %vm4279_vm12, %v1343_v36, 0.0  ;;  %v1350_v23 = vsel %vm4283_vm13, %v1344_v24, 0.0 }
 0x26f   :  { %v1351_v53 = vadd.f32 %v1349_v4, %v1348_v3 }
 0x271   :  { %v1352_v26 = vadd.f32 %v1351_v53, %v1350_v23 }
 0x273   :  { %1353 = vadd.xlane.f32.xlu0 %v1352_v26 }
 0x289   :  { %1807 = vperm.xlu0 %2962, %v4298_v57  }
 0x28d   :  { %2965 = vset.pattern.permute.xlu0 %v5824_v58  ;;  %v5849_v58 = vmov 26  }
 0x28e   :  { %1900 = vperm.xlu0 %2965, %v4298_v57  }
 0x292   :  { %2968 = vset.pattern.permute.xlu0 %v5825_v5  ;;  %v5850_v5 = vmov 27  }
 0x293   :  { %1993 = vperm.xlu0 %2968, %v4298_v57  }
 0x297   :  { %2971 = vset.pattern.permute.xlu0 %v5826_v41  ;;  %v5851_v41 = vmov 29  }
 0x298   :  { %2086 = vperm.xlu0 %2971, %v4298_v57  }
 0x29c   :  { %2974 = vset.pattern.permute.xlu0 %v5827_v35  ;;  %v5852_v35 = vmov 30  }
 0x29d   :  { %2179 = vperm.xlu0 %2974, %v4298_v57  }
 0x2a1   :  { %2977 = vset.pattern.permute.xlu0 %v5828_v50  ;;  %v5853_v50 = vmov 1  }
 0x2a2   :  { %2272 = vperm.xlu0 %2977, %v4298_v57  }
 0x2a6   :  { %2980 = vset.pattern.permute.xlu0 %v5829_v55  ;;  %v5854_v55 = vmov 31  }
 0x2a7   :  { %2365 = vperm.xlu0 %2980, %v4298_v57  }
 0x2ab   :  { %2983 = vset.pattern.permute.xlu0 %v5830_v12  ;;  %v5855_v12 = vmov 32  }
 0x2ac   :  { %2458 = vperm.xlu0 %2983, %v4298_v57  }
 0x2b0   :  { %2988 = vset.pattern.permute.xlu0 %v5831_v52  ;;  %v5856_v52 = vmov 3  }
 0x2b1   :  { %1686 = vperm.xlu0 %2988, %v4298_v57  }
 0x2b5   :  { %2991 = vset.pattern.permute.xlu0 %v5832_v34  ;;  %v5857_v34 = vmov 34  }
 0x2b6   :  { %2613 = vperm.xlu0 %2991, %v4298_v57  }
 0x2ba   :  { %2992 = vset.pattern.permute.xlu0 %v5833_v37 }
 0x2bb   :  { %1654 = vperm.xlu0 %2992, %v4298_v57  }
 0x300   :  { %v1354_v27 = vpop.xlane.xlu0 %1353 }
 0x301   :  { %v1356_v44 = vrot.slane %v1354_v27, 4 }
 0x303   :  { %v1358_v9 = vadd.f32 %v1356_v44, %v1354_v27  ;;  %v5858_v27 = vmov 35  }
 0x305   :  { %v1360_v63 = vrot.slane %v1358_v9, 4 }
 0x307   :  { %v1362_v38 = vsel %vm88_vm0, %v1358_v9, %v1360_v63 }
 0x308   :  { %v4322_v2 = vmul.f32 0.001953125, %v1362_v38 }
 0x30a   :  { %1366 = vperm.xlu1 %2958, %v4322_v2  }
 0x30e   :  { %2959 = vset.pattern.permute.xlu1 %v5834_v7 }
 0x30f   :  { %1714 = vperm.xlu1 %2959, %v4298_v57  }
 0x313   :  { %2960 = vset.pattern.permute.xlu1 %v5835_v32 }
 0x314   :  { %1745 = vperm.xlu1 %2960, %v4298_v57  }
 0x318   :  { %2961 = vset.pattern.permute.xlu1 %v5836_v33 }
 0x389   :  { %v1367_v47 = vpop.permute.xlu1 %1366 }
 0x38a   :  { %v1369_v30 = vsub.f32 %v4251_v19, %v1367_v47  ;;  %v1370_v60 = vsub.f32 %v4253_v43, %v1367_v47  ;;  %v1371_v6 = vsub.f32 %v4262_v13, %v1367_v47  ;;  %v1372_v17 = vsub.f32 %v4260_v45, %v1367_v47 }
 0x38c   :  { %1377 = vrot.lane.b32.xlu1 %v1369_v30, %s3046_s22 }
 0x38e   :  { %v4362_v42 = vpop.permute.xlu1 %1714 }
 0x390   :  { %1379 = vrot.lane.b32.xlu1 %v1370_v60, %s3046_s22 }
 0x393   :  { %v4364_v28 = vpop.permute.xlu1 %1745 }
 0x394   :  { %1381 = vrot.lane.b32.xlu1 %v1371_v6, %s3046_s22 }
 0x398   :  { %1383 = vrot.lane.b32.xlu1 %v1372_v17, %s3046_s22 }
 0x39c   :  { %1776 = vperm.xlu1 %2961, %v4298_v57  }
 0x3a0   :  { %2963 = vset.pattern.permute.xlu1 %v5837_v46 }
 0x3a1   :  { %1838 = vperm.xlu1 %2963, %v4298_v57  }
 0x3a5   :  { %2964 = vset.pattern.permute.xlu1 %v5838_v18 }
 0x3a6   :  { %1869 = vperm.xlu1 %2964, %v4298_v57  }
 0x3aa   :  { %2966 = vset.pattern.permute.xlu1 %v5839_v25 }
 0x3ab   :  { %1931 = vperm.xlu1 %2966, %v4298_v57  }
 0x3af   :  { %2967 = vset.pattern.permute.xlu1 %v5840_v29 }
 0x3b0   :  { %1962 = vperm.xlu1 %2967, %v4298_v57  }
 0x3b4   :  { %2969 = vset.pattern.permute.xlu1 %v5841_v20 }
 0x3b5   :  { %2024 = vperm.xlu1 %2969, %v4298_v57  }
 0x3b9   :  { %2970 = vset.pattern.permute.xlu1 %v5842_v31  ;;  %v1410_v31 = vld [vmem:[%s5558_s3] sm:$0xff] }
 0x3ba   :  { %2055 = vperm.xlu1 %2970, %v4298_v57  }
 0x3be   :  { %2972 = vset.pattern.permute.xlu1 %v5843_v48 }
 0x3bf   :  { %2117 = vperm.xlu1 %2972, %v4298_v57  }
 0x3c3   :  { %2973 = vset.pattern.permute.xlu1 %v5844_v61 }
 0x3c4   :  { %2148 = vperm.xlu1 %2973, %v4298_v57  }
 0x3c8   :  { %2975 = vset.pattern.permute.xlu1 %v5845_v54  ;;  %v2874_v54 = vld [vmem:[%s5558_s3 + $0x8] sm:$0xff]  ;;  %s3047_s3 = smov 32  }
 0x3c9   :  { %2210 = vperm.xlu1 %2975, %v4298_v57  }
 0x3cd   :  { %2976 = vset.pattern.permute.xlu1 %v5846_v15 }
 0x3ce   :  { %2241 = vperm.xlu1 %2976, %v4298_v57  }
 0x3d2   :  { %2978 = vset.pattern.permute.xlu1 %v5847_v22 }
 0x3d3   :  { %2303 = vperm.xlu1 %2978, %v4298_v57  }
 0x3d7   :  { %2979 = vset.pattern.permute.xlu1 %v5848_v39  ;;  %v4429_v39 = vpop.permute.xlu0 %1807 }
 0x3d8   :  { %5861 = vst [vmem:[#allocation13_spill] sm:$0xff] %v4429_v39 }
 0x3fe   :  { %v1378_v21 = vpop.permute.xlu1 %1377 }
 0x402   :  { %v1380_v49 = vpop.permute.xlu1 %1379 }
 0x403   :  { %v1385_v1 = vsel %vm1341_vm10, %v1378_v21, %v1380_v49 }
 0x404   :  { %v1391_v62 = vsel %vm4274_vm11, %v1385_v1, 0.0 }
 0x405   :  { %v1394_v24 = vmul.f32 %v1391_v62, %v1391_v62 }
 0x406   :  { %v1382_v56 = vpop.permute.xlu1 %1381 }
 0x407   :  { %v1386_v51 = vsel %vm1341_vm10, %v1380_v49, %v1382_v56  ;;  %v4433_v49 = vpop.permute.xlu0 %1900 }
 0x408   :  { %v1392_v40 = vsel %vm4279_vm12, %v1386_v51, 0.0 }
 0x409   :  { %v1395_v11 = vmul.f32 %v1392_v40, %v1392_v40 }
 0x40a   :  { %v1384_v36 = vpop.permute.xlu1 %1383 }
 0x40b   :  { %v1387_v3 = vsel %vm1341_vm10, %v1382_v56, %v1384_v36  ;;  %v1397_v23 = vadd.f32 %v1395_v11, %v1394_v24  ;;  %v4437_v56 = vpop.permute.xlu0 %1993 }
 0x40c   :  { %v1393_v4 = vsel %vm4283_vm13, %v1387_v3, 0.0 }
 0x40d   :  { %v1396_v53 = vmul.f32 %v1393_v4, %v1393_v4 }
 0x40f   :  { %v1398_v26 = vadd.f32 %v1397_v23, %v1396_v53  ;;  %v4441_v62 = vpop.permute.xlu0 %2086 }
 0x411   :  { %1399 = vadd.xlane.f32.xlu1 %v1398_v26 }
 0x413   :  { %v4445_v11 = vpop.permute.xlu0 %2179 }
 0x417   :  { %v4449_v36 = vpop.permute.xlu0 %2272 }
 0x41b   :  { %v4396_v44 = vpop.permute.xlu1 %1776  ;;  %v4453_v3 = vpop.permute.xlu0 %2365 }
 0x41c   :  { %5859 = vst [vmem:[#allocation12_spill] sm:$0xff] %v4396_v44 }
 0x41f   :  { %v4457_v53 = vpop.permute.xlu0 %2458 }
 0x420   :  { %v4399_v9 = vpop.permute.xlu1 %1838 }
 0x421   :  { %5860 = vst [vmem:[#allocation11_spill] sm:$0xff] %v4399_v9 }
 0x422   :  { %2334 = vperm.xlu1 %2979, %v4298_v57  }
 0x423   :  { %v4461_v26 = vpop.permute.xlu0 %1686 }
 0x425   :  { %v4401_v63 = vpop.permute.xlu1 %1869 }
 0x426   :  { %2981 = vset.pattern.permute.xlu1 %v5849_v58 }
 0x427   :  { %2396 = vperm.xlu1 %2981, %v4298_v57  }
 0x42a   :  { %v4403_v38 = vpop.permute.xlu1 %1931 }
 0x42b   :  { %2982 = vset.pattern.permute.xlu1 %v5850_v5  ;;  %v4465_v5 = vpop.permute.xlu0 %2613 }
 0x42c   :  { %2427 = vperm.xlu1 %2982, %v4298_v57  }
 0x42f   :  { %v4405_v7 = vpop.permute.xlu1 %1962 }
 0x430   :  { %2984 = vset.pattern.permute.xlu1 %v5851_v41 }
 0x431   :  { %2489 = vperm.xlu1 %2984, %v4298_v57  }
 0x434   :  { %v4407_v32 = vpop.permute.xlu1 %2024 }
 0x435   :  { %2985 = vset.pattern.permute.xlu1 %v5852_v35  ;;  %v4469_v35 = vpop.permute.xlu0 %1654 }
 0x436   :  { %2520 = vperm.xlu1 %2985, %v4298_v57  }
 0x439   :  { %v4409_v33 = vpop.permute.xlu1 %2055 }
 0x43a   :  { %2986 = vset.pattern.permute.xlu1 %v5853_v50 }
 0x43b   :  { %1670 = vperm.xlu1 %2986, %v4298_v57  }
 0x43e   :  { %v4411_v47 = vpop.permute.xlu1 %2117 }
 0x43f   :  { %2987 = vset.pattern.permute.xlu1 %v5854_v55 }
 0x440   :  { %2551 = vperm.xlu1 %2987, %v4298_v57  }
 0x443   :  { %v4413_v30 = vpop.permute.xlu1 %2148 }
 0x444   :  { %2989 = vset.pattern.permute.xlu1 %v5855_v12 }
 0x445   :  { %2582 = vperm.xlu1 %2989, %v4298_v57  }
 0x449   :  { %2990 = vset.pattern.permute.xlu1 %v5856_v52 }
 0x44a   :  { %1702 = vperm.xlu1 %2990, %v4298_v57  }
 0x44e   :  { %2993 = vset.pattern.permute.xlu1 %v5857_v34 }
 0x44f   :  { %2644 = vperm.xlu1 %2993, %v4298_v57  }
 0x453   :  { %2994 = vset.pattern.permute.xlu1 %v5858_v27 }
 0x454   :  { %2675 = vperm.xlu1 %2994, %v4298_v57   ;;  %v4415_v57 = vpop.permute.xlu1 %2210 }
 0x458   :  { %2995 = vset.pattern.permute.xlu1 %v5833_v37  ;;  %v4417_v60 = vpop.permute.xlu1 %2241 }
 0x45c   :  { %v4419_v37 = vpop.permute.xlu1 %2303 }
 0x49e   :  { %v1400_v6 = vpop.xlane.xlu1 %1399 }
 0x49f   :  { %v1402_v17 = vrot.slane %v1400_v6, 4 }
 0x4a1   :  { %v1404_v46 = vadd.f32 %v1402_v17, %v1400_v6 }
 0x4a2   :  { %v4431_v21 = vpop.permute.xlu1 %2334 }
 0x4a3   :  { %v1406_v18 = vrot.slane %v1404_v46, 4 }
 0x4a5   :  { %v1408_v25 = vsel %vm88_vm0, %v1404_v46, %v1406_v18 }
 0x4a6   :  { %v1409_v29 = vmul.f32 0.001953125, %v1408_v25  ;;  %v4435_v1 = vpop.permute.xlu1 %2396 }
 0x4a8   :  { %v1411_v20 = vadd.f32 1e-05, %v1409_v29 }
 0x4aa   :  { %2996 = vrsqrt.f32 %v1411_v20 }
 0x4ab   :  { %v4439_v51 = vpop.permute.xlu1 %2427 }
 0x4b0   :  { %v4443_v40 = vpop.permute.xlu1 %2489 }
 0x4b4   :  { %v2997_v48 = vpop.eup %2996 }
 0x4b5   :  { %v1413_v61 = vmul.f32 %v2997_v48, %v1410_v31 }
 0x4b7   :  { %1420 = vperm.xlu0 %2992, %v1413_v61   ;;  %v1416_v15 = vmul.f32 %v1413_v61, %v4322_v2  ;;  %v4447_v2 = vpop.permute.xlu1 %2520 }
 0x4b9   :  { %v1417_v22 = vsub.f32 %v2874_v54, %v1416_v15 }
 0x4bb   :  { %1429 = vperm.xlu1 %2995, %v1417_v22   ;;  %v4451_v24 = vpop.permute.xlu1 %1670 }
 0x4bf   :  { %v4455_v4 = vpop.permute.xlu1 %2551 }
 0x4c4   :  { %v4459_v23 = vpop.permute.xlu1 %2582 }
 0x4c9   :  { %v4463_v58 = vpop.permute.xlu1 %1702 }
 0x4ce   :  { %v4467_v41 = vpop.permute.xlu1 %2644 }
 0x4d3   :  { %v4471_v50 = vpop.permute.xlu1 %2675 }
 0x536   :  { %v1421_v55 = vpop.permute.xlu0 %1420 }
 0x537   :  { %v1423_v12 = vmul.f32 %v1421_v55, %v4251_v19  ;;  %v1424_v52 = vmul.f32 %v1421_v55, %v4253_v43  ;;  %v1425_v27 = vmul.f32 %v1421_v55, %v4262_v13  ;;  %v1426_v6 = vmul.f32 %v1421_v55, %v4260_v45  ;;  %v5862_v19 = vld [vmem:[#allocation3_spill] sm:$0xff] }
 0x538   :  { %v1475_v43 = vsub.s32 4, %v5862_v19 }
 0x53a   :  { %v1430_v34 = vpop.permute.xlu1 %1429 }
 0x53b   :  { %v1433_v17 = vadd.f32 %v1430_v34, %v1424_v52  ;;  %v1432_v46 = vadd.f32 %v1430_v34, %v1423_v12  ;;  %v1435_v29 = vadd.f32 %v1430_v34, %v1426_v6  ;;  %v1434_v20 = vadd.f32 %v1430_v34, %v1425_v27 }
 0x53c   :  { %v1523_v52 = vsub.s32 5, %v5862_v19 }
 0x53d   :  { %v1437_v18 = vmax.f32 %v1433_v17, 0.0  ;;  %v1436_v25 = vmax.f32 %v1432_v46, 0.0  ;;  %v1439_v31 = vmax.f32 %v1435_v29, 0.0  ;;  %v1438_v48 = vmax.f32 %v1434_v20, 0.0 }
 0x53f   :  { %1446 = vrot.lane.b32.xlu0 %v1437_v18, %s3046_s22  ;;  %1444 = vrot.lane.b32.xlu1 %v1436_v25, %s3046_s22 }
 0x543   :  { %1450 = vrot.lane.b32.xlu0 %v1439_v31, %s3046_s22  ;;  %1448 = vrot.lane.b32.xlu1 %v1438_v48, %s3046_s22 }
 0x5b1   :  { %v1447_v13 = vpop.permute.xlu0 %1446  ;;  %v1445_v45 = vpop.permute.xlu1 %1444 }
 0x5b2   :  { %v1452_v61 = vsel %vm1341_vm10, %v1445_v45, %v1447_v13 }
 0x5b3   :  { %v1458_v54 = vsel %vm4274_vm11, %v1452_v61, 0.0 }
 0x5b4   :  { %v1464_v15 = vrot.slane %v1458_v54, %v5812_v8  ;;  %v1476_v22 = vrot.slane %v1458_v54, %v1475_v43  ;;  %v1512_v31 = vrot.slane %v1458_v54, %v5813_v0  ;;  %v1524_v48 = vrot.slane %v1458_v54, %v1523_v52 }
 0x5b5   :  { %v1451_v55 = vpop.permute.xlu0 %1450  ;;  %v1449_v12 = vpop.permute.xlu1 %1448 }
 0x5b6   :  { %v1453_v34 = vsel %vm1341_vm10, %v1447_v13, %v1449_v12  ;;  %v1454_v27 = vsel %vm1341_vm10, %v1449_v12, %v1451_v55  ;;  %v1485_v6 = vsel %vm88_vm0, %v1464_v15, %v1476_v22  ;;  %v1569_v22 = vsub.s32 6, %v5862_v19 }
 0x5b7   :  { %v1459_v17 = vsel %vm4279_vm12, %v1453_v34, 0.0  ;;  %v1460_v46 = vsel %vm4283_vm13, %v1454_v27, 0.0  ;;  %1491 = vrot.lane.b32.xlu1 %v1485_v6, %s3047_s3  ;;  %v1533_v55 = vsel %vm88_vm0, %v1512_v31, %v1524_v48  ;;  %v1615_v6 = vsub.s32 7, %v5862_v19  ;;  %v5863_v31 = vld [vmem:[#allocation7_spill] sm:$0xff] }
 0x5b8   :  { %v1472_v18 = vrot.slane %v1460_v46, %v5812_v8  ;;  %v1484_v25 = vrot.slane %v1460_v46, %v1475_v43  ;;  %v1468_v29 = vrot.slane %v1459_v17, %v5812_v8  ;;  %v1480_v20 = vrot.slane %v1459_v17, %v1475_v43 }
 0x5b9   :  { %v1516_v61 = vrot.slane %v1459_v17, %v5813_v0  ;;  %v1528_v15 = vrot.slane %v1459_v17, %v1523_v52  ;;  %v1562_v8 = vrot.slane %v1459_v17, %v5814_v14  ;;  %v1574_v12 = vrot.slane %v1459_v17, %v1569_v22 }
 0x5ba   :  { %v1487_v13 = vsel %vm88_vm0, %v1472_v18, %v1484_v25  ;;  %v1486_v45 = vsel %vm88_vm0, %v1468_v29, %v1480_v20  ;;  %v1520_v34 = vrot.slane %v1460_v46, %v5813_v0  ;;  %v1532_v27 = vrot.slane %v1460_v46, %v1523_v52 }
 0x5bb   :  { %1495 = vrot.lane.b32.xlu1 %v1487_v13, %s3047_s3  ;;  %1493 = vrot.lane.b32.xlu0 %v1486_v45, %s3047_s3  ;;  %v1534_v43 = vsel %vm88_vm0, %v1516_v61, %v1528_v15  ;;  %v1558_v18 = vrot.slane %v1458_v54, %v5814_v14  ;;  %v1570_v25 = vrot.slane %v1458_v54, %v1569_v22 }
 0x5bc   :  { %v1580_v29 = vsel %vm88_vm0, %v1562_v8, %v1574_v12  ;;  %v1535_v20 = vsel %vm88_vm0, %v1520_v34, %v1532_v27  ;;  %v1608_v48 = vrot.slane %v1459_v17, %v5863_v31  ;;  %v1620_v13 = vrot.slane %v1459_v17, %v1615_v6 }
 0x5bd   :  { %v1579_v52 = vsel %vm88_vm0, %v1558_v18, %v1570_v25  ;;  %v1566_v19 = vrot.slane %v1460_v46, %v5814_v14  ;;  %v1578_v45 = vrot.slane %v1460_v46, %v1569_v22  ;;  %v1604_v15 = vrot.slane %v1458_v54, %v5863_v31 }
 0x5be   :  { %v1626_v0 = vsel %vm88_vm0, %v1608_v48, %v1620_v13  ;;  %v1616_v17 = vrot.slane %v1458_v54, %v1615_v6  ;;  %v1612_v8 = vrot.slane %v1460_v46, %v5863_v31 }
 0x5bf   :  { %1541 = vrot.lane.b32.xlu1 %v1534_v43, %s3047_s3  ;;  %1539 = vrot.lane.b32.xlu0 %v1533_v55, %s3047_s3  ;;  %v1581_v61 = vsel %vm88_vm0, %v1566_v19, %v1578_v45  ;;  %v1624_v43 = vrot.slane %v1460_v46, %v1615_v6 }
 0x5c0   :  { %v1625_v55 = vsel %vm88_vm0, %v1604_v15, %v1616_v17 }
 0x5c1   :  { %v1627_v14 = vsel %vm88_vm0, %v1612_v8, %v1624_v43 }
 0x5c3   :  { %1587 = vrot.lane.b32.xlu1 %v1580_v29, %s3047_s3  ;;  %1543 = vrot.lane.b32.xlu0 %v1535_v20, %s3047_s3 }
 0x5c7   :  { %1633 = vrot.lane.b32.xlu1 %v1626_v0, %s3047_s3  ;;  %1585 = vrot.lane.b32.xlu0 %v1579_v52, %s3047_s3 }
 0x5cb   :  { %1589 = vrot.lane.b32.xlu0 %v1581_v61, %s3047_s3 }
 0x5cf   :  { %1631 = vrot.lane.b32.xlu0 %v1625_v55, %s3047_s3 }
 0x5d3   :  { %1635 = vrot.lane.b32.xlu0 %v1627_v14, %s3047_s3 }
 0x629   :  { %v1492_v22 = vpop.permute.xlu1 %1491 }
 0x62a   :  { %1505 = vst.msk [vmem:[#allocation2] sm:$0xff] %vm1504_vm14, %v1492_v22 }
 0x62d   :  { %v1494_v12 = vpop.permute.xlu0 %1493  ;;  %v1496_v54 = vpop.permute.xlu1 %1495 }
 0x62e   :  { %v4532_v34 = vsel %vm1497_vm15, %v1492_v22, %v1494_v12  ;;  %v4535_v27 = vsel %vm1497_vm15, %v1494_v12, %v1496_v54  ;;  %1508 = vst.msk [vmem:[#allocation2 + $0x18] sm:$0xff] %vm1497_vm15, %v1496_v54 }
 0x62f   :  { %v1658_v10 = vmul.f32 %v4469_v35, %v4532_v34 }
 0x631   :  { %v1540_v46 = vpop.permute.xlu0 %1539  ;;  %v1542_v6 = vpop.permute.xlu1 %1541  ;;  %v4538_v18 = vld [vmem:[#allocation2] sm:$0xff] }
 0x632   :  { %1551 = vst.msk [vmem:[#allocation2 + $0x20] sm:$0xff] %vm1504_vm14, %v1540_v46  ;;  %v4542_v25 = vsel %vm1497_vm15, %v1540_v46, %v1542_v6  ;;  %v1717_v29 = vmul.f32 %v4362_v42, %v4538_v18 }
 0x634   :  { %1725 = vrot.lane.b32.xlu0 %v1717_v29, %s3038_s14 }
 0x635   :  { %v1544_v20 = vpop.permute.xlu0 %1543  ;;  %v4547_v31 = vld [vmem:[#allocation2 + $0x18] sm:$0xff]  ;;  %v1588_v0 = vpop.permute.xlu1 %1587 }
 0x636   :  { %v4550_v48 = vsel %vm1497_vm15, %v1542_v6, %v1544_v20  ;;  %1554 = vst.msk [vmem:[#allocation2 + $0x38] sm:$0xff] %vm1497_vm15, %v1544_v20  ;;  %v1720_v13 = vmul.f32 %v4362_v42, %v4547_v31  ;;  %v1660_v6 = vmul.f32 %v4469_v35, %v4547_v31 }
 0x638   :  { %1731 = vrot.lane.b32.xlu1 %v1720_v13, %s3038_s14 }
 0x639   :  { %v1586_v52 = vpop.permute.xlu0 %1585  ;;  %v4556_v19 = vld [vmem:[#allocation2 + $0x20] sm:$0xff]  ;;  %v1634_v14 = vpop.permute.xlu1 %1633 }
 0x63a   :  { %v4559_v45 = vsel %vm1497_vm15, %v1586_v52, %v1588_v0  ;;  %1597 = vst.msk [vmem:[#allocation2 + $0x40] sm:$0xff] %vm1504_vm14, %v1586_v52  ;;  %v1748_v61 = vmul.f32 %v4364_v28, %v4556_v19 }
 0x63b   :  { %5864 = vst [vmem:[#allocation15_spill] sm:$0xff] %v4559_v45 }
 0x63c   :  { %1756 = vrot.lane.b32.xlu0 %v1748_v61, %s3038_s14 }
 0x63d   :  { %v1590_v15 = vpop.permute.xlu0 %1589  ;;  %v4565_v17 = vld [vmem:[#allocation2 + $0x38] sm:$0xff] }
 0x63e   :  { %v4568_v55 = vsel %vm1497_vm15, %v1588_v0, %v1590_v15  ;;  %1600 = vst.msk [vmem:[#allocation2 + $0x58] sm:$0xff] %vm1497_vm15, %v1590_v15  ;;  %v1751_v8 = vmul.f32 %v4364_v28, %v4565_v17  ;;  %v1676_v43 = vmul.f32 %v4451_v24, %v4565_v17 }
 0x63f   :  { %5865 = vst [vmem:[#allocation14_spill] sm:$0xff] %v4568_v55  ;;  %v1691_v59 = vmul.f32 %v4461_v26, %v4568_v55 }
 0x640   :  { %1762 = vrot.lane.b32.xlu1 %v1751_v8, %s3038_s14  ;;  %v1680_v29 = vadd.f32 %v1676_v43, %v1660_v6  ;;  %v1844_v6 = vmul.f32 %v4399_v9, %v4547_v31 }
 0x641   :  { %v1632_v22 = vpop.permute.xlu0 %1631  ;;  %v4576_v12 = vld [vmem:[#allocation2 + $0x40] sm:$0xff] }
 0x642   :  { %v4579_v54 = vsel %vm1497_vm15, %v1632_v22, %v1634_v14  ;;  %1643 = vst.msk [vmem:[#allocation2 + $0x60] sm:$0xff] %vm1504_vm14, %v1632_v22  ;;  %v1779_v46 = vmul.f32 %v4396_v44, %v4576_v12  ;;  %v1841_v22 = vmul.f32 %v4399_v9, %v4538_v18  ;;  %v1673_v9 = vmul.f32 %v4451_v24, %v4556_v19 }
 0x644   :  { %1787 = vrot.lane.b32.xlu0 %v1779_v46, %s3038_s14 }
 0x645   :  { %v1636_v20 = vpop.permute.xlu0 %1635  ;;  %v4587_v13 = vld [vmem:[#allocation2 + $0x58] sm:$0xff] }
 0x646   :  { %v4590_v0 = vsel %vm1497_vm15, %v1634_v14, %v1636_v20  ;;  %1646 = vst.msk [vmem:[#allocation2 + $0x78] sm:$0xff] %vm1497_vm15, %v1636_v20  ;;  %v1782_v52 = vmul.f32 %v4396_v44, %v4587_v13  ;;  %v1692_v61 = vmul.f32 %v4461_v26, %v4587_v13  ;;  %v1903_v44 = vmul.f32 %v4433_v49, %v4576_v12 }
 0x647   :  { %5866 = vst [vmem:[#allocation16_spill] sm:$0xff] %v4590_v0  ;;  %v1707_v16 = vmul.f32 %v4463_v58, %v4590_v0 }
 0x648   :  { %1793 = vrot.lane.b32.xlu1 %v1782_v52, %s3038_s14  ;;  %v1696_v8 = vadd.f32 %v1692_v61, %v1680_v29  ;;  %v1872_v29 = vmul.f32 %v4401_v63, %v4556_v19  ;;  %v1659_v52 = vmul.f32 %v4469_v35, %v4535_v27  ;;  %v1675_v61 = vmul.f32 %v4451_v24, %v4550_v48 }
 0x649   :  { %v4598_v15 = vld [vmem:[#allocation2 + $0x60] sm:$0xff] }
 0x64a   :  { %v1810_v43 = vmul.f32 %v4429_v39, %v4598_v15 }
 0x64c   :  { %1818 = vrot.lane.b32.xlu0 %v1810_v43, %s3038_s14 }
 0x64d   :  { %v4603_v14 = vld [vmem:[#allocation2 + $0x78] sm:$0xff] }
 0x64e   :  { %v1813_v46 = vmul.f32 %v4429_v39, %v4603_v14  ;;  %v1708_v20 = vmul.f32 %v4463_v58, %v4603_v14  ;;  %v1705_v39 = vmul.f32 %v4463_v58, %v4598_v15 }
 0x650   :  { %1849 = vrot.lane.b32.xlu0 %v1841_v22, %s3039_s15  ;;  %1824 = vrot.lane.b32.xlu1 %v1813_v46, %s3038_s14  ;;  %v4621_v43 = vadd.f32 %v1708_v20, %v1696_v8  ;;  %v1657_v22 = vmul.f32 %v4469_v35, %v4538_v18  ;;  %v1679_v46 = vadd.f32 %v1675_v61, %v1659_v52 }
 0x651   :  { %v1674_v8 = vmul.f32 %v4451_v24, %v4542_v25  ;;  %v1689_v20 = vmul.f32 %v4461_v26, %v4576_v12  ;;  %v1706_v52 = vmul.f32 %v4463_v58, %v4579_v54  ;;  %v1875_v24 = vmul.f32 %v4401_v63, %v4565_v17 }
 0x652   :  { %5867 = vst [vmem:[#allocation18_spill] sm:$0xff] %v4621_v43  ;;  %v1690_v43 = vmul.f32 %v4461_v26, %v4559_v45  ;;  %v1695_v35 = vadd.f32 %v1691_v59, %v1679_v46  ;;  %v1677_v61 = vadd.f32 %v1673_v9, %v1657_v22  ;;  %v1906_v59 = vmul.f32 %v4433_v49, %v4587_v13 }
 0x653   :  { %v1678_v0 = vadd.f32 %v1674_v8, %v1658_v10  ;;  %v1934_v10 = vmul.f32 %v4403_v38, %v4598_v15  ;;  %v1996_v9 = vmul.f32 %v4437_v56, %v4556_v19  ;;  %v2061_v22 = vmul.f32 %v4409_v33, %v4603_v14 }
 0x654   :  { %1880 = vrot.lane.b32.xlu0 %v1872_v29, %s3039_s15  ;;  %1855 = vrot.lane.b32.xlu1 %v1844_v6, %s3039_s15  ;;  %v4649_v26 = vadd.f32 %v1707_v16, %v1695_v35  ;;  %v1693_v45 = vadd.f32 %v1689_v20, %v1677_v61  ;;  %v1965_v16 = vmul.f32 %v4405_v7, %v4538_v18 }
 0x655   :  { %v1694_v55 = vadd.f32 %v1690_v43, %v1678_v0  ;;  %v2058_v0 = vmul.f32 %v4409_v33, %v4598_v15  ;;  %v2030_v29 = vmul.f32 %v4407_v32, %v4587_v13  ;;  %v2089_v43 = vmul.f32 %v4441_v62, %v4538_v18 }
 0x656   :  { %v4653_v58 = vadd.f32 %v1705_v39, %v1693_v45  ;;  %v1968_v39 = vmul.f32 %v4405_v7, %v4547_v31  ;;  %v2027_v45 = vmul.f32 %v4407_v32, %v4576_v12  ;;  %v2120_v46 = vmul.f32 %v4411_v47, %v4556_v19 }
 0x657   :  { %v4655_v6 = vadd.f32 %v1706_v52, %v1694_v55  ;;  %v1999_v55 = vmul.f32 %v4437_v56, %v4565_v17  ;;  %v2092_v8 = vmul.f32 %v4441_v62, %v4547_v31  ;;  %v2151_v20 = vmul.f32 %v4413_v30, %v4576_v12 }
 0x658   :  { %1911 = vrot.lane.b32.xlu0 %v1903_v44, %s3039_s15  ;;  %1886 = vrot.lane.b32.xlu1 %v1875_v24, %s3039_s15  ;;  %v1937_v44 = vmul.f32 %v4403_v38, %v4603_v14  ;;  %v2123_v52 = vmul.f32 %v4411_v47, %v4565_v17  ;;  %v2182_v35 = vmul.f32 %v4445_v11, %v4598_v15 }
 0x659   :  { %v2154_v61 = vmul.f32 %v4413_v30, %v4587_v13  ;;  %v2213_v24 = vmul.f32 %v4415_v57, %v4538_v18 }
 0x65c   :  { %1942 = vrot.lane.b32.xlu0 %v1934_v10, %s3039_s15  ;;  %1917 = vrot.lane.b32.xlu1 %v1906_v59, %s3039_s15  ;;  %v2185_v10 = vmul.f32 %v4445_v11, %v4603_v14  ;;  %v2244_v59 = vmul.f32 %v4417_v60, %v4556_v19 }
 0x660   :  { %1973 = vrot.lane.b32.xlu0 %v1965_v16, %s3040_s16  ;;  %1948 = vrot.lane.b32.xlu1 %v1937_v44, %s3039_s15  ;;  %v2216_v16 = vmul.f32 %v4415_v57, %v4547_v31  ;;  %v2275_v44 = vmul.f32 %v4449_v36, %v4576_v12 }
 0x664   :  { %2004 = vrot.lane.b32.xlu0 %v1996_v9, %s3040_s16  ;;  %1979 = vrot.lane.b32.xlu1 %v1968_v39, %s3040_s16  ;;  %v2247_v9 = vmul.f32 %v4417_v60, %v4565_v17  ;;  %v2306_v39 = vmul.f32 %v4419_v37, %v4598_v15 }
 0x668   :  { %2035 = vrot.lane.b32.xlu0 %v2027_v45, %s3040_s16  ;;  %2010 = vrot.lane.b32.xlu1 %v1999_v55, %s3040_s16  ;;  %v2278_v45 = vmul.f32 %v4449_v36, %v4587_v13  ;;  %v2337_v55 = vmul.f32 %v4431_v21, %v4538_v18 }
 0x66c   :  { %2066 = vrot.lane.b32.xlu0 %v2058_v0, %s3040_s16  ;;  %2041 = vrot.lane.b32.xlu1 %v2030_v29, %s3040_s16  ;;  %v2309_v0 = vmul.f32 %v4419_v37, %v4603_v14  ;;  %v2368_v29 = vmul.f32 %v4453_v3, %v4556_v19 }
 0x670   :  { %2097 = vrot.lane.b32.xlu0 %v2089_v43, %s3041_s17  ;;  %2072 = vrot.lane.b32.xlu1 %v2061_v22, %s3040_s16  ;;  %v2340_v43 = vmul.f32 %v4431_v21, %v4547_v31  ;;  %v2399_v22 = vmul.f32 %v4435_v1, %v4576_v12 }
 0x674   :  { %2128 = vrot.lane.b32.xlu0 %v2120_v46, %s3041_s17  ;;  %2103 = vrot.lane.b32.xlu1 %v2092_v8, %s3041_s17  ;;  %v2371_v46 = vmul.f32 %v4453_v3, %v4565_v17  ;;  %v2430_v8 = vmul.f32 %v4439_v51, %v4598_v15 }
 0x678   :  { %2159 = vrot.lane.b32.xlu0 %v2151_v20, %s3041_s17  ;;  %2134 = vrot.lane.b32.xlu1 %v2123_v52, %s3041_s17  ;;  %v2402_v20 = vmul.f32 %v4435_v1, %v4587_v13  ;;  %v2461_v52 = vmul.f32 %v4457_v53, %v4538_v18 }
 0x67c   :  { %2190 = vrot.lane.b32.xlu0 %v2182_v35, %s3041_s17  ;;  %2165 = vrot.lane.b32.xlu1 %v2154_v61, %s3041_s17  ;;  %v2433_v35 = vmul.f32 %v4439_v51, %v4603_v14  ;;  %v2492_v61 = vmul.f32 %v4443_v40, %v4556_v19 }
 0x680   :  { %2221 = vrot.lane.b32.xlu0 %v2213_v24, %s3042_s18  ;;  %2196 = vrot.lane.b32.xlu1 %v2185_v10, %s3041_s17  ;;  %v2464_v24 = vmul.f32 %v4457_v53, %v4547_v31  ;;  %v2523_v10 = vmul.f32 %v4447_v2, %v4576_v12 }
 0x684   :  { %2252 = vrot.lane.b32.xlu0 %v2244_v59, %s3042_s18  ;;  %2227 = vrot.lane.b32.xlu1 %v2216_v16, %s3042_s18  ;;  %v2495_v59 = vmul.f32 %v4443_v40, %v4565_v17  ;;  %v2554_v16 = vmul.f32 %v4455_v4, %v4598_v15 }
 0x688   :  { %2283 = vrot.lane.b32.xlu0 %v2275_v44, %s3042_s18  ;;  %2258 = vrot.lane.b32.xlu1 %v2247_v9, %s3042_s18  ;;  %v2526_v44 = vmul.f32 %v4447_v2, %v4587_v13  ;;  %v2585_v9 = vmul.f32 %v4459_v23, %v4538_v18 }
 0x68c   :  { %2314 = vrot.lane.b32.xlu0 %v2306_v39, %s3042_s18  ;;  %2289 = vrot.lane.b32.xlu1 %v2278_v45, %s3042_s18  ;;  %v2557_v39 = vmul.f32 %v4455_v4, %v4603_v14 }
 0x690   :  { %2345 = vrot.lane.b32.xlu0 %v2337_v55, %s3043_s19  ;;  %2320 = vrot.lane.b32.xlu1 %v2309_v0, %s3042_s18  ;;  %v2616_v55 = vmul.f32 %v4465_v5, %v4556_v19  ;;  %v2588_v0 = vmul.f32 %v4459_v23, %v4547_v31 }
 0x694   :  { %2376 = vrot.lane.b32.xlu0 %v2368_v29, %s3043_s19  ;;  %2351 = vrot.lane.b32.xlu1 %v2340_v43, %s3043_s19  ;;  %v2647_v43 = vmul.f32 %v4467_v41, %v4576_v12 }
 0x698   :  { %2407 = vrot.lane.b32.xlu0 %v2399_v22, %s3043_s19  ;;  %2382 = vrot.lane.b32.xlu1 %v2371_v46, %s3043_s19  ;;  %v2619_v22 = vmul.f32 %v4465_v5, %v4565_v17  ;;  %v2678_v46 = vmul.f32 %v4471_v50, %v4598_v15 }
 0x69c   :  { %2438 = vrot.lane.b32.xlu0 %v2430_v8, %s3043_s19  ;;  %2413 = vrot.lane.b32.xlu1 %v2402_v20, %s3043_s19  ;;  %v2650_v8 = vmul.f32 %v4467_v41, %v4587_v13  ;;  %v1718_v20 = vmul.f32 %v4362_v42, %v4532_v34 }
 0x6a0   :  { %2469 = vrot.lane.b32.xlu0 %v2461_v52, %s3044_s20  ;;  %2444 = vrot.lane.b32.xlu1 %v2433_v35, %s3043_s19  ;;  %v1719_v52 = vmul.f32 %v4362_v42, %v4535_v27  ;;  %v1750_v35 = vmul.f32 %v4364_v28, %v4550_v48 }
 0x6a4   :  { %2500 = vrot.lane.b32.xlu0 %v2492_v61, %s3044_s20  ;;  %2475 = vrot.lane.b32.xlu1 %v2464_v24, %s3044_s20  ;;  %v1749_v61 = vmul.f32 %v4364_v28, %v4542_v25 }
 0x6a6   :  { %v4789_v45 = vpop.permute.xlu0 %1725 }
 0x6a8   :  { %2531 = vrot.lane.b32.xlu0 %v2523_v10, %s3044_s20  ;;  %2506 = vrot.lane.b32.xlu1 %v2495_v59, %s3044_s20  ;;  %v5868_v10 = vld [vmem:[#allocation14_spill] sm:$0xff]  ;;  %v5869_v59 = vld [vmem:[#allocation12_spill] sm:$0xff] }
 0x6aa   :  { %v4797_v18 = vpop.permute.xlu1 %1731 }
 0x6ac   :  { %2562 = vrot.lane.b32.xlu0 %v2554_v16, %s3044_s20  ;;  %2537 = vrot.lane.b32.xlu1 %v2526_v44, %s3044_s20  ;;  %v1781_v16 = vmul.f32 %v5869_v59, %v5868_v10  ;;  %v5870_v44 = vld [vmem:[#allocation15_spill] sm:$0xff] }
 0x6ae   :  { %v4799_v29 = vpop.permute.xlu0 %1756 }
 0x6b0   :  { %2593 = vrot.lane.b32.xlu0 %v2585_v9, %s3045_s21  ;;  %2568 = vrot.lane.b32.xlu1 %v2557_v39, %s3044_s20  ;;  %v1780_v9 = vmul.f32 %v5869_v59, %v5870_v44 }
 0x6b2   :  { %v4807_v19 = vpop.permute.xlu1 %1762 }
 0x6b4   :  { %2624 = vrot.lane.b32.xlu0 %v2616_v55, %s3045_s21  ;;  %2599 = vrot.lane.b32.xlu1 %v2588_v0, %s3045_s21  ;;  %v5871_v55 = vld [vmem:[#allocation16_spill] sm:$0xff]  ;;  %v5872_v0 = vld [vmem:[#allocation13_spill] sm:$0xff] }
 0x6b6   :  { %v4809_v31 = vpop.permute.xlu0 %1787 }
 0x6b8   :  { %2655 = vrot.lane.b32.xlu0 %v2647_v43, %s3045_s21  ;;  %2630 = vrot.lane.b32.xlu1 %v2619_v22, %s3045_s21  ;;  %v1812_v43 = vmul.f32 %v5872_v0, %v5871_v55  ;;  %v1811_v22 = vmul.f32 %v5872_v0, %v4579_v54 }
 0x6ba   :  { %v4817_v12 = vpop.permute.xlu1 %1793 }
 0x6bc   :  { %2686 = vrot.lane.b32.xlu0 %v2678_v46, %s3045_s21  ;;  %2661 = vrot.lane.b32.xlu1 %v2650_v8, %s3045_s21 }
 0x6be   :  { %v4819_v17 = vpop.permute.xlu0 %1818 }
 0x6c0   :  { %1727 = vrot.lane.b32.xlu1 %v1718_v20, %s3038_s14  ;;  %1729 = vrot.lane.b32.xlu0 %v1719_v52, %s3038_s14  ;;  %v5873_v20 = vld [vmem:[#allocation11_spill] sm:$0xff] }
 0x6c1   :  { %v1843_v52 = vmul.f32 %v5873_v20, %v4535_v27 }
 0x6c2   :  { %v4827_v15 = vpop.permute.xlu0 %1849  ;;  %v4829_v13 = vpop.permute.xlu1 %1824 }
 0x6c4   :  { %1760 = vrot.lane.b32.xlu0 %v1750_v35, %s3038_s14  ;;  %1758 = vrot.lane.b32.xlu1 %v1749_v61, %s3038_s14  ;;  %v1842_v35 = vmul.f32 %v5873_v20, %v4532_v34  ;;  %v1904_v20 = vmul.f32 %v4433_v49, %v5870_v44 }
 0x6c6   :  { %v4837_v24 = vpop.permute.xlu0 %1880  ;;  %v4839_v42 = vpop.permute.xlu1 %1855 }
 0x6c8   :  { %1791 = vrot.lane.b32.xlu0 %v1781_v16, %s3038_s14  ;;  %1789 = vrot.lane.b32.xlu1 %v1780_v9, %s3038_s14  ;;  %v1874_v16 = vmul.f32 %v4401_v63, %v4550_v48  ;;  %v1873_v9 = vmul.f32 %v4401_v63, %v4542_v25 }
 0x6ca   :  { %v4847_v39 = vpop.permute.xlu0 %1911  ;;  %v4849_v28 = vpop.permute.xlu1 %1886 }
 0x6cc   :  { %1822 = vrot.lane.b32.xlu0 %v1812_v43, %s3038_s14  ;;  %1820 = vrot.lane.b32.xlu1 %v1811_v22, %s3038_s14  ;;  %v1905_v22 = vmul.f32 %v4433_v49, %v5868_v10 }
 0x6ce   :  { %v4857_v46 = vpop.permute.xlu0 %1942  ;;  %v4859_v8 = vpop.permute.xlu1 %1917 }
 0x6d0   :  { %1853 = vrot.lane.b32.xlu0 %v1843_v52, %s3039_s15  ;;  %1851 = vrot.lane.b32.xlu1 %v1842_v35, %s3039_s15  ;;  %v1936_v35 = vmul.f32 %v4403_v38, %v5871_v55 }
 0x6d2   :  { %v4867_v61 = vpop.permute.xlu0 %1973  ;;  %v4869_v59 = vpop.permute.xlu1 %1948 }
 0x6d4   :  { %1884 = vrot.lane.b32.xlu0 %v1874_v16, %s3039_s15  ;;  %1882 = vrot.lane.b32.xlu1 %v1873_v9, %s3039_s15  ;;  %v1935_v16 = vmul.f32 %v4403_v38, %v4579_v54 }
 0x6d6   :  { %v4877_v0 = vpop.permute.xlu0 %2004  ;;  %v4879_v43 = vpop.permute.xlu1 %1979 }
 0x6d8   :  { %1915 = vrot.lane.b32.xlu0 %v1905_v22, %s3039_s15  ;;  %1913 = vrot.lane.b32.xlu1 %v1904_v20, %s3039_s15  ;;  %v1967_v22 = vmul.f32 %v4405_v7, %v4535_v27  ;;  %v1966_v20 = vmul.f32 %v4405_v7, %v4532_v34 }
 0x6da   :  { %v4887_v52 = vpop.permute.xlu0 %2035  ;;  %v4889_v63 = vpop.permute.xlu1 %2010 }
 0x6db   :  { %5874 = vst [vmem:[#allocation17_spill] sm:$0xff] %v4889_v63 }
 0x6dc   :  { %1946 = vrot.lane.b32.xlu0 %v1936_v35, %s3039_s15  ;;  %1944 = vrot.lane.b32.xlu1 %v1935_v16, %s3039_s15  ;;  %v1998_v35 = vmul.f32 %v4437_v56, %v4550_v48  ;;  %v1997_v16 = vmul.f32 %v4437_v56, %v4542_v25 }
 0x6de   :  { %v4897_v9 = vpop.permute.xlu0 %2066  ;;  %v4899_v49 = vpop.permute.xlu1 %2041 }
 0x6df   :  { %5875 = vst [vmem:[#allocation19_spill] sm:$0xff] %v4899_v49 }
 0x6e0   :  { %1977 = vrot.lane.b32.xlu0 %v1967_v22, %s3040_s16  ;;  %1975 = vrot.lane.b32.xlu1 %v1966_v20, %s3040_s16  ;;  %v2029_v22 = vmul.f32 %v4407_v32, %v5868_v10  ;;  %v2028_v20 = vmul.f32 %v4407_v32, %v5870_v44 }
 0x6e2   :  { %v4907_v63 = vpop.permute.xlu0 %2097  ;;  %v4909_v38 = vpop.permute.xlu1 %2072 }
 0x6e3   :  { %5876 = vst [vmem:[#allocation21_spill] sm:$0xff] %v4909_v38 }
 0x6e4   :  { %2008 = vrot.lane.b32.xlu0 %v1998_v35, %s3040_s16  ;;  %2006 = vrot.lane.b32.xlu1 %v1997_v16, %s3040_s16  ;;  %v2060_v35 = vmul.f32 %v4409_v33, %v5871_v55  ;;  %v2059_v16 = vmul.f32 %v4409_v33, %v4579_v54 }
 0x6e6   :  { %v4917_v49 = vpop.permute.xlu0 %2128  ;;  %v4919_v7 = vpop.permute.xlu1 %2103 }
 0x6e7   :  { %5877 = vst [vmem:[#allocation20_spill] sm:$0xff] %v4919_v7 }
 0x6e8   :  { %2039 = vrot.lane.b32.xlu0 %v2029_v22, %s3040_s16  ;;  %2037 = vrot.lane.b32.xlu1 %v2028_v20, %s3040_s16  ;;  %v2091_v22 = vmul.f32 %v4441_v62, %v4535_v27  ;;  %v2090_v20 = vmul.f32 %v4441_v62, %v4532_v34 }
 0x6ea   :  { %v4927_v38 = vpop.permute.xlu0 %2159  ;;  %v4929_v56 = vpop.permute.xlu1 %2134 }
 0x6eb   :  { %5878 = vst [vmem:[#allocation22_spill] sm:$0xff] %v4927_v38  ;;  %5879 = vst [vmem:[#allocation24_spill] sm:$0xff] %v4929_v56 }
 0x6ec   :  { %2070 = vrot.lane.b32.xlu0 %v2060_v35, %s3040_s16  ;;  %2068 = vrot.lane.b32.xlu1 %v2059_v16, %s3040_s16  ;;  %v2122_v35 = vmul.f32 %v4411_v47, %v4550_v48  ;;  %v2121_v16 = vmul.f32 %v4411_v47, %v4542_v25 }
 0x6ee   :  { %v4937_v7 = vpop.permute.xlu0 %2190  ;;  %v4939_v32 = vpop.permute.xlu1 %2165 }
 0x6ef   :  { %5880 = vst [vmem:[#allocation23_spill] sm:$0xff] %v4937_v7  ;;  %5881 = vst [vmem:[#allocation25_spill] sm:$0xff] %v4939_v32 }
 0x6f0   :  { %2101 = vrot.lane.b32.xlu0 %v2091_v22, %s3041_s17  ;;  %2099 = vrot.lane.b32.xlu1 %v2090_v20, %s3041_s17  ;;  %v2153_v22 = vmul.f32 %v4413_v30, %v5868_v10  ;;  %v2152_v20 = vmul.f32 %v4413_v30, %v5870_v44 }
 0x6f2   :  { %v4947_v56 = vpop.permute.xlu0 %2221  ;;  %v4949_v33 = vpop.permute.xlu1 %2196 }
 0x6f3   :  { %5882 = vst [vmem:[#allocation27_spill] sm:$0xff] %v4947_v56  ;;  %5883 = vst [vmem:[#allocation26_spill] sm:$0xff] %v4949_v33 }
 0x6f4   :  { %2132 = vrot.lane.b32.xlu0 %v2122_v35, %s3041_s17  ;;  %2130 = vrot.lane.b32.xlu1 %v2121_v16, %s3041_s17  ;;  %v2184_v35 = vmul.f32 %v4445_v11, %v5871_v55  ;;  %v2183_v16 = vmul.f32 %v4445_v11, %v4579_v54 }
 0x6f6   :  { %v4957_v32 = vpop.permute.xlu0 %2252  ;;  %v4959_v62 = vpop.permute.xlu1 %2227 }
 0x6f7   :  { %5884 = vst [vmem:[#allocation29_spill] sm:$0xff] %v4957_v32  ;;  %5885 = vst [vmem:[#allocation28_spill] sm:$0xff] %v4959_v62 }
 0x6f8   :  { %2163 = vrot.lane.b32.xlu0 %v2153_v22, %s3041_s17  ;;  %2161 = vrot.lane.b32.xlu1 %v2152_v20, %s3041_s17  ;;  %v2215_v22 = vmul.f32 %v4415_v57, %v4535_v27  ;;  %v2214_v20 = vmul.f32 %v4415_v57, %v4532_v34 }
 0x6fa   :  { %v4967_v33 = vpop.permute.xlu0 %2283  ;;  %v4969_v47 = vpop.permute.xlu1 %2258 }
 0x6fb   :  { %5886 = vst [vmem:[#allocation31_spill] sm:$0xff] %v4967_v33  ;;  %5887 = vst [vmem:[#allocation30_spill] sm:$0xff] %v4969_v47 }
 0x6fc   :  { %2194 = vrot.lane.b32.xlu0 %v2184_v35, %s3041_s17  ;;  %2192 = vrot.lane.b32.xlu1 %v2183_v16, %s3041_s17  ;;  %v2246_v35 = vmul.f32 %v4417_v60, %v4550_v48  ;;  %v2245_v16 = vmul.f32 %v4417_v60, %v4542_v25 }
 0x6fe   :  { %v4977_v62 = vpop.permute.xlu0 %2314  ;;  %v4979_v30 = vpop.permute.xlu1 %2289 }
 0x6ff   :  { %5888 = vst [vmem:[#allocation35_spill] sm:$0xff] %v4977_v62  ;;  %5889 = vst [vmem:[#allocation32_spill] sm:$0xff] %v4979_v30 }
 0x700   :  { %2225 = vrot.lane.b32.xlu0 %v2215_v22, %s3042_s18  ;;  %2223 = vrot.lane.b32.xlu1 %v2214_v20, %s3042_s18  ;;  %v2277_v22 = vmul.f32 %v4449_v36, %v5868_v10  ;;  %v2276_v20 = vmul.f32 %v4449_v36, %v5870_v44 }
 0x702   :  { %v4987_v47 = vpop.permute.xlu0 %2345  ;;  %v4989_v11 = vpop.permute.xlu1 %2320 }
 0x703   :  { %5890 = vst [vmem:[#allocation34_spill] sm:$0xff] %v4987_v47  ;;  %5891 = vst [vmem:[#allocation33_spill] sm:$0xff] %v4989_v11 }
 0x704   :  { %2256 = vrot.lane.b32.xlu0 %v2246_v35, %s3042_s18  ;;  %2254 = vrot.lane.b32.xlu1 %v2245_v16, %s3042_s18  ;;  %v2308_v35 = vmul.f32 %v4419_v37, %v5871_v55  ;;  %v2307_v16 = vmul.f32 %v4419_v37, %v4579_v54 }
 0x706   :  { %v4997_v30 = vpop.permute.xlu0 %2376  ;;  %v4999_v57 = vpop.permute.xlu1 %2351 }
 0x707   :  { %5892 = vst [vmem:[#allocation39_spill] sm:$0xff] %v4997_v30  ;;  %5893 = vst [vmem:[#allocation36_spill] sm:$0xff] %v4999_v57 }
 0x708   :  { %2287 = vrot.lane.b32.xlu0 %v2277_v22, %s3042_s18  ;;  %2285 = vrot.lane.b32.xlu1 %v2276_v20, %s3042_s18  ;;  %v2339_v22 = vmul.f32 %v4431_v21, %v4535_v27  ;;  %v2338_v20 = vmul.f32 %v4431_v21, %v4532_v34 }
 0x70a   :  { %v5007_v11 = vpop.permute.xlu0 %2407  ;;  %v5009_v60 = vpop.permute.xlu1 %2382 }
 0x70b   :  { %5894 = vst [vmem:[#allocation38_spill] sm:$0xff] %v5007_v11  ;;  %5895 = vst [vmem:[#allocation37_spill] sm:$0xff] %v5009_v60 }
 0x70c   :  { %2318 = vrot.lane.b32.xlu0 %v2308_v35, %s3042_s18  ;;  %2316 = vrot.lane.b32.xlu1 %v2307_v16, %s3042_s18  ;;  %v2370_v35 = vmul.f32 %v4453_v3, %v4550_v48  ;;  %v2369_v16 = vmul.f32 %v4453_v3, %v4542_v25 }
 0x70e   :  { %v5017_v57 = vpop.permute.xlu0 %2438  ;;  %v5019_v36 = vpop.permute.xlu1 %2413 }
 0x70f   :  { %5896 = vst [vmem:[#allocation43_spill] sm:$0xff] %v5017_v57  ;;  %5897 = vst [vmem:[#allocation40_spill] sm:$0xff] %v5019_v36 }
 0x710   :  { %2349 = vrot.lane.b32.xlu0 %v2339_v22, %s3043_s19  ;;  %2347 = vrot.lane.b32.xlu1 %v2338_v20, %s3043_s19  ;;  %v2401_v22 = vmul.f32 %v4435_v1, %v5868_v10  ;;  %v2400_v20 = vmul.f32 %v4435_v1, %v5870_v44 }
 0x712   :  { %v5027_v60 = vpop.permute.xlu0 %2469  ;;  %v5029_v37 = vpop.permute.xlu1 %2444 }
 0x713   :  { %5898 = vst [vmem:[#allocation42_spill] sm:$0xff] %v5027_v60  ;;  %5899 = vst [vmem:[#allocation41_spill] sm:$0xff] %v5029_v37 }
 0x714   :  { %2380 = vrot.lane.b32.xlu0 %v2370_v35, %s3043_s19  ;;  %2378 = vrot.lane.b32.xlu1 %v2369_v16, %s3043_s19  ;;  %v2432_v35 = vmul.f32 %v4439_v51, %v5871_v55  ;;  %v2431_v16 = vmul.f32 %v4439_v51, %v4579_v54 }
 0x716   :  { %v5037_v36 = vpop.permute.xlu0 %2500  ;;  %v5039_v21 = vpop.permute.xlu1 %2475 }
 0x717   :  { %5900 = vst [vmem:[#allocation47_spill] sm:$0xff] %v5037_v36  ;;  %5901 = vst [vmem:[#allocation44_spill] sm:$0xff] %v5039_v21 }
 0x718   :  { %2411 = vrot.lane.b32.xlu0 %v2401_v22, %s3043_s19  ;;  %2409 = vrot.lane.b32.xlu1 %v2400_v20, %s3043_s19  ;;  %v2463_v22 = vmul.f32 %v4457_v53, %v4535_v27  ;;  %v2462_v20 = vmul.f32 %v4457_v53, %v4532_v34 }
 0x71a   :  { %v5047_v37 = vpop.permute.xlu0 %2531  ;;  %v5049_v3 = vpop.permute.xlu1 %2506 }
 0x71b   :  { %5902 = vst [vmem:[#allocation46_spill] sm:$0xff] %v5047_v37  ;;  %5903 = vst [vmem:[#allocation45_spill] sm:$0xff] %v5049_v3 }
 0x71c   :  { %2442 = vrot.lane.b32.xlu0 %v2432_v35, %s3043_s19  ;;  %2440 = vrot.lane.b32.xlu1 %v2431_v16, %s3043_s19  ;;  %v2494_v35 = vmul.f32 %v4443_v40, %v4550_v48  ;;  %v2493_v16 = vmul.f32 %v4443_v40, %v4542_v25 }
 0x71e   :  { %v5057_v21 = vpop.permute.xlu0 %2562  ;;  %v5059_v1 = vpop.permute.xlu1 %2537 }
 0x71f   :  { %5904 = vst [vmem:[#allocation51_spill] sm:$0xff] %v5057_v21  ;;  %5905 = vst [vmem:[#allocation48_spill] sm:$0xff] %v5059_v1 }
 0x720   :  { %2473 = vrot.lane.b32.xlu0 %v2463_v22, %s3044_s20  ;;  %2471 = vrot.lane.b32.xlu1 %v2462_v20, %s3044_s20  ;;  %v2525_v22 = vmul.f32 %v4447_v2, %v5868_v10  ;;  %v2524_v20 = vmul.f32 %v4447_v2, %v5870_v44 }
 0x722   :  { %v5067_v3 = vpop.permute.xlu0 %2593  ;;  %v5069_v51 = vpop.permute.xlu1 %2568 }
 0x723   :  { %5906 = vst [vmem:[#allocation50_spill] sm:$0xff] %v5067_v3  ;;  %5907 = vst [vmem:[#allocation49_spill] sm:$0xff] %v5069_v51 }
 0x724   :  { %2504 = vrot.lane.b32.xlu0 %v2494_v35, %s3044_s20  ;;  %2502 = vrot.lane.b32.xlu1 %v2493_v16, %s3044_s20  ;;  %v2556_v35 = vmul.f32 %v4455_v4, %v5871_v55  ;;  %v2555_v16 = vmul.f32 %v4455_v4, %v4579_v54 }
 0x726   :  { %v5077_v1 = vpop.permute.xlu0 %2624  ;;  %v5079_v53 = vpop.permute.xlu1 %2599 }
 0x727   :  { %5908 = vst [vmem:[#allocation55_spill] sm:$0xff] %v5077_v1  ;;  %5909 = vst [vmem:[#allocation52_spill] sm:$0xff] %v5079_v53 }
 0x728   :  { %2535 = vrot.lane.b32.xlu0 %v2525_v22, %s3044_s20  ;;  %2533 = vrot.lane.b32.xlu1 %v2524_v20, %s3044_s20  ;;  %v2587_v22 = vmul.f32 %v4459_v23, %v4535_v27  ;;  %v2586_v20 = vmul.f32 %v4459_v23, %v4532_v34 }
 0x72a   :  { %v5087_v51 = vpop.permute.xlu0 %2655  ;;  %v5089_v40 = vpop.permute.xlu1 %2630 }
 0x72b   :  { %5910 = vst [vmem:[#allocation54_spill] sm:$0xff] %v5087_v51  ;;  %5911 = vst [vmem:[#allocation53_spill] sm:$0xff] %v5089_v40 }
 0x72c   :  { %2566 = vrot.lane.b32.xlu0 %v2556_v35, %s3044_s20  ;;  %2564 = vrot.lane.b32.xlu1 %v2555_v16, %s3044_s20  ;;  %v2618_v35 = vmul.f32 %v4465_v5, %v4550_v48  ;;  %v2617_v16 = vmul.f32 %v4465_v5, %v4542_v25  ;;  %v2648_v48 = vmul.f32 %v4467_v41, %v5870_v44 }
 0x72e   :  { %v5097_v53 = vpop.permute.xlu0 %2686  ;;  %v5099_v2 = vpop.permute.xlu1 %2661 }
 0x72f   :  { %5912 = vst [vmem:[#allocation59_spill] sm:$0xff] %v5097_v53  ;;  %5913 = vst [vmem:[#allocation56_spill] sm:$0xff] %v5099_v2 }
 0x730   :  { %2597 = vrot.lane.b32.xlu0 %v2587_v22, %s3045_s21  ;;  %2595 = vrot.lane.b32.xlu1 %v2586_v20, %s3045_s21  ;;  %v2649_v22 = vmul.f32 %v4467_v41, %v5868_v10  ;;  %v2680_v20 = vmul.f32 %v4471_v50, %v5871_v55  ;;  %v2679_v10 = vmul.f32 %v4471_v50, %v4579_v54 }
 0x732   :  { %v1730_v40 = vpop.permute.xlu0 %1729  ;;  %v1728_v4 = vpop.permute.xlu1 %1727 }
 0x733   :  { %v1735_v53 = vsel %vm349_vm2, %v1730_v40, %v4797_v18  ;;  %v1733_v62 = vsel %vm349_vm2, %v4789_v45, %v1728_v4  ;;  %v1734_v33 = vsel %vm349_vm2, %v1728_v4, %v1730_v40  ;;  %v5918_v4 = vld [vmem:[#allocation18_spill] sm:$0xff] }
 0x734   :  { %v1742_v27 = vadd.f32 %v1735_v53, %v4649_v26  ;;  %2628 = vrot.lane.b32.xlu0 %v2618_v35, %s3045_s21  ;;  %2626 = vrot.lane.b32.xlu1 %v2617_v16, %s3045_s21  ;;  %v2681_v35 = vmul.f32 %v4471_v50, %v4603_v14  ;;  %v1740_v7 = vadd.f32 %v1733_v62, %v4653_v58 }
 0x736   :  { %v1761_v23 = vpop.permute.xlu0 %1760  ;;  %v1759_v34 = vpop.permute.xlu1 %1758 }
 0x737   :  { %v1766_v5 = vsel %vm349_vm2, %v1761_v23, %v4807_v19  ;;  %v1764_v32 = vsel %vm349_vm2, %v4799_v29, %v1759_v34  ;;  %v1765_v56 = vsel %vm349_vm2, %v1759_v34, %v1761_v23  ;;  %v1743_v29 = vadd.f32 %v4797_v18, %v5918_v4 }
 0x738   :  { %v5122_v25 = vadd.f32 %v1766_v5, %v1742_v27  ;;  %2659 = vrot.lane.b32.xlu0 %v2649_v22, %s3045_s21  ;;  %2657 = vrot.lane.b32.xlu1 %v2648_v48, %s3045_s21 }
 0x73a   :  { %v1792_v26 = vpop.permute.xlu0 %1791  ;;  %v1790_v53 = vpop.permute.xlu1 %1789 }
 0x73b   :  { %v1796_v45 = vsel %vm349_vm2, %v1790_v53, %v1792_v26 }
 0x73c   :  { %2690 = vrot.lane.b32.xlu0 %v2680_v20, %s3045_s21  ;;  %2688 = vrot.lane.b32.xlu1 %v2679_v10, %s3045_s21 }
 0x73e   :  { %v1823_v41 = vpop.permute.xlu0 %1822  ;;  %v1821_v44 = vpop.permute.xlu1 %1820 }
 0x73f   :  { %v1826_v23 = vsel %vm349_vm2, %v4819_v17, %v1821_v44  ;;  %v1827_v58 = vsel %vm349_vm2, %v1821_v44, %v1823_v41 }
 0x740   :  { %2692 = vrot.lane.b32.xlu1 %v2681_v35, %s3045_s21 }
 0x742   :  { %v1854_v16 = vpop.permute.xlu0 %1853  ;;  %v1852_v27 = vpop.permute.xlu1 %1851 }
 0x743   :  { %v1858_v18 = vsel %vm474_vm3, %v1852_v27, %v1854_v16 }
 0x746   :  { %v5135_v22 = vpop.permute.xlu0 %1884  ;;  %v1883_v48 = vpop.permute.xlu1 %1882 }
 0x74a   :  { %v5137_v55 = vpop.permute.xlu0 %1915  ;;  %v1914_v5 = vpop.permute.xlu1 %1913 }
 0x74e   :  { %v5139_v54 = vpop.permute.xlu0 %1946  ;;  %v1945_v20 = vpop.permute.xlu1 %1944 }
 0x752   :  { %v5141_v2 = vpop.permute.xlu0 %1977  ;;  %v5143_v10 = vpop.permute.xlu1 %1975 }
 0x756   :  { %v5145_v51 = vpop.permute.xlu0 %2008  ;;  %v5147_v50 = vpop.permute.xlu1 %2006 }
 0x75a   :  { %v5149_v14 = vpop.permute.xlu0 %2039  ;;  %v5151_v35 = vpop.permute.xlu1 %2037 }
 0x75e   :  { %v5153_v1 = vpop.permute.xlu0 %2070  ;;  %v5155_v3 = vpop.permute.xlu1 %2068 }
 0x762   :  { %v5157_v21 = vpop.permute.xlu0 %2101  ;;  %v5159_v37 = vpop.permute.xlu1 %2099 }
 0x766   :  { %v5161_v36 = vpop.permute.xlu0 %2132  ;;  %v5163_v60 = vpop.permute.xlu1 %2130 }
 0x76a   :  { %v5165_v57 = vpop.permute.xlu0 %2163  ;;  %v5167_v11 = vpop.permute.xlu1 %2161 }
 0x76b   :  { %5914 = vst [vmem:[#allocation58_spill] sm:$0xff] %v5165_v57  ;;  %5915 = vst [vmem:[#allocation57_spill] sm:$0xff] %v5167_v11  ;;  %v1741_v57 = vadd.f32 %v1734_v33, %v4655_v6 }
 0x76d   :  { %v1772_v40 = vadd.f32 %v1765_v56, %v1741_v57  ;;  %v1857_v56 = vsel %vm474_vm3, %v4827_v15, %v1852_v27 }
 0x76e   :  { %v5169_v30 = vpop.permute.xlu0 %2194  ;;  %v5171_v47 = vpop.permute.xlu1 %2192 }
 0x76f   :  { %5916 = vst [vmem:[#allocation63_spill] sm:$0xff] %v5169_v30  ;;  %5917 = vst [vmem:[#allocation60_spill] sm:$0xff] %v5171_v47  ;;  %v1795_v30 = vsel %vm349_vm2, %v4809_v31, %v1790_v53  ;;  %v1771_v47 = vadd.f32 %v1764_v32, %v1740_v7  ;;  %v1803_v33 = vadd.f32 %v1796_v45, %v1772_v40 }
 0x770   :  { %v1774_v31 = vadd.f32 %v4807_v19, %v1743_v29  ;;  %v1797_v7 = vsel %vm349_vm2, %v1792_v26, %v4817_v12  ;;  %v1889_v19 = vsel %vm474_vm3, %v1883_v48, %v5135_v22  ;;  %v1890_v29 = vsel %vm474_vm3, %v5135_v22, %v4849_v28 }
 0x771   :  { %v1802_v6 = vadd.f32 %v1795_v30, %v1771_v47  ;;  %v1834_v17 = vadd.f32 %v1827_v58, %v1803_v33  ;;  %v1828_v47 = vsel %vm349_vm2, %v1823_v41, %v4829_v13  ;;  %v1888_v30 = vsel %vm474_vm3, %v4837_v24, %v1883_v48 }
 0x772   :  { %v5181_v38 = vpop.permute.xlu0 %2225  ;;  %v5183_v11 = vpop.permute.xlu1 %2223  ;;  %v1805_v57 = vadd.f32 %v4817_v12, %v1774_v31  ;;  %v1804_v26 = vadd.f32 %v1797_v7, %v5122_v25  ;;  %v1859_v12 = vsel %vm474_vm3, %v1854_v16, %v4839_v42  ;;  %v1919_v41 = vsel %vm474_vm3, %v4847_v39, %v1914_v5 }
 0x773   :  { %v1833_v32 = vadd.f32 %v1826_v23, %v1802_v6  ;;  %v1865_v44 = vadd.f32 %v1858_v18, %v1834_v17  ;;  %v1920_v24 = vsel %vm474_vm3, %v1914_v5, %v5137_v55  ;;  %v1951_v16 = vsel %vm474_vm3, %v1945_v20, %v5139_v54 }
 0x774   :  { %v1836_v45 = vadd.f32 %v4829_v13, %v1805_v57  ;;  %v1835_v48 = vadd.f32 %v1828_v47, %v1804_v26  ;;  %v1950_v13 = vsel %vm474_vm3, %v4857_v46, %v1945_v20  ;;  %v1981_v46 = vsel %vm599_vm4, %v4867_v61, %v5143_v10 }
 0x775   :  { %v1864_v53 = vadd.f32 %v1857_v56, %v1833_v32  ;;  %v1896_v25 = vadd.f32 %v1889_v19, %v1865_v44  ;;  %v1982_v22 = vsel %vm599_vm4, %v5143_v10, %v5141_v2  ;;  %v2013_v61 = vsel %vm599_vm4, %v5147_v50, %v5145_v51 }
 0x776   :  { %v5193_v62 = vpop.permute.xlu0 %2256  ;;  %v5195_v34 = vpop.permute.xlu1 %2254  ;;  %v1867_v4 = vadd.f32 %v4839_v42, %v1836_v45  ;;  %v1866_v23 = vadd.f32 %v1859_v12, %v1835_v48  ;;  %v1921_v42 = vsel %vm474_vm3, %v5137_v55, %v4859_v8  ;;  %v2012_v55 = vsel %vm599_vm4, %v4877_v0, %v5147_v50 }
 0x777   :  { %v1895_v40 = vadd.f32 %v1888_v30, %v1864_v53  ;;  %v1927_v58 = vadd.f32 %v1920_v24, %v1896_v25  ;;  %v2043_v0 = vsel %vm599_vm4, %v4887_v52, %v5151_v35  ;;  %v2044_v50 = vsel %vm599_vm4, %v5151_v35, %v5149_v14  ;;  %v5919_v53 = vld [vmem:[#allocation17_spill] sm:$0xff]  ;;  %v5920_v24 = vld [vmem:[#allocation19_spill] sm:$0xff] }
 0x778   :  { %v1898_v33 = vadd.f32 %v4849_v28, %v1867_v4  ;;  %v1897_v20 = vadd.f32 %v1890_v29, %v1866_v23  ;;  %v1952_v28 = vsel %vm474_vm3, %v5139_v54, %v4869_v59  ;;  %v1983_v54 = vsel %vm599_vm4, %v5141_v2, %v4879_v43  ;;  %v5921_v29 = vld [vmem:[#allocation21_spill] sm:$0xff] }
 0x779   :  { %v1926_v39 = vadd.f32 %v1919_v41, %v1895_v40  ;;  %v1958_v7 = vadd.f32 %v1951_v16, %v1927_v58  ;;  %v2074_v2 = vsel %vm599_vm4, %v4897_v9, %v5155_v3  ;;  %v2075_v52 = vsel %vm599_vm4, %v5155_v3, %v5153_v1 }
 0x77a   :  { %v5211_v15 = vpop.permute.xlu0 %2287  ;;  %v5213_v27 = vpop.permute.xlu1 %2285  ;;  %v1929_v56 = vadd.f32 %v4859_v8, %v1898_v33  ;;  %v1928_v18 = vadd.f32 %v1921_v42, %v1897_v20  ;;  %v2105_v9 = vsel %vm724_vm5, %v4907_v63, %v5159_v37  ;;  %v2106_v3 = vsel %vm724_vm5, %v5159_v37, %v5157_v21  ;;  %v5922_v42 = vld [vmem:[#allocation20_spill] sm:$0xff]  ;;  %v5925_v20 = vld [vmem:[#allocation58_spill] sm:$0xff] }
 0x77b   :  { %v1957_v31 = vadd.f32 %v1950_v13, %v1926_v39  ;;  %v1989_v10 = vadd.f32 %v1982_v22, %v1958_v7  ;;  %v2076_v13 = vsel %vm599_vm4, %v5153_v1, %v5921_v29  ;;  %v2137_v63 = vsel %vm724_vm5, %v5163_v60, %v5161_v36  ;;  %v5924_v22 = vld [vmem:[#allocation22_spill] sm:$0xff] }
 0x77c   :  { %v1960_v8 = vadd.f32 %v4869_v59, %v1929_v56  ;;  %v1959_v47 = vadd.f32 %v1952_v28, %v1928_v18  ;;  %v2014_v59 = vsel %vm599_vm4, %v5145_v51, %v5919_v53  ;;  %v2045_v51 = vsel %vm599_vm4, %v5149_v14, %v5920_v24  ;;  %v5927_v18 = vld [vmem:[#allocation60_spill] sm:$0xff] }
 0x77d   :  { %v1988_v32 = vadd.f32 %v1981_v46, %v1957_v31  ;;  %v2020_v19 = vadd.f32 %v2013_v61, %v1989_v10  ;;  %v2136_v14 = vsel %vm724_vm5, %v4917_v49, %v5163_v60  ;;  %v2107_v1 = vsel %vm724_vm5, %v5157_v21, %v5922_v42  ;;  %v5923_v46 = vld [vmem:[#allocation57_spill] sm:$0xff]  ;;  %v5929_v10 = vld [vmem:[#allocation63_spill] sm:$0xff] }
 0x77e   :  { %v5230_v6 = vpop.permute.xlu0 %2318  ;;  %v5232_v5 = vpop.permute.xlu1 %2316  ;;  %v1991_v26 = vadd.f32 %v4879_v43, %v1960_v8  ;;  %v1990_v44 = vadd.f32 %v1983_v54, %v1959_v47  ;;  %v2167_v49 = vsel %vm724_vm5, %v5924_v22, %v5923_v46  ;;  %v2168_v60 = vsel %vm724_vm5, %v5923_v46, %v5925_v20  ;;  %v5937_v22 = vld [vmem:[#allocation35_spill] sm:$0xff] }
 0x77f   :  { %v2019_v30 = vadd.f32 %v2012_v55, %v1988_v32  ;;  %v2051_v35 = vadd.f32 %v2044_v50, %v2020_v19  ;;  %v5926_v55 = vld [vmem:[#allocation24_spill] sm:$0xff]  ;;  %v5928_v32 = vld [vmem:[#allocation23_spill] sm:$0xff]  ;;  %v2199_v8 = vsel %vm724_vm5, %v5927_v18, %v5929_v10 }
 0x780   :  { %v2022_v43 = vadd.f32 %v5919_v53, %v1991_v26  ;;  %v2021_v48 = vadd.f32 %v2014_v59, %v1990_v44  ;;  %v2138_v61 = vsel %vm724_vm5, %v5161_v36, %v5926_v55  ;;  %v2198_v21 = vsel %vm724_vm5, %v5928_v32, %v5927_v18  ;;  %v5930_v26 = vld [vmem:[#allocation25_spill] sm:$0xff]  ;;  %v5931_v53 = vld [vmem:[#allocation27_spill] sm:$0xff] }
 0x781   :  { %v2050_v45 = vadd.f32 %v2043_v0, %v2019_v30  ;;  %v2082_v25 = vadd.f32 %v2075_v52, %v2051_v35  ;;  %v2169_v36 = vsel %vm724_vm5, %v5925_v20, %v5930_v26  ;;  %v2229_v59 = vsel %vm849_vm6, %v5931_v53, %v5183_v11 }
 0x782   :  { %v5254_v17 = vpop.permute.xlu0 %2349  ;;  %v5256_v57 = vpop.permute.xlu1 %2347  ;;  %v2053_v4 = vadd.f32 %v5920_v24, %v2022_v43  ;;  %v2052_v16 = vadd.f32 %v2045_v51, %v2021_v48  ;;  %v5932_v43 = vld [vmem:[#allocation26_spill] sm:$0xff]  ;;  %v5933_v51 = vld [vmem:[#allocation29_spill] sm:$0xff] }
 0x783   :  { %v2081_v40 = vadd.f32 %v2074_v2, %v2050_v45  ;;  %v2113_v37 = vadd.f32 %v2106_v3, %v2082_v25  ;;  %v2230_v2 = vsel %vm849_vm6, %v5183_v11, %v5181_v38  ;;  %v2200_v24 = vsel %vm724_vm5, %v5929_v10, %v5932_v43 }
 0x784   :  { %v2084_v33 = vadd.f32 %v5921_v29, %v2053_v4  ;;  %v2083_v31 = vadd.f32 %v2076_v13, %v2052_v16  ;;  %v2261_v3 = vsel %vm849_vm6, %v5195_v34, %v5193_v62  ;;  %v5934_v13 = vld [vmem:[#allocation28_spill] sm:$0xff]  ;;  %v2354_v18 = vsel %vm974_vm7, %v5256_v57, %v5254_v17 }
 0x785   :  { %v2112_v23 = vadd.f32 %v2105_v9, %v2081_v40  ;;  %v2144_v56 = vadd.f32 %v2137_v63, %v2113_v37  ;;  %v2260_v9 = vsel %vm849_vm6, %v5933_v51, %v5195_v34  ;;  %v5935_v63 = vld [vmem:[#allocation31_spill] sm:$0xff]  ;;  %v2292_v34 = vsel %vm849_vm6, %v5213_v27, %v5211_v15  ;;  %v5944_v51 = vld [vmem:[#allocation37_spill] sm:$0xff] }
 0x786   :  { %v5278_v12 = vpop.permute.xlu0 %2380  ;;  %v5280_v41 = vpop.permute.xlu1 %2378  ;;  %v2115_v28 = vadd.f32 %v5922_v42, %v2084_v33  ;;  %v2114_v54 = vadd.f32 %v2107_v1, %v2083_v31  ;;  %v2291_v16 = vsel %vm849_vm6, %v5935_v63, %v5213_v27  ;;  %v5936_v1 = vld [vmem:[#allocation30_spill] sm:$0xff]  ;;  %v5946_v63 = vld [vmem:[#allocation40_spill] sm:$0xff] }
 0x787   :  { %v2143_v7 = vadd.f32 %v2136_v14, %v2112_v23  ;;  %v2175_v50 = vadd.f32 %v2168_v60, %v2144_v56  ;;  %v2231_v14 = vsel %vm849_vm6, %v5181_v38, %v5934_v13  ;;  %v2262_v46 = vsel %vm849_vm6, %v5193_v62, %v5936_v1  ;;  %v5939_v62 = vld [vmem:[#allocation34_spill] sm:$0xff] }
 0x788   :  { %v2146_v19 = vadd.f32 %v5926_v55, %v2115_v28  ;;  %v2145_v52 = vadd.f32 %v2138_v61, %v2114_v54  ;;  %v2322_v38 = vsel %vm849_vm6, %v5937_v22, %v5232_v5  ;;  %v5938_v28 = vld [vmem:[#allocation32_spill] sm:$0xff]  ;;  %v2353_v61 = vsel %vm974_vm7, %v5939_v62, %v5256_v57  ;;  %v5949_v22 = vld [vmem:[#allocation47_spill] sm:$0xff]  ;;  %v5951_v62 = vld [vmem:[#allocation46_spill] sm:$0xff] }
 0x789   :  { %v2174_v0 = vadd.f32 %v2167_v49, %v2143_v7  ;;  %v2206_v45 = vadd.f32 %v2199_v8, %v2175_v50  ;;  %v2323_v49 = vsel %vm849_vm6, %v5232_v5, %v5230_v6  ;;  %v2293_v55 = vsel %vm849_vm6, %v5211_v15, %v5938_v28  ;;  %v5940_v8 = vld [vmem:[#allocation33_spill] sm:$0xff] }
 0x78a   :  { %v5302_v39 = vpop.permute.xlu0 %2411  ;;  %v5304_v58 = vpop.permute.xlu1 %2409  ;;  %v2177_v35 = vadd.f32 %v5930_v26, %v2146_v19  ;;  %v2176_v48 = vadd.f32 %v2169_v36, %v2145_v52  ;;  %v2324_v54 = vsel %vm849_vm6, %v5230_v6, %v5940_v8  ;;  %v2385_v50 = vsel %vm974_vm7, %v5280_v41, %v5278_v12  ;;  %v5943_v6 = vld [vmem:[#allocation38_spill] sm:$0xff] }
 0x78b   :  { %v2205_v44 = vadd.f32 %v2198_v21, %v2174_v0  ;;  %v2237_v11 = vadd.f32 %v2230_v2, %v2206_v45  ;;  %v5941_v0 = vld [vmem:[#allocation39_spill] sm:$0xff]  ;;  %v5942_v2 = vld [vmem:[#allocation36_spill] sm:$0xff]  ;;  %v2416_v45 = vsel %vm974_vm7, %v5304_v58, %v5302_v39 }
 0x78c   :  { %v2208_v29 = vadd.f32 %v5932_v43, %v2177_v35  ;;  %v2207_v23 = vadd.f32 %v2200_v24, %v2176_v48  ;;  %v2384_v15 = vsel %vm974_vm7, %v5941_v0, %v5280_v41  ;;  %v2355_v52 = vsel %vm974_vm7, %v5254_v17, %v5942_v2 }
 0x78d   :  { %v2236_v40 = vadd.f32 %v2229_v59, %v2205_v44  ;;  %v2268_v33 = vadd.f32 %v2261_v3, %v2237_v11  ;;  %v2415_v44 = vsel %vm974_vm7, %v5943_v6, %v5304_v58  ;;  %v5945_v3 = vld [vmem:[#allocation43_spill] sm:$0xff] }
 0x78e   :  { %v5326_v47 = vpop.permute.xlu0 %2442  ;;  %v2441_v30 = vpop.permute.xlu1 %2440  ;;  %v2239_v42 = vadd.f32 %v5934_v13, %v2208_v29  ;;  %v2238_v20 = vadd.f32 %v2231_v14, %v2207_v23 }
 0x78f   :  { %v2267_v37 = vadd.f32 %v2260_v9, %v2236_v40  ;;  %v2299_v27 = vadd.f32 %v2292_v34, %v2268_v33  ;;  %v2386_v9 = vsel %vm974_vm7, %v5278_v12, %v5944_v51  ;;  %v2446_v17 = vsel %vm974_vm7, %v5945_v3, %v2441_v30  ;;  %v5947_v34 = vld [vmem:[#allocation42_spill] sm:$0xff] }
 0x790   :  { %v2270_v56 = vadd.f32 %v5936_v1, %v2239_v42  ;;  %v2269_v5 = vadd.f32 %v2262_v46, %v2238_v20  ;;  %v2447_v48 = vsel %vm974_vm7, %v2441_v30, %v5326_v47  ;;  %v5948_v1 = vld [vmem:[#allocation41_spill] sm:$0xff] }
 0x791   :  { %v2298_v60 = vadd.f32 %v2291_v16, %v2267_v37  ;;  %v2330_v21 = vadd.f32 %v2323_v49, %v2299_v27  ;;  %v2417_v16 = vsel %vm974_vm7, %v5302_v39, %v5946_v63  ;;  %v2448_v46 = vsel %vm974_vm7, %v5326_v47, %v5948_v1 }
 0x792   :  { %v5348_v25 = vpop.permute.xlu0 %2473  ;;  %v2472_v4 = vpop.permute.xlu1 %2471  ;;  %v2301_v10 = vadd.f32 %v5938_v28, %v2270_v56  ;;  %v2300_v19 = vadd.f32 %v2293_v55, %v2269_v5  ;;  %v5950_v28 = vld [vmem:[#allocation44_spill] sm:$0xff] }
 0x793   :  { %v2329_v32 = vadd.f32 %v2322_v38, %v2298_v60  ;;  %v2361_v57 = vadd.f32 %v2354_v18, %v2330_v21  ;;  %v2477_v12 = vsel %vm1099_vm8, %v5947_v34, %v2472_v4  ;;  %v2478_v23 = vsel %vm1099_vm8, %v2472_v4, %v5348_v25  ;;  %v5952_v21 = vld [vmem:[#allocation45_spill] sm:$0xff] }
 0x794   :  { %v2332_v59 = vadd.f32 %v5940_v8, %v2301_v10  ;;  %v2331_v41 = vadd.f32 %v2324_v54, %v2300_v19  ;;  %v2479_v55 = vsel %vm1099_vm8, %v5348_v25, %v5950_v28  ;;  %v5953_v8 = vld [vmem:[#allocation51_spill] sm:$0xff] }
 0x795   :  { %v2360_v26 = vadd.f32 %v2353_v61, %v2329_v32  ;;  %v2392_v43 = vadd.f32 %v2385_v50, %v2361_v57 }
 0x796   :  { %v2505_v31 = vpop.permute.xlu0 %2504  ;;  %v2503_v7 = vpop.permute.xlu1 %2502  ;;  %v2363_v24 = vadd.f32 %v5942_v2, %v2332_v59  ;;  %v2362_v40 = vadd.f32 %v2355_v52, %v2331_v41  ;;  %v5955_v2 = vld [vmem:[#allocation50_spill] sm:$0xff] }
 0x797   :  { %v2391_v35 = vadd.f32 %v2384_v15, %v2360_v26  ;;  %v2423_v29 = vadd.f32 %v2416_v45, %v2392_v43  ;;  %v2508_v38 = vsel %vm1099_vm8, %v5949_v22, %v2503_v7  ;;  %v2509_v39 = vsel %vm1099_vm8, %v2503_v7, %v2505_v31 }
 0x798   :  { %v2394_v14 = vadd.f32 %v5944_v51, %v2363_v24  ;;  %v2393_v37 = vadd.f32 %v2386_v9, %v2362_v40  ;;  %v2510_v10 = vsel %vm1099_vm8, %v2505_v31, %v5952_v21  ;;  %v5957_v24 = vld [vmem:[#allocation55_spill] sm:$0xff] }
 0x799   :  { %v2422_v11 = vadd.f32 %v2415_v44, %v2391_v35  ;;  %v2454_v30 = vadd.f32 %v2447_v48, %v2423_v29  ;;  %v5956_v35 = vld [vmem:[#allocation49_spill] sm:$0xff]  ;;  %v5958_v29 = vld [vmem:[#allocation52_spill] sm:$0xff] }
 0x79a   :  { %v2536_v36 = vpop.permute.xlu0 %2535  ;;  %v2534_v53 = vpop.permute.xlu1 %2533  ;;  %v2425_v42 = vadd.f32 %v5946_v63, %v2394_v14  ;;  %v2424_v49 = vadd.f32 %v2417_v16, %v2393_v37  ;;  %v5959_v14 = vld [vmem:[#allocation54_spill] sm:$0xff]  ;;  %v5960_v37 = vld [vmem:[#allocation53_spill] sm:$0xff] }
 0x79b   :  { %v2453_v33 = vadd.f32 %v2446_v17, %v2422_v11  ;;  %v2485_v60 = vadd.f32 %v2478_v23, %v2454_v30  ;;  %v2539_v61 = vsel %vm1099_vm8, %v5951_v62, %v2534_v53  ;;  %v2540_v47 = vsel %vm1099_vm8, %v2534_v53, %v2536_v36  ;;  %v5954_v53 = vld [vmem:[#allocation48_spill] sm:$0xff] }
 0x79c   :  { %v2456_v4 = vadd.f32 %v5948_v1, %v2425_v42  ;;  %v2455_v18 = vadd.f32 %v2448_v46, %v2424_v49  ;;  %v2541_v59 = vsel %vm1099_vm8, %v2536_v36, %v5954_v53 }
 0x79d   :  { %v2484_v20 = vadd.f32 %v2477_v12, %v2453_v33  ;;  %v2516_v32 = vadd.f32 %v2509_v39, %v2485_v60  ;;  %v5961_v39 = vld [vmem:[#allocation56_spill] sm:$0xff] }
 0x79e   :  { %v2567_v13 = vpop.permute.xlu0 %2566  ;;  %v2565_v58 = vpop.permute.xlu1 %2564  ;;  %v2487_v7 = vadd.f32 %v5950_v28, %v2456_v4  ;;  %v2486_v15 = vadd.f32 %v2479_v55, %v2455_v18 }
 0x79f   :  { %v2515_v5 = vadd.f32 %v2508_v38, %v2484_v20  ;;  %v2570_v54 = vsel %vm1099_vm8, %v5953_v8, %v2565_v58  ;;  %v2571_v0 = vsel %vm1099_vm8, %v2565_v58, %v2567_v13  ;;  %v2547_v50 = vadd.f32 %v2540_v47, %v2516_v32  ;;  %v5962_v20 = vld [vmem:[#allocation59_spill] sm:$0xff] }
 0x7a0   :  { %v2518_v57 = vadd.f32 %v5952_v21, %v2487_v7  ;;  %v2517_v6 = vadd.f32 %v2510_v10, %v2486_v15  ;;  %v2572_v43 = vsel %vm1099_vm8, %v2567_v13, %v5956_v35 }
 0x7a1   :  { %v2546_v25 = vadd.f32 %v2539_v61, %v2515_v5  ;;  %v2578_v45 = vadd.f32 %v2571_v0, %v2547_v50 }
 0x7a2   :  { %v2598_v27 = vpop.permute.xlu0 %2597  ;;  %v2596_v56 = vpop.permute.xlu1 %2595  ;;  %v2549_v41 = vadd.f32 %v5954_v53, %v2518_v57  ;;  %v2548_v3 = vadd.f32 %v2541_v59, %v2517_v6 }
 0x7a3   :  { %v2601_v52 = vsel %vm1224_vm9, %v5955_v2, %v2596_v56  ;;  %v2602_v31 = vsel %vm1224_vm9, %v2596_v56, %v2598_v27  ;;  %v2577_v44 = vadd.f32 %v2570_v54, %v2546_v25  ;;  %v2603_v58 = vsel %vm1224_vm9, %v2598_v27, %v5958_v29 }
 0x7a4   :  { %v2609_v17 = vadd.f32 %v2602_v31, %v2578_v45  ;;  %v2580_v11 = vadd.f32 %v5956_v35, %v2549_v41  ;;  %v2579_v16 = vadd.f32 %v2572_v43, %v2548_v3 }
 0x7a5   :  { %v2608_v36 = vadd.f32 %v2601_v52, %v2577_v44 }
 0x7a6   :  { %v2629_v19 = vpop.permute.xlu0 %2628  ;;  %v2627_v26 = vpop.permute.xlu1 %2626  ;;  %v2611_v23 = vadd.f32 %v5958_v29, %v2580_v11  ;;  %v2610_v30 = vadd.f32 %v2603_v58, %v2579_v16 }
 0x7a7   :  { %v2632_v51 = vsel %vm1224_vm9, %v5957_v24, %v2627_v26  ;;  %v2633_v9 = vsel %vm1224_vm9, %v2627_v26, %v2629_v19  ;;  %v2634_v33 = vsel %vm1224_vm9, %v2629_v19, %v5960_v37 }
 0x7a8   :  { %v2639_v34 = vadd.f32 %v2632_v51, %v2608_v36  ;;  %v2640_v12 = vadd.f32 %v2633_v9, %v2609_v17  ;;  %v2642_v38 = vadd.f32 %v5960_v37, %v2611_v23  ;;  %v2641_v56 = vadd.f32 %v2634_v33, %v2610_v30 }
 0x7aa   :  { %v2660_v48 = vpop.permute.xlu0 %2659  ;;  %v2658_v40 = vpop.permute.xlu1 %2657  ;;  %v2673_v55 = vadd.f32 %v5961_v39, %v2642_v38 }
 0x7ab   :  { %v2663_v63 = vsel %vm1224_vm9, %v5959_v14, %v2658_v40  ;;  %v2664_v13 = vsel %vm1224_vm9, %v2658_v40, %v2660_v48  ;;  %v2665_v49 = vsel %vm1224_vm9, %v2660_v48, %v5961_v39 }
 0x7ac   :  { %v2670_v42 = vadd.f32 %v2663_v63, %v2639_v34  ;;  %v2671_v1 = vadd.f32 %v2664_v13, %v2640_v12  ;;  %v2672_v62 = vadd.f32 %v2665_v49, %v2641_v56  ;;  %v2875_v49 = vld [vmem:[%s5559_s5 + $0x8] sm:$0xff]  ;;  %v2813_v56 = vld [vmem:[%s5555_s0 + $0x10] sm:$0xff] }
 0x7ae   :  { %v2691_v46 = vpop.permute.xlu0 %2690  ;;  %v2689_v22 = vpop.permute.xlu1 %2688 }
 0x7af   :  { %v2694_v60 = vsel %vm1224_vm9, %v5962_v20, %v2689_v22  ;;  %v2695_v27 = vsel %vm1224_vm9, %v2689_v22, %v2691_v46  ;;  %v2785_v22 = vld [vmem:[%s5559_s5] sm:$0xff] }
 0x7b0   :  { %v5463_v4 = vadd.f32 %v2694_v60, %v2670_v42  ;;  %v5465_v28 = vadd.f32 %v2695_v27, %v2671_v1  ;;  %v2811_v60 = vld [vmem:[%s5555_s0] sm:$0xff] }
 0x7b2   :  { %2711 = vrot.lane.b32.xlu1 %v5465_v28, %s3046_s22  ;;  %2709 = vrot.lane.b32.xlu0 %v5463_v4, %s3046_s22  ;;  %v2693_v61 = vpop.permute.xlu1 %2692 }
 0x7b3   :  { %v2696_v47 = vsel %vm1224_vm9, %v2691_v46, %v2693_v61  ;;  %v5473_v18 = vadd.f32 %v2693_v61, %v2673_v55  ;;  %v2812_v55 = vld [vmem:[%s5555_s0 + $0x8] sm:$0xff] }
 0x7b4   :  { %v5475_v5 = vadd.f32 %v2696_v47, %v2672_v62  ;;  %v2814_v62 = vld [vmem:[%s5555_s0 + $0x18] sm:$0xff] }
 0x7b6   :  { %2715 = vrot.lane.b32.xlu1 %v5473_v18, %s3046_s22  ;;  %2713 = vrot.lane.b32.xlu0 %v5475_v5, %s3046_s22 }
 0x824   :  { %v2710_v32 = vpop.permute.xlu0 %2709  ;;  %v2712_v7 = vpop.permute.xlu1 %2711 }
 0x825   :  { %v2717_v21 = vsel %vm1341_vm10, %v2710_v32, %v2712_v7 }
 0x826   :  { %v2723_v25 = vsel %vm4274_vm11, %v2717_v21, 0.0 }
 0x828   :  { %v2714_v10 = vpop.permute.xlu0 %2713  ;;  %v2716_v8 = vpop.permute.xlu1 %2715 }
 0x829   :  { %v2718_v54 = vsel %vm1341_vm10, %v2712_v7, %v2714_v10  ;;  %v2719_v0 = vsel %vm1341_vm10, %v2714_v10, %v2716_v8 }
 0x82a   :  { %v2724_v19 = vsel %vm4279_vm12, %v2718_v54, 0.0  ;;  %v2725_v53 = vsel %vm4283_vm13, %v2719_v0, 0.0 }
 0x82b   :  { %v2726_v26 = vadd.f32 %v2724_v19, %v2723_v25 }
 0x82d   :  { %v2727_v59 = vadd.f32 %v2726_v26, %v2725_v53 }
 0x82f   :  { %2728 = vadd.xlane.f32.xlu0 %v2727_v59 }
 0x8bc   :  { %v2729_v2 = vpop.xlane.xlu0 %2728 }
 0x8bd   :  { %v2731_v52 = vrot.slane %v2729_v2, 4 }
 0x8bf   :  { %v2733_v31 = vadd.f32 %v2731_v52, %v2729_v2 }
 0x8c1   :  { %v2735_v6 = vrot.slane %v2733_v31, 4 }
 0x8c3   :  { %v2737_v44 = vsel %vm88_vm0, %v2733_v31, %v2735_v6 }
 0x8c4   :  { %v2738_v45 = vmul.f32 0.001953125, %v2737_v44 }
 0x8c6   :  { %2741 = vperm.xlu1 %2995, %v2738_v45  }
 0x945   :  { %v2742_v41 = vpop.permute.xlu1 %2741 }
 0x946   :  { %v2744_v35 = vsub.f32 %v5463_v4, %v2742_v41  ;;  %v2745_v43 = vsub.f32 %v5465_v28, %v2742_v41  ;;  %v2746_v24 = vsub.f32 %v5475_v5, %v2742_v41  ;;  %v2747_v51 = vsub.f32 %v5473_v18, %v2742_v41 }
 0x948   :  { %2752 = vrot.lane.b32.xlu1 %v2744_v35, %s3046_s22 }
 0x94c   :  { %2754 = vrot.lane.b32.xlu1 %v2745_v43, %s3046_s22 }
 0x950   :  { %2756 = vrot.lane.b32.xlu1 %v2746_v24, %s3046_s22 }
 0x954   :  { %2758 = vrot.lane.b32.xlu1 %v2747_v51, %s3046_s22 }
 0x9ba   :  { %v2753_v9 = vpop.permute.xlu1 %2752 }
 0x9be   :  { %v2755_v3 = vpop.permute.xlu1 %2754 }
 0x9bf   :  { %v2760_v36 = vsel %vm1341_vm10, %v2753_v9, %v2755_v3 }
 0x9c0   :  { %v2766_v40 = vsel %vm4274_vm11, %v2760_v36, 0.0 }
 0x9c1   :  { %v2769_v14 = vmul.f32 %v2766_v40, %v2766_v40 }
 0x9c2   :  { %v2757_v17 = vpop.permute.xlu1 %2756 }
 0x9c3   :  { %v2761_v48 = vsel %vm1341_vm10, %v2755_v3, %v2757_v17 }
 0x9c4   :  { %v2767_v11 = vsel %vm4279_vm12, %v2761_v48, 0.0 }
 0x9c5   :  { %v2770_v29 = vmul.f32 %v2767_v11, %v2767_v11 }
 0x9c6   :  { %v2759_v58 = vpop.permute.xlu1 %2758 }
 0x9c7   :  { %v2762_v63 = vsel %vm1341_vm10, %v2757_v17, %v2759_v58  ;;  %v2772_v16 = vadd.f32 %v2770_v29, %v2769_v14 }
 0x9c8   :  { %v2768_v13 = vsel %vm4283_vm13, %v2762_v63, 0.0 }
 0x9c9   :  { %v2771_v34 = vmul.f32 %v2768_v13, %v2768_v13 }
 0x9cb   :  { %v2773_v12 = vadd.f32 %v2772_v16, %v2771_v34 }
 0x9cd   :  { %2774 = vadd.xlane.f32.xlu1 %v2773_v12 }
 0xa5a   :  { %v2775_v23 = vpop.xlane.xlu1 %2774 }
 0xa5b   :  { %v2777_v37 = vrot.slane %v2775_v23, 4 }
 0xa5d   :  { %v2779_v33 = vadd.f32 %v2777_v37, %v2775_v23 }
 0xa5f   :  { %v2781_v30 = vrot.slane %v2779_v33, 4 }
 0xa61   :  { %v2783_v42 = vsel %vm88_vm0, %v2779_v33, %v2781_v30 }
 0xa62   :  { %v2784_v1 = vmul.f32 0.001953125, %v2783_v42 }
 0xa64   :  { %v2786_v46 = vadd.f32 1e-05, %v2784_v1 }
 0xa66   :  { %2998 = vrsqrt.f32 %v2786_v46 }
 0xa70   :  { %v2999_v38 = vpop.eup %2998 }
 0xa71   :  { %v2788_v39 = vmul.f32 %v2999_v38, %v2785_v22 }
 0xa73   :  { %2795 = vperm.xlu0 %2992, %v2788_v39   ;;  %v2791_v20 = vmul.f32 %v2788_v39, %v2738_v45 }
 0xa75   :  { %v2792_v27 = vsub.f32 %v2875_v49, %v2791_v20 }
 0xa77   :  { %2804 = vperm.xlu1 %2995, %v2792_v27   ;;  %2819 = vrot.lane.b32.xlu0 %v2811_v60, %s3041_s17 }
 0xa7b   :  { %2823 = vrot.lane.b32.xlu0 %v2813_v56, %s3041_s17  ;;  %2821 = vrot.lane.b32.xlu1 %v2812_v55, %s3041_s17 }
 0xa7f   :  { %2825 = vrot.lane.b32.xlu1 %v2814_v62, %s3041_s17 }
 0xaf2   :  { %v2796_v61 = vpop.permute.xlu0 %2795 }
 0xaf3   :  { %v2798_v7 = vmul.f32 %v2796_v61, %v5463_v4  ;;  %v2799_v21 = vmul.f32 %v2796_v61, %v5465_v28  ;;  %v2801_v50 = vmul.f32 %v2796_v61, %v5473_v18  ;;  %v2800_v19 = vmul.f32 %v2796_v61, %v5475_v5 }
 0xaf6   :  { %v2820_v47 = vpop.permute.xlu0 %2819  ;;  %v2805_v32 = vpop.permute.xlu1 %2804 }
 0xaf7   :  { %v2807_v8 = vadd.f32 %v2805_v32, %v2798_v7  ;;  %v2808_v54 = vadd.f32 %v2805_v32, %v2799_v21  ;;  %v2810_v53 = vadd.f32 %v2805_v32, %v2801_v50  ;;  %v2809_v4 = vadd.f32 %v2805_v32, %v2800_v19 }
 0xafa   :  { %v2824_v10 = vpop.permute.xlu0 %2823  ;;  %v2822_v0 = vpop.permute.xlu1 %2821 }
 0xafb   :  { %v2827_v15 = vsel %vm724_vm5, %v2820_v47, %v2822_v0  ;;  %v2828_v25 = vsel %vm724_vm5, %v2822_v0, %v2824_v10 }
 0xafc   :  { %v2834_v26 = vadd.f32 %v2827_v15, %v2807_v8  ;;  %v2835_v57 = vadd.f32 %v2828_v25, %v2808_v54 }
 0xafe   :  { %v2838_v59 = vmax.f32 %v2834_v26, 0.0  ;;  %v2839_v2 = vmax.f32 %v2835_v57, 0.0  ;;  %v2826_v52 = vpop.permute.xlu1 %2825 }
 0xaff   :  { %v2829_v28 = vsel %vm724_vm5, %v2824_v10, %v2826_v52  ;;  %v2837_v31 = vadd.f32 %v2826_v52, %v2810_v53 }
 0xb00   :  { %v2836_v6 = vadd.f32 %v2829_v28, %v2809_v4  ;;  %2848 = vrot.lane.b32.xlu1 %v2839_v2, %s3046_s22  ;;  %2846 = vrot.lane.b32.xlu0 %v2838_v59, %s3046_s22 }
 0xb01   :  { %v2841_v44 = vmax.f32 %v2837_v31, 0.0 }
 0xb02   :  { %v2840_v45 = vmax.f32 %v2836_v6, 0.0 }
 0xb04   :  { %2852 = vrot.lane.b32.xlu1 %v2841_v44, %s3046_s22  ;;  %2850 = vrot.lane.b32.xlu0 %v2840_v45, %s3046_s22 }
 0xb72   :  { %v2847_v18 = vpop.permute.xlu0 %2846  ;;  %v2849_v5 = vpop.permute.xlu1 %2848 }
 0xb73   :  { %v2854_v41 = vsel %vm1341_vm10, %v2847_v18, %v2849_v5 }
 0xb74   :  { %2860 = vst [vmem:[%s5560_s6] sm:$0xff] %v2854_v41 }
 0xb76   :  { %v2851_v35 = vpop.permute.xlu0 %2850  ;;  %v2853_v43 = vpop.permute.xlu1 %2852 }
 0xb77   :  { %v2855_v24 = vsel %vm1341_vm10, %v2849_v5, %v2851_v35  ;;  %v2856_v51 = vsel %vm1341_vm10, %v2851_v35, %v2853_v43 }
 0xb78   :  { %2861 = vst [vmem:[%s5560_s6 + $0x8] sm:$0xff] %v2855_v24  ;;  %2862 = vst [vmem:[%s5560_s6 + $0x10] sm:$0xff] %v2856_v51 }

</bundles_post_ra>
